<compile_context>
chip_gen: v6e
topology: v6e:2x2x1
jax: 0.10.0
libtpu: 0.0.40
codegen_flags: <defaults>
</compile_context>

<pallas_src>
import math
import functools

import jax
import jax.numpy as jnp
from jax import lax
from jax.experimental import pallas as pl
from jax.experimental.pallas import tpu as pltpu


def _modconv_kernel(s_ref, w_ref, x_ref, out_ref, xpad_scr, *,
                    in_ch, ksize, H, W, tile_h, pad, demodulate, eps,
                    compute_dtype):
    """One grid step == (batch element b, spatial row-tile ti).

    s_ref    : (1, 1, kk*Cin)      conv_scale * per-sample modulation, [tap, cin] order
    w_ref    : (Cout, kk*Cin)      shared base weight, column index = tap*Cin + cin
    x_ref    : (1, Cin, H, W)      full per-sample input (resident across the tile axis)
    out_ref  : (1, Cout, tile_h*W) lane-dense output rows of this tile
    xpad_scr : (Cin, tile_h+2p, W+2p) zero-padded input window (compute dtype)
    """
    kk = ksize * ksize
    p, th = pad, tile_h
    cdt = compute_dtype

    # ---- modulate + demodulate the shared weight in f32 ----------------------
    w = w_ref[...] * s_ref[0]                                       # (Cout, kk*Cin)
    if demodulate:
        w = w * lax.rsqrt(jnp.sum(w * w, axis=1, keepdims=True) + eps)
    w = w.astype(cdt)

    # ---- fill the padded window scratch (interior copy + halo-only zeroing) --
    if th == H:
        # Single spatial tile: fully static padding writes.
        if p > 0:
            xpad_scr[:, :, 0:p] = jnp.zeros((in_ch, H + 2 * p, p), cdt)
            xpad_scr[:, :, p + W:p + W + p] = jnp.zeros((in_ch, H + 2 * p, p), cdt)
            xpad_scr[:, 0:p, :] = jnp.zeros((in_ch, p, W + 2 * p), cdt)
            xpad_scr[:, p + H:p + H + p, :] = jnp.zeros((in_ch, p, W + 2 * p), cdt)
        xpad_scr[:, p:p + H, p:p + W] = x_ref[0].astype(cdt)
    else:
        ti = pl.program_id(1)
        r0 = pl.multiple_of(ti * th, th)            # first image row of this tile
        if p > 0:
            zcol = jnp.zeros((in_ch, th + 2 * p, p), cdt)
            xpad_scr[:, :, 0:p] = zcol
            xpad_scr[:, :, p + W:p + W + p] = zcol
        xpad_scr[:, p:p + th, p:p + W] = x_ref[0, :, pl.ds(r0, th), :].astype(cdt)
        if p > 0:
            zrow = jnp.zeros((in_ch, p, W), cdt)
            last = pl.num_programs(1) - 1

            @pl.when(ti == 0)
            def _():
                xpad_scr[:, 0:p, p:p + W] = zrow

            @pl.when(ti > 0)
            def _():
                xpad_scr[:, 0:p, p:p + W] = (
                    x_ref[0, :, pl.ds(r0 - p, p), :].astype(cdt))

            @pl.when(ti == last)
            def _():
                xpad_scr[:, p + th:p + th + p, p:p + W] = zrow

            @pl.when(ti < last)
            def _():
                xpad_scr[:, p + th:p + th + p, p:p + W] = (
                    x_ref[0, :, pl.ds(r0 + th, p), :].astype(cdt))

    # ---- k*k shallow MXU matmuls accumulated in f32 (no materialized im2col) -
    acc = None
    for t in range(kk):                               # static unroll, k*k small
        ky, kx = divmod(t, ksize)
        win = xpad_scr[:, ky:ky + th, kx:kx + W].reshape(in_ch, th * W)
        part = jnp.dot(w[:, t * in_ch:(t + 1) * in_ch], win,
                       preferred_element_type=jnp.float32)
        acc = part if acc is None else acc + part
    out_ref[0, :, :] = acc.astype(out_ref.dtype)


def _choose_tile_h(H, W, pad, max_lanes=4096):
    """Largest row-tile height dividing H with tile_h*W a multiple of 128 and at
    most `max_lanes` lanes; falls back to the full height (always legal)."""
    if H * W <= max_lanes:
        return H
    for h in range(H, 0, -1):
        if H % h or h < max(pad, 1):
            continue
        if h * W > max_lanes or (h * W) % 128:
            continue
        return h
    return H


def modulated_conv2d(x, style, base_weight, mod_weight, mod_bias, *,
                     demodulate=True, compute_dtype=jnp.bfloat16,
                     tile_h=None, out_dtype=None):
    """StyleGAN2 ModulatedConv2d forward (n_kernel=1, no up/downsample).

    x           : (B, Cin, H, W) NCHW activations (pass bf16 to halve input DMA)
    style       : (B, style_dim)
    base_weight : (Cout, Cin, k, k)  == self.weight[0]
    mod_weight  : (Cin, style_dim)   == EqualLinear.weight
    mod_bias    : (Cin,)             == EqualLinear.bias (bias_init=1)
    """
    B, Cin, H, W = x.shape
    Cout, _, k, _ = base_weight.shape
    style_dim = style.shape[-1]
    kk = k * k
    pad = k // 2
    out_dtype = x.dtype if out_dtype is None else out_dtype

    conv_scale = 1.0 / math.sqrt(Cin * kk)       # ModulatedConv2d.scale
    mod_scale = 1.0 / math.sqrt(style_dim)       # EqualLinear scale (lr_mul=1)

    # Hoisted EqualLinear modulation; conv_scale folded into s (saves a VALU
    # pass over (Cout, kk*Cin) per grid step).
    s = (style @ (mod_weight * mod_scale).T + mod_bias) * conv_scale     # (B, Cin)
    s_tiled = jnp.tile(s, (1, kk)).reshape(B, 1, kk * Cin).astype(jnp.float32)

    # Base conv weight flattened so column index = tap*Cin + cin.
    w2d = jnp.transpose(base_weight, (0, 2, 3, 1)).reshape(Cout, kk * Cin)
    w2d = w2d.astype(jnp.float32)

    if tile_h is None:
        tile_h = _choose_tile_h(H, W, pad)
    assert H % tile_h == 0 and tile_h >= max(pad, 1)
    assert tile_h == H or (tile_h * W) % 128 == 0, "row tile must be lane-aligned"
    n_tiles = H // tile_h

    kernel = functools.partial(
        _modconv_kernel, in_ch=Cin, ksize=k, H=H, W=W, tile_h=tile_h, pad=pad,
        demodulate=demodulate, eps=1e-8, compute_dtype=compute_dtype)

    # Advisory cost estimate for XLA's scheduler.
    x_bytes = x.dtype.itemsize
    o_bytes = jnp.dtype(out_dtype).itemsize
    c_bytes = jnp.dtype(compute_dtype).itemsize
    flops = 2 * B * Cout * Cin * kk * H * W
    bytes_accessed = int(x.size * x_bytes + s_tiled.size * 4 + w2d.size * 4
                         + B * Cout * H * W * o_bytes)
    cost = pl.CostEstimate(flops=flops, transcendentals=B * n_tiles * Cout,
                           bytes_accessed=bytes_accessed)

    # VMEM budget: double-buffered x/out blocks, weight block, padded-window
    # scratch, f32 accumulator spill + per-tap window temporaries.
    blk_bytes = (2 * Cin * H * W * x_bytes
                 + 2 * Cout * tile_h * W * o_bytes
                 + 2 * kk * Cin * 4
                 + 2 * Cout * kk * Cin * 4)
    scratch_bytes = (Cin * (tile_h + 2 * pad) * (W + 2 * pad) * c_bytes
                     + Cout * tile_h * W * 4
                     + Cin * tile_h * W * c_bytes
                     + Cout * kk * Cin * (4 + c_bytes))
    try:   # per-generation VMEM cap (128 MiB-class v5e/v6e vs 64 MiB v7x)
        vmem_cap = int(pltpu.get_tpu_info().vmem_capacity_bytes)
    except Exception:
        vmem_cap = 128 * 2 ** 20
    vmem_limit = int(min(int(vmem_cap * 0.8),
                         max(32 * 2 ** 20, 2 * (blk_bytes + scratch_bytes))))

    s_spec = pl.BlockSpec((1, 1, kk * Cin), lambda b, t: (b, 0, 0))
    x_spec = pl.BlockSpec((1, Cin, H, W), lambda b, t: (b, 0, 0, 0))  # b only -> resident
    out_spec = pl.BlockSpec((1, Cout, tile_h * W), lambda b, t: (b, 0, t))

    def _run(single_buffer_weight):
        if single_buffer_weight:
            # Constant block (index_map == (0,0) for every step) -> 1 buffer.
            w_spec = pl.BlockSpec((Cout, kk * Cin), lambda b, t: (0, 0),
                                  pipeline_mode=pl.Buffered(buffer_count=1))
        else:
            w_spec = pl.BlockSpec((Cout, kk * Cin), lambda b, t: (0, 0))
        return pl.pallas_call(
            kernel,
            out_shape=jax.ShapeDtypeStruct((B, Cout, H * W), out_dtype),
            grid_spec=pltpu.PrefetchScalarGridSpec(
                num_scalar_prefetch=0,
                grid=(B, n_tiles),
                in_specs=[s_spec, w_spec, x_spec],
                out_specs=out_spec,
                scratch_shapes=[pltpu.VMEM(
                    (Cin, tile_h + 2 * pad, W + 2 * pad), compute_dtype)],
            ),
            compiler_params=pltpu.CompilerParams(
                dimension_semantics=("parallel", "parallel"),
                vmem_limit_bytes=vmem_limit),
            cost_estimate=cost,
        )(s_tiled, w2d, x)

    try:
        out_flat = _run(True)
    except Exception:
        # TODO(synk): jax versions without single-buffer pipeline_mode support.
        out_flat = _run(False)

    return out_flat.reshape(B, Cout, H, W)


def ref_modulated_conv2d(x, style, base_weight, mod_weight, mod_bias, demodulate=True):
    """Plain-JAX reference mirroring the PyTorch forward (default branch)."""
    B, Cin, H, W = x.shape
    Cout, _, k, _ = base_weight.shape
    style_dim = style.shape[-1]
    mod_scale = 1.0 / math.sqrt(style_dim)
    conv_scale = 1.0 / math.sqrt(Cin * k * k)

    s = style @ (mod_weight * mod_scale).T + mod_bias                  # (B, Cin)
    w = conv_scale * base_weight[None] * s[:, None, :, None, None]     # (B,Cout,Cin,k,k)
    if demodulate:
        d = lax.rsqrt(jnp.sum(w ** 2, axis=(2, 3, 4)) + 1e-8)
        w = w * d[:, :, None, None, None]
    pad = k // 2
    outs = []
    for b in range(B):  # groups=batch grouped conv == per-sample conv
        o = lax.conv_general_dilated(
            x[b:b + 1], w[b], window_strides=(1, 1),
            padding=[(pad, pad), (pad, pad)],
            dimension_numbers=("NCHW", "OIHW", "NCHW"))
        outs.append(o)
    return jnp.concatenate(outs, axis=0)


if __name__ == "__main__":
    B, Cin, Cout, K, Sdim, H, W = 2, 4, 8, 3, 16, 16, 16

    key = jax.random.PRNGKey(0)
    k1, k2, k3, k4 = jax.random.split(key, 4)
    x = jax.random.normal(k1, (B, Cin, H, W), jnp.float32)
    style = jax.random.normal(k2, (B, Sdim), jnp.float32)
    base_w = jax.random.normal(k3, (Cout, Cin, K, K), jnp.float32)    # self.weight[0]
    mod_w = jax.random.normal(k4, (Cin, Sdim), jnp.float32)           # EqualLinear.weight
    mod_b = jnp.ones((Cin,), jnp.float32)                             # bias_init=1

    ref = ref_modulated_conv2d(x, style, base_w, mod_w, mod_b, demodulate=True)

    # f32-operand path, single spatial tile.
    out_f32 = jax.block_until_ready(
        modulated_conv2d(x, style, base_w, mod_w, mod_b,
                         demodulate=True, compute_dtype=jnp.float32))
    assert out_f32.shape == (B, Cout, H, W)
    err = float(jnp.max(jnp.abs(out_f32 - ref)))
    assert err < 5e-2, f"f32 max_err={err}"

    # Default bf16 MXU-operand path (f32 accumulation / demod).
    out_bf16 = jax.block_until_ready(
        modulated_conv2d(x, style, base_w, mod_w, mod_b, demodulate=True))
    err = float(jnp.max(jnp.abs(out_bf16 - ref)))
    assert err < 2e-1, f"bf16 max_err={err}"

    # Multi-row-tile path (forced tile_h=8 -> 2 tiles), bf16 activations fed in.
    out_tiled = jax.block_until_ready(
        modulated_conv2d(x.astype(jnp.bfloat16), style, base_w, mod_w, mod_b,
                         demodulate=True, tile_h=8))
    assert out_tiled.shape == (B, Cout, H, W)
    err = float(jnp.max(jnp.abs(out_tiled.astype(jnp.float32) - ref)))
    assert err < 2e-1, f"tiled bf16 max_err={err}"

    print("KERNEL_OK")
</pallas_src>

<mosaic_0001>
module attributes {stable_mosaic.version = 11 : i64} {
  func.func @_modconv_kernel(%arg0: i32, %arg1: i32, %arg2: memref<1x1x36xf32, #tpu.memory_space<vmem>>, %arg3: memref<8x36xf32, #tpu.memory_space<vmem>>, %arg4: memref<1x4x16x16xf32, #tpu.memory_space<vmem>>, %arg5: memref<1x8x256xf32, #tpu.memory_space<vmem>>, %arg6: memref<4x18x18xf32, #tpu.memory_space<vmem>>) attributes {dimension_semantics = [#tpu.dimension_semantics<parallel>, #tpu.dimension_semantics<parallel>], iteration_bounds = array<i64: 2, 1>, scalar_prefetch = 0 : i64, scratch_operands = 1 : i64, tpu.core_type = #tpu.core_type<tc>, window_params = [{transform_indices = @transform_0, window_bounds = array<i64: 1, 1, 36>}, {pipeline_mode = #tpu.pipeline_mode<synchronous>, transform_indices = @transform_1, window_bounds = array<i64: 8, 36>}, {transform_indices = @transform_2, window_bounds = array<i64: 1, 4, 16, 16>}, {transform_indices = @transform_3, window_bounds = array<i64: 1, 8, 256>}]} {
    %c0 = arith.constant 0 : index
    %c0_0 = arith.constant 0 : index
    %0 = vector.load %arg3[%c0, %c0_0] : memref<8x36xf32, #tpu.memory_space<vmem>>, vector<8x36xf32>
    %c0_1 = arith.constant 0 : index
    %c0_2 = arith.constant 0 : index
    %c0_3 = arith.constant 0 : index
    %1 = vector.load %arg2[%c0_1, %c0_2, %c0_3] : memref<1x1x36xf32, #tpu.memory_space<vmem>>, vector<1x1x36xf32>
    %2 = vector.shape_cast %1 : vector<1x1x36xf32> to vector<1x36xf32>
    %3 = vector.broadcast %2 : vector<1x36xf32> to vector<8x36xf32>
    %4 = arith.mulf %0, %3 : vector<8x36xf32>
    %5 = arith.mulf %4, %4 : vector<8x36xf32>
    %cst = arith.constant dense<0.000000e+00> : vector<8xf32>
    %6 = vector.multi_reduction <add>, %5, %cst [1] : vector<8x36xf32> to vector<8xf32>
    %7 = vector.shape_cast %6 : vector<8xf32> to vector<8x1xf32>
    %cst_4 = arith.constant 9.99999993E-9 : f32
    %8 = vector.broadcast %cst_4 : f32 to vector<8x1xf32>
    %9 = arith.addf %7, %8 : vector<8x1xf32>
    %10 = math.rsqrt %9 : vector<8x1xf32>
    %11 = vector.broadcast %10 : vector<8x1xf32> to vector<8x36xf32>
    %12 = arith.mulf %4, %11 : vector<8x36xf32>
    %cst_5 = arith.constant 0.000000e+00 : f32
    %13 = vector.broadcast %cst_5 : f32 to vector<4x18x1xf32>
    %c0_6 = arith.constant 0 : index
    %c0_7 = arith.constant 0 : index
    %c0_8 = arith.constant 0 : index
    %14 = vector.load %arg6[%c0_6, %c0_7, %c0_8] : memref<4x18x18xf32, #tpu.memory_space<vmem>>, vector<4x18x1xf32>
    tpu.vector_store %arg6[%c0_6, %c0_7, %c0_8], %13 {strides = array<i32>} : memref<4x18x18xf32, #tpu.memory_space<vmem>>, vector<4x18x1xf32>,
    %cst_9 = arith.constant 0.000000e+00 : f32
    %15 = vector.broadcast %cst_9 : f32 to vector<4x18x1xf32>
    %c0_10 = arith.constant 0 : index
    %c0_11 = arith.constant 0 : index
    %c17 = arith.constant 17 : index
    %16 = vector.load %arg6[%c0_10, %c0_11, %c17] : memref<4x18x18xf32, #tpu.memory_space<vmem>>, vector<4x18x1xf32>
    tpu.vector_store %arg6[%c0_10, %c0_11, %c17], %15 {strides = array<i32>} : memref<4x18x18xf32, #tpu.memory_space<vmem>>, vector<4x18x1xf32>,
    %cst_12 = arith.constant 0.000000e+00 : f32
    %17 = vector.broadcast %cst_12 : f32 to vector<4x1x18xf32>
    %c0_13 = arith.constant 0 : index
    %c0_14 = arith.constant 0 : index
    %c0_15 = arith.constant 0 : index
    %18 = vector.load %arg6[%c0_13, %c0_14, %c0_15] : memref<4x18x18xf32, #tpu.memory_space<vmem>>, vector<4x1x18xf32>
    tpu.vector_store %arg6[%c0_13, %c0_14, %c0_15], %17 {strides = array<i32>} : memref<4x18x18xf32, #tpu.memory_space<vmem>>, vector<4x1x18xf32>,
    %cst_16 = arith.constant 0.000000e+00 : f32
    %19 = vector.broadcast %cst_16 : f32 to vector<4x1x18xf32>
    %c0_17 = arith.constant 0 : index
    %c17_18 = arith.constant 17 : index
    %c0_19 = arith.constant 0 : index
    %20 = vector.load %arg6[%c0_17, %c17_18, %c0_19] : memref<4x18x18xf32, #tpu.memory_space<vmem>>, vector<4x1x18xf32>
    tpu.vector_store %arg6[%c0_17, %c17_18, %c0_19], %19 {strides = array<i32>} : memref<4x18x18xf32, #tpu.memory_space<vmem>>, vector<4x1x18xf32>,
    %c0_20 = arith.constant 0 : index
    %c0_21 = arith.constant 0 : index
    %c0_22 = arith.constant 0 : index
    %c0_23 = arith.constant 0 : index
    %21 = vector.load %arg4[%c0_20, %c0_21, %c0_22, %c0_23] : memref<1x4x16x16xf32, #tpu.memory_space<vmem>>, vector<1x4x16x16xf32>
    %22 = vector.shape_cast %21 : vector<1x4x16x16xf32> to vector<4x16x16xf32>
    %c0_24 = arith.constant 0 : index
    %c1 = arith.constant 1 : index
    %c1_25 = arith.constant 1 : index
    %23 = vector.load %arg6[%c0_24, %c1, %c1_25] : memref<4x18x18xf32, #tpu.memory_space<vmem>>, vector<4x16x16xf32>
    tpu.vector_store %arg6[%c0_24, %c1, %c1_25], %22 {strides = array<i32>} : memref<4x18x18xf32, #tpu.memory_space<vmem>>, vector<4x16x16xf32>,
    %c0_26 = arith.constant 0 : index
    %c0_27 = arith.constant 0 : index
    %c0_28 = arith.constant 0 : index
    %24 = vector.load %arg6[%c0_26, %c0_27, %c0_28] : memref<4x18x18xf32, #tpu.memory_space<vmem>>, vector<4x16x16xf32>
    %25 = vector.shape_cast %24 : vector<4x16x16xf32> to vector<4x256xf32>
    %26 = vector.extract_strided_slice %12 {offsets = [0, 0], sizes = [8, 4], strides = [1, 1]} : vector<8x36xf32> to vector<8x4xf32>
    %cst_29 = arith.constant dense<0.000000e+00> : vector<8x256xf32>
    %27 = tpu.matmul %26, %25, %cst_29 {dimension_numbers = #tpu.dot_dimension_numbers<[1], [0], [0], [1], [0, 0, 1, 1], [], []>} : vector<8x4xf32>, vector<4x256xf32>, vector<8x256xf32> -> vector<8x256xf32>
    %c0_30 = arith.constant 0 : index
    %c0_31 = arith.constant 0 : index
    %c1_32 = arith.constant 1 : index
    %28 = vector.load %arg6[%c0_30, %c0_31, %c1_32] : memref<4x18x18xf32, #tpu.memory_space<vmem>>, vector<4x16x16xf32>
    %29 = vector.shape_cast %28 : vector<4x16x16xf32> to vector<4x256xf32>
    %30 = vector.extract_strided_slice %12 {offsets = [0, 4], sizes = [8, 4], strides = [1, 1]} : vector<8x36xf32> to vector<8x4xf32>
    %cst_33 = arith.constant dense<0.000000e+00> : vector<8x256xf32>
    %31 = tpu.matmul %30, %29, %cst_33 {dimension_numbers = #tpu.dot_dimension_numbers<[1], [0], [0], [1], [0, 0, 1, 1], [], []>} : vector<8x4xf32>, vector<4x256xf32>, vector<8x256xf32> -> vector<8x256xf32>
    %32 = arith.addf %27, %31 : vector<8x256xf32>
    %c0_34 = arith.constant 0 : index
    %c0_35 = arith.constant 0 : index
    %c2 = arith.constant 2 : index
    %33 = vector.load %arg6[%c0_34, %c0_35, %c2] : memref<4x18x18xf32, #tpu.memory_space<vmem>>, vector<4x16x16xf32>
    %34 = vector.shape_cast %33 : vector<4x16x16xf32> to vector<4x256xf32>
    %35 = vector.extract_strided_slice %12 {offsets = [0, 8], sizes = [8, 4], strides = [1, 1]} : vector<8x36xf32> to vector<8x4xf32>
    %cst_36 = arith.constant dense<0.000000e+00> : vector<8x256xf32>
    %36 = tpu.matmul %35, %34, %cst_36 {dimension_numbers = #tpu.dot_dimension_numbers<[1], [0], [0], [1], [0, 0, 1, 1], [], []>} : vector<8x4xf32>, vector<4x256xf32>, vector<8x256xf32> -> vector<8x256xf32>
    %37 = arith.addf %32, %36 : vector<8x256xf32>
    %c0_37 = arith.constant 0 : index
    %c1_38 = arith.constant 1 : index
    %c0_39 = arith.constant 0 : index
    %38 = vector.load %arg6[%c0_37, %c1_38, %c0_39] : memref<4x18x18xf32, #tpu.memory_space<vmem>>, vector<4x16x16xf32>
    %39 = vector.shape_cast %38 : vector<4x16x16xf32> to vector<4x256xf32>
    %40 = vector.extract_strided_slice %12 {offsets = [0, 12], sizes = [8, 4], strides = [1, 1]} : vector<8x36xf32> to vector<8x4xf32>
    %cst_40 = arith.constant dense<0.000000e+00> : vector<8x256xf32>
    %41 = tpu.matmul %40, %39, %cst_40 {dimension_numbers = #tpu.dot_dimension_numbers<[1], [0], [0], [1], [0, 0, 1, 1], [], []>} : vector<8x4xf32>, vector<4x256xf32>, vector<8x256xf32> -> vector<8x256xf32>
    %42 = arith.addf %37, %41 : vector<8x256xf32>
    %c0_41 = arith.constant 0 : index
    %c1_42 = arith.constant 1 : index
    %c1_43 = arith.constant 1 : index
    %43 = vector.load %arg6[%c0_41, %c1_42, %c1_43] : memref<4x18x18xf32, #tpu.memory_space<vmem>>, vector<4x16x16xf32>
    %44 = vector.shape_cast %43 : vector<4x16x16xf32> to vector<4x256xf32>
    %45 = vector.extract_strided_slice %12 {offsets = [0, 16], sizes = [8, 4], strides = [1, 1]} : vector<8x36xf32> to vector<8x4xf32>
    %cst_44 = arith.constant dense<0.000000e+00> : vector<8x256xf32>
    %46 = tpu.matmul %45, %44, %cst_44 {dimension_numbers = #tpu.dot_dimension_numbers<[1], [0], [0], [1], [0, 0, 1, 1], [], []>} : vector<8x4xf32>, vector<4x256xf32>, vector<8x256xf32> -> vector<8x256xf32>
    %47 = arith.addf %42, %46 : vector<8x256xf32>
    %c0_45 = arith.constant 0 : index
    %c1_46 = arith.constant 1 : index
    %c2_47 = arith.constant 2 : index
    %48 = vector.load %arg6[%c0_45, %c1_46, %c2_47] : memref<4x18x18xf32, #tpu.memory_space<vmem>>, vector<4x16x16xf32>
    %49 = vector.shape_cast %48 : vector<4x16x16xf32> to vector<4x256xf32>
    %50 = vector.extract_strided_slice %12 {offsets = [0, 20], sizes = [8, 4], strides = [1, 1]} : vector<8x36xf32> to vector<8x4xf32>
    %cst_48 = arith.constant dense<0.000000e+00> : vector<8x256xf32>
    %51 = tpu.matmul %50, %49, %cst_48 {dimension_numbers = #tpu.dot_dimension_numbers<[1], [0], [0], [1], [0, 0, 1, 1], [], []>} : vector<8x4xf32>, vector<4x256xf32>, vector<8x256xf32> -> vector<8x256xf32>
    %52 = arith.addf %47, %51 : vector<8x256xf32>
    %c0_49 = arith.constant 0 : index
    %c2_50 = arith.constant 2 : index
    %c0_51 = arith.constant 0 : index
    %53 = vector.load %arg6[%c0_49, %c2_50, %c0_51] : memref<4x18x18xf32, #tpu.memory_space<vmem>>, vector<4x16x16xf32>
    %54 = vector.shape_cast %53 : vector<4x16x16xf32> to vector<4x256xf32>
    %55 = vector.extract_strided_slice %12 {offsets = [0, 24], sizes = [8, 4], strides = [1, 1]} : vector<8x36xf32> to vector<8x4xf32>
    %cst_52 = arith.constant dense<0.000000e+00> : vector<8x256xf32>
    %56 = tpu.matmul %55, %54, %cst_52 {dimension_numbers = #tpu.dot_dimension_numbers<[1], [0], [0], [1], [0, 0, 1, 1], [], []>} : vector<8x4xf32>, vector<4x256xf32>, vector<8x256xf32> -> vector<8x256xf32>
    %57 = arith.addf %52, %56 : vector<8x256xf32>
    %c0_53 = arith.constant 0 : index
    %c2_54 = arith.constant 2 : index
    %c1_55 = arith.constant 1 : index
    %58 = vector.load %arg6[%c0_53, %c2_54, %c1_55] : memref<4x18x18xf32, #tpu.memory_space<vmem>>, vector<4x16x16xf32>
    %59 = vector.shape_cast %58 : vector<4x16x16xf32> to vector<4x256xf32>
    %60 = vector.extract_strided_slice %12 {offsets = [0, 28], sizes = [8, 4], strides = [1, 1]} : vector<8x36xf32> to vector<8x4xf32>
    %cst_56 = arith.constant dense<0.000000e+00> : vector<8x256xf32>
    %61 = tpu.matmul %60, %59, %cst_56 {dimension_numbers = #tpu.dot_dimension_numbers<[1], [0], [0], [1], [0, 0, 1, 1], [], []>} : vector<8x4xf32>, vector<4x256xf32>, vector<8x256xf32> -> vector<8x256xf32>
    %62 = arith.addf %57, %61 : vector<8x256xf32>
    %c0_57 = arith.constant 0 : index
    %c2_58 = arith.constant 2 : index
    %c2_59 = arith.constant 2 : index
    %63 = vector.load %arg6[%c0_57, %c2_58, %c2_59] : memref<4x18x18xf32, #tpu.memory_space<vmem>>, vector<4x16x16xf32>
    %64 = vector.shape_cast %63 : vector<4x16x16xf32> to vector<4x256xf32>
    %65 = vector.extract_strided_slice %12 {offsets = [0, 32], sizes = [8, 4], strides = [1, 1]} : vector<8x36xf32> to vector<8x4xf32>
    %cst_60 = arith.constant dense<0.000000e+00> : vector<8x256xf32>
    %66 = tpu.matmul %65, %64, %cst_60 {dimension_numbers = #tpu.dot_dimension_numbers<[1], [0], [0], [1], [0, 0, 1, 1], [], []>} : vector<8x4xf32>, vector<4x256xf32>, vector<8x256xf32> -> vector<8x256xf32>
    %67 = arith.addf %62, %66 : vector<8x256xf32>
    %c0_61 = arith.constant 0 : index
    %c0_62 = arith.constant 0 : index
    %c0_63 = arith.constant 0 : index
    %68 = vector.load %arg5[%c0_61, %c0_62, %c0_63] : memref<1x8x256xf32, #tpu.memory_space<vmem>>, vector<1x8x256xf32>
    %69 = vector.shape_cast %68 : vector<1x8x256xf32> to vector<8x256xf32>
    %70 = vector.shape_cast %67 : vector<8x256xf32> to vector<1x8x256xf32>
    tpu.vector_store %arg5[%c0_61, %c0_62, %c0_63], %70 {strides = array<i32>} : memref<1x8x256xf32, #tpu.memory_space<vmem>>, vector<1x8x256xf32>,
    return
  }
  func.func @transform_0(%arg0: i32, %arg1: i32) -> (i32, i32, i32) {
    %c0_i32 = arith.constant 0 : i32
    %c0_i32_0 = arith.constant 0 : i32
    %c0_i32_1 = arith.constant 0 : i32
    return %arg0, %c0_i32, %c0_i32_0 : i32, i32, i32
  }
  func.func @transform_1(%arg0: i32, %arg1: i32) -> (i32, i32) {
    %c0_i32 = arith.constant 0 : i32
    %c0_i32_0 = arith.constant 0 : i32
    %c0_i32_1 = arith.constant 0 : i32
    return %c0_i32, %c0_i32_0 : i32, i32
  }
  func.func @transform_2(%arg0: i32, %arg1: i32) -> (i32, i32, i32, i32) {
    %c0_i32 = arith.constant 0 : i32
    %c0_i32_0 = arith.constant 0 : i32
    %c0_i32_1 = arith.constant 0 : i32
    %c0_i32_2 = arith.constant 0 : i32
    return %arg0, %c0_i32, %c0_i32_0, %c0_i32_1 : i32, i32, i32, i32
  }
  func.func @transform_3(%arg0: i32, %arg1: i32) -> (i32, i32, i32) {
    %c0_i32 = arith.constant 0 : i32
    %c0_i32_0 = arith.constant 0 : i32
    return %arg0, %c0_i32, %arg1 : i32, i32, i32
  }
}

module attributes {stable_mosaic.version = 11 : i64} {
  func.func @_modconv_kernel(%arg0: i32, %arg1: i32, %arg2: memref<1x1x36xf32, #tpu.memory_space<vmem>>, %arg3: memref<8x36xf32, #tpu.memory_space<vmem>>, %arg4: memref<1x4x16x16xf32, #tpu.memory_space<vmem>>, %arg5: memref<1x8x256xf32, #tpu.memory_space<vmem>>, %arg6: memref<4x18x18xf32, #tpu.memory_space<vmem>>) attributes {dimension_semantics = [#tpu.dimension_semantics<parallel>, #tpu.dimension_semantics<parallel>], iteration_bounds = array<i64: 2, 1>, scalar_prefetch = 0 : i64, scratch_operands = 1 : i64, tpu.core_type = #tpu.core_type<tc>, window_params = [{transform_indices = @transform_0, window_bounds = array<i64: 1, 1, 36>}, {pipeline_mode = #tpu.pipeline_mode<synchronous>, transform_indices = @transform_1, window_bounds = array<i64: 8, 36>}, {transform_indices = @transform_2, window_bounds = array<i64: 1, 4, 16, 16>}, {transform_indices = @transform_3, window_bounds = array<i64: 1, 8, 256>}]} {
    %c0 = arith.constant 0 : index
    %c0_0 = arith.constant 0 : index
    %0 = vector.load %arg3[%c0, %c0_0] : memref<8x36xf32, #tpu.memory_space<vmem>>, vector<8x36xf32>
    %c0_1 = arith.constant 0 : index
    %c0_2 = arith.constant 0 : index
    %c0_3 = arith.constant 0 : index
    %1 = vector.load %arg2[%c0_1, %c0_2, %c0_3] : memref<1x1x36xf32, #tpu.memory_space<vmem>>, vector<1x1x36xf32>
    %2 = vector.shape_cast %1 : vector<1x1x36xf32> to vector<1x36xf32>
    %3 = vector.broadcast %2 : vector<1x36xf32> to vector<8x36xf32>
    %4 = arith.mulf %0, %3 : vector<8x36xf32>
    %5 = arith.mulf %4, %4 : vector<8x36xf32>
    %cst = arith.constant dense<0.000000e+00> : vector<8xf32>
    %6 = vector.multi_reduction <add>, %5, %cst [1] : vector<8x36xf32> to vector<8xf32>
    %7 = vector.shape_cast %6 : vector<8xf32> to vector<8x1xf32>
    %cst_4 = arith.constant 9.99999993E-9 : f32
    %8 = vector.broadcast %cst_4 : f32 to vector<8x1xf32>
    %9 = arith.addf %7, %8 : vector<8x1xf32>
    %10 = math.rsqrt %9 : vector<8x1xf32>
    %11 = vector.broadcast %10 : vector<8x1xf32> to vector<8x36xf32>
    %12 = arith.mulf %4, %11 : vector<8x36xf32>
    %cst_5 = arith.constant 0.000000e+00 : f32
    %13 = vector.broadcast %cst_5 : f32 to vector<4x18x1xf32>
    %c0_6 = arith.constant 0 : index
    %c0_7 = arith.constant 0 : index
    %c0_8 = arith.constant 0 : index
    %14 = vector.load %arg6[%c0_6, %c0_7, %c0_8] : memref<4x18x18xf32, #tpu.memory_space<vmem>>, vector<4x18x1xf32>
    tpu.vector_store %arg6[%c0_6, %c0_7, %c0_8], %13 {strides = array<i32>} : memref<4x18x18xf32, #tpu.memory_space<vmem>>, vector<4x18x1xf32>,
    %cst_9 = arith.constant 0.000000e+00 : f32
    %15 = vector.broadcast %cst_9 : f32 to vector<4x18x1xf32>
    %c0_10 = arith.constant 0 : index
    %c0_11 = arith.constant 0 : index
    %c17 = arith.constant 17 : index
    %16 = vector.load %arg6[%c0_10, %c0_11, %c17] : memref<4x18x18xf32, #tpu.memory_space<vmem>>, vector<4x18x1xf32>
    tpu.vector_store %arg6[%c0_10, %c0_11, %c17], %15 {strides = array<i32>} : memref<4x18x18xf32, #tpu.memory_space<vmem>>, vector<4x18x1xf32>,
    %cst_12 = arith.constant 0.000000e+00 : f32
    %17 = vector.broadcast %cst_12 : f32 to vector<4x1x18xf32>
    %c0_13 = arith.constant 0 : index
    %c0_14 = arith.constant 0 : index
    %c0_15 = arith.constant 0 : index
    %18 = vector.load %arg6[%c0_13, %c0_14, %c0_15] : memref<4x18x18xf32, #tpu.memory_space<vmem>>, vector<4x1x18xf32>
    tpu.vector_store %arg6[%c0_13, %c0_14, %c0_15], %17 {strides = array<i32>} : memref<4x18x18xf32, #tpu.memory_space<vmem>>, vector<4x1x18xf32>,
    %cst_16 = arith.constant 0.000000e+00 : f32
    %19 = vector.broadcast %cst_16 : f32 to vector<4x1x18xf32>
    %c0_17 = arith.constant 0 : index
    %c17_18 = arith.constant 17 : index
    %c0_19 = arith.constant 0 : index
    %20 = vector.load %arg6[%c0_17, %c17_18, %c0_19] : memref<4x18x18xf32, #tpu.memory_space<vmem>>, vector<4x1x18xf32>
    tpu.vector_store %arg6[%c0_17, %c17_18, %c0_19], %19 {strides = array<i32>} : memref<4x18x18xf32, #tpu.memory_space<vmem>>, vector<4x1x18xf32>,
    %c0_20 = arith.constant 0 : index
    %c0_21 = arith.constant 0 : index
    %c0_22 = arith.constant 0 : index
    %c0_23 = arith.constant 0 : index
    %21 = vector.load %arg4[%c0_20, %c0_21, %c0_22, %c0_23] : memref<1x4x16x16xf32, #tpu.memory_space<vmem>>, vector<1x4x16x16xf32>
    %22 = vector.shape_cast %21 : vector<1x4x16x16xf32> to vector<4x16x16xf32>
    %c0_24 = arith.constant 0 : index
    %c1 = arith.constant 1 : index
    %c1_25 = arith.constant 1 : index
    %23 = vector.load %arg6[%c0_24, %c1, %c1_25] : memref<4x18x18xf32, #tpu.memory_space<vmem>>, vector<4x16x16xf32>
    tpu.vector_store %arg6[%c0_24, %c1, %c1_25], %22 {strides = array<i32>} : memref<4x18x18xf32, #tpu.memory_space<vmem>>, vector<4x16x16xf32>,
    %c0_26 = arith.constant 0 : index
    %c0_27 = arith.constant 0 : index
    %c0_28 = arith.constant 0 : index
    %24 = vector.load %arg6[%c0_26, %c0_27, %c0_28] : memref<4x18x18xf32, #tpu.memory_space<vmem>>, vector<4x16x16xf32>
    %25 = vector.shape_cast %24 : vector<4x16x16xf32> to vector<4x256xf32>
    %26 = vector.extract_strided_slice %12 {offsets = [0, 0], sizes = [8, 4], strides = [1, 1]} : vector<8x36xf32> to vector<8x4xf32>
    %cst_29 = arith.constant dense<0.000000e+00> : vector<8x256xf32>
    %27 = tpu.matmul %26, %25, %cst_29 {dimension_numbers = #tpu.dot_dimension_numbers<[1], [0], [0], [1], [0, 0, 1, 1], [], []>} : vector<8x4xf32>, vector<4x256xf32>, vector<8x256xf32> -> vector<8x256xf32>
    %c0_30 = arith.constant 0 : index
    %c0_31 = arith.constant 0 : index
    %c1_32 = arith.constant 1 : index
    %28 = vector.load %arg6[%c0_30, %c0_31, %c1_32] : memref<4x18x18xf32, #tpu.memory_space<vmem>>, vector<4x16x16xf32>
    %29 = vector.shape_cast %28 : vector<4x16x16xf32> to vector<4x256xf32>
    %30 = vector.extract_strided_slice %12 {offsets = [0, 4], sizes = [8, 4], strides = [1, 1]} : vector<8x36xf32> to vector<8x4xf32>
    %cst_33 = arith.constant dense<0.000000e+00> : vector<8x256xf32>
    %31 = tpu.matmul %30, %29, %cst_33 {dimension_numbers = #tpu.dot_dimension_numbers<[1], [0], [0], [1], [0, 0, 1, 1], [], []>} : vector<8x4xf32>, vector<4x256xf32>, vector<8x256xf32> -> vector<8x256xf32>
    %32 = arith.addf %27, %31 : vector<8x256xf32>
    %c0_34 = arith.constant 0 : index
    %c0_35 = arith.constant 0 : index
    %c2 = arith.constant 2 : index
    %33 = vector.load %arg6[%c0_34, %c0_35, %c2] : memref<4x18x18xf32, #tpu.memory_space<vmem>>, vector<4x16x16xf32>
    %34 = vector.shape_cast %33 : vector<4x16x16xf32> to vector<4x256xf32>
    %35 = vector.extract_strided_slice %12 {offsets = [0, 8], sizes = [8, 4], strides = [1, 1]} : vector<8x36xf32> to vector<8x4xf32>
    %cst_36 = arith.constant dense<0.000000e+00> : vector<8x256xf32>
    %36 = tpu.matmul %35, %34, %cst_36 {dimension_numbers = #tpu.dot_dimension_numbers<[1], [0], [0], [1], [0, 0, 1, 1], [], []>} : vector<8x4xf32>, vector<4x256xf32>, vector<8x256xf32> -> vector<8x256xf32>
    %37 = arith.addf %32, %36 : vector<8x256xf32>
    %c0_37 = arith.constant 0 : index
    %c1_38 = arith.constant 1 : index
    %c0_39 = arith.constant 0 : index
    %38 = vector.load %arg6[%c0_37, %c1_38, %c0_39] : memref<4x18x18xf32, #tpu.memory_space<vmem>>, vector<4x16x16xf32>
    %39 = vector.shape_cast %38 : vector<4x16x16xf32> to vector<4x256xf32>
    %40 = vector.extract_strided_slice %12 {offsets = [0, 12], sizes = [8, 4], strides = [1, 1]} : vector<8x36xf32> to vector<8x4xf32>
    %cst_40 = arith.constant dense<0.000000e+00> : vector<8x256xf32>
    %41 = tpu.matmul %40, %39, %cst_40 {dimension_numbers = #tpu.dot_dimension_numbers<[1], [0], [0], [1], [0, 0, 1, 1], [], []>} : vector<8x4xf32>, vector<4x256xf32>, vector<8x256xf32> -> vector<8x256xf32>
    %42 = arith.addf %37, %41 : vector<8x256xf32>
    %c0_41 = arith.constant 0 : index
    %c1_42 = arith.constant 1 : index
    %c1_43 = arith.constant 1 : index
    %43 = vector.load %arg6[%c0_41, %c1_42, %c1_43] : memref<4x18x18xf32, #tpu.memory_space<vmem>>, vector<4x16x16xf32>
    %44 = vector.shape_cast %43 : vector<4x16x16xf32> to vector<4x256xf32>
    %45 = vector.extract_strided_slice %12 {offsets = [0, 16], sizes = [8, 4], strides = [1, 1]} : vector<8x36xf32> to vector<8x4xf32>
    %cst_44 = arith.constant dense<0.000000e+00> : vector<8x256xf32>
    %46 = tpu.matmul %45, %44, %cst_44 {dimension_numbers = #tpu.dot_dimension_numbers<[1], [0], [0], [1], [0, 0, 1, 1], [], []>} : vector<8x4xf32>, vector<4x256xf32>, vector<8x256xf32> -> vector<8x256xf32>
    %47 = arith.addf %42, %46 : vector<8x256xf32>
    %c0_45 = arith.constant 0 : index
    %c1_46 = arith.constant 1 : index
    %c2_47 = arith.constant 2 : index
    %48 = vector.load %arg6[%c0_45, %c1_46, %c2_47] : memref<4x18x18xf32, #tpu.memory_space<vmem>>, vector<4x16x16xf32>
    %49 = vector.shape_cast %48 : vector<4x16x16xf32> to vector<4x256xf32>
    %50 = vector.extract_strided_slice %12 {offsets = [0, 20], sizes = [8, 4], strides = [1, 1]} : vector<8x36xf32> to vector<8x4xf32>
    %cst_48 = arith.constant dense<0.000000e+00> : vector<8x256xf32>
    %51 = tpu.matmul %50, %49, %cst_48 {dimension_numbers = #tpu.dot_dimension_numbers<[1], [0], [0], [1], [0, 0, 1, 1], [], []>} : vector<8x4xf32>, vector<4x256xf32>, vector<8x256xf32> -> vector<8x256xf32>
    %52 = arith.addf %47, %51 : vector<8x256xf32>
    %c0_49 = arith.constant 0 : index
    %c2_50 = arith.constant 2 : index
    %c0_51 = arith.constant 0 : index
    %53 = vector.load %arg6[%c0_49, %c2_50, %c0_51] : memref<4x18x18xf32, #tpu.memory_space<vmem>>, vector<4x16x16xf32>
    %54 = vector.shape_cast %53 : vector<4x16x16xf32> to vector<4x256xf32>
    %55 = vector.extract_strided_slice %12 {offsets = [0, 24], sizes = [8, 4], strides = [1, 1]} : vector<8x36xf32> to vector<8x4xf32>
    %cst_52 = arith.constant dense<0.000000e+00> : vector<8x256xf32>
    %56 = tpu.matmul %55, %54, %cst_52 {dimension_numbers = #tpu.dot_dimension_numbers<[1], [0], [0], [1], [0, 0, 1, 1], [], []>} : vector<8x4xf32>, vector<4x256xf32>, vector<8x256xf32> -> vector<8x256xf32>
    %57 = arith.addf %52, %56 : vector<8x256xf32>
    %c0_53 = arith.constant 0 : index
    %c2_54 = arith.constant 2 : index
    %c1_55 = arith.constant 1 : index
    %58 = vector.load %arg6[%c0_53, %c2_54, %c1_55] : memref<4x18x18xf32, #tpu.memory_space<vmem>>, vector<4x16x16xf32>
    %59 = vector.shape_cast %58 : vector<4x16x16xf32> to vector<4x256xf32>
    %60 = vector.extract_strided_slice %12 {offsets = [0, 28], sizes = [8, 4], strides = [1, 1]} : vector<8x36xf32> to vector<8x4xf32>
    %cst_56 = arith.constant dense<0.000000e+00> : vector<8x256xf32>
    %61 = tpu.matmul %60, %59, %cst_56 {dimension_numbers = #tpu.dot_dimension_numbers<[1], [0], [0], [1], [0, 0, 1, 1], [], []>} : vector<8x4xf32>, vector<4x256xf32>, vector<8x256xf32> -> vector<8x256xf32>
    %62 = arith.addf %57, %61 : vector<8x256xf32>
    %c0_57 = arith.constant 0 : index
    %c2_58 = arith.constant 2 : index
    %c2_59 = arith.constant 2 : index
    %63 = vector.load %arg6[%c0_57, %c2_58, %c2_59] : memref<4x18x18xf32, #tpu.memory_space<vmem>>, vector<4x16x16xf32>
    %64 = vector.shape_cast %63 : vector<4x16x16xf32> to vector<4x256xf32>
    %65 = vector.extract_strided_slice %12 {offsets = [0, 32], sizes = [8, 4], strides = [1, 1]} : vector<8x36xf32> to vector<8x4xf32>
    %cst_60 = arith.constant dense<0.000000e+00> : vector<8x256xf32>
    %66 = tpu.matmul %65, %64, %cst_60 {dimension_numbers = #tpu.dot_dimension_numbers<[1], [0], [0], [1], [0, 0, 1, 1], [], []>} : vector<8x4xf32>, vector<4x256xf32>, vector<8x256xf32> -> vector<8x256xf32>
    %67 = arith.addf %62, %66 : vector<8x256xf32>
    %c0_61 = arith.constant 0 : index
    %c0_62 = arith.constant 0 : index
    %c0_63 = arith.constant 0 : index
    %68 = vector.load %arg5[%c0_61, %c0_62, %c0_63] : memref<1x8x256xf32, #tpu.memory_space<vmem>>, vector<1x8x256xf32>
    %69 = vector.shape_cast %68 : vector<1x8x256xf32> to vector<8x256xf32>
    %70 = vector.shape_cast %67 : vector<8x256xf32> to vector<1x8x256xf32>
    tpu.vector_store %arg5[%c0_61, %c0_62, %c0_63], %70 {strides = array<i32>} : memref<1x8x256xf32, #tpu.memory_space<vmem>>, vector<1x8x256xf32>,
    return
  }
  func.func @transform_0(%arg0: i32, %arg1: i32) -> (i32, i32, i32) {
    %c0_i32 = arith.constant 0 : i32
    %c0_i32_0 = arith.constant 0 : i32
    %c0_i32_1 = arith.constant 0 : i32
    return %arg0, %c0_i32, %c0_i32_0 : i32, i32, i32
  }
  func.func @transform_1(%arg0: i32, %arg1: i32) -> (i32, i32) {
    %c0_i32 = arith.constant 0 : i32
    %c0_i32_0 = arith.constant 0 : i32
    %c0_i32_1 = arith.constant 0 : i32
    return %c0_i32, %c0_i32_0 : i32, i32
  }
  func.func @transform_2(%arg0: i32, %arg1: i32) -> (i32, i32, i32, i32) {
    %c0_i32 = arith.constant 0 : i32
    %c0_i32_0 = arith.constant 0 : i32
    %c0_i32_1 = arith.constant 0 : i32
    %c0_i32_2 = arith.constant 0 : i32
    return %arg0, %c0_i32, %c0_i32_0, %c0_i32_1 : i32, i32, i32, i32
  }
  func.func @transform_3(%arg0: i32, %arg1: i32) -> (i32, i32, i32) {
    %c0_i32 = arith.constant 0 : i32
    %c0_i32_0 = arith.constant 0 : i32
    return %arg0, %c0_i32, %arg1 : i32, i32, i32
  }
}

</mosaic_0001>

<bundles_post_ra>
// kernel: tpu_custom_call.1
= control target key start
LH: loop header
LB: loop body
LE: loop exit
PB: predicated region body
PF: predicated region fallthrough
CT: control target
= control target key end

     0   :  { %8 = vsyncpa [#allocation4], 0  ;;  %s5363_s0 = inlined_call_operand.hbm [shape: f32[2,1,36], index: 0, kind: input, shape index: {}]   ;;  %s5364_s1 = inlined_call_operand.hbm [shape: f32[8,36], index: 1, kind: input, shape index: {}]   ;;  %s5365_s2 = inlined_call_operand.hbm [shape: f32[2,4,16,16], index: 2, kind: input, shape index: {}]   ;;  %s5366_s3 = inlined_call_operand.hbm [shape: f32[2,8,256], index: 3, kind: output, shape index: {}]  }
   0x1   :  { %10 = vsyncpa [#allocation4 + $0x1], 0 }
   0x2   :  { %11 = vsyncpa [#allocation7], 0 }
   0x3   :  { %12 = vsyncpa [#allocation5], 0 }
   0x4   :  { %14 = vsyncpa [#allocation5 + $0x1], 0  ;;  %s3729_s12 = smov 0   ;;  %s3731_s13 = smov 0  }
   0x5   :  { %s3733_s14 = smov 0   ;;  %s3735_s15 = smov 0  }
   0x6   :  { %s3737_s16 = smov 0   ;;  %s3739_s17 = smov 0  }
   0x7 LB: > { %s32_s18 = sadd.s32 1, %s3678_s16  ;;  %s39_s19 = sadd.s32 1, %s3670_s14  ;;  %s3682_s17 = sphi %s3739_s17, %s20_s17   ;;  %s3678_s16 = sphi %s3737_s16, %s5469_s16   ;;  %s3674_s15 = sphi %s3735_s15, %s5468_s15   ;;  %s3670_s14 = sphi %s3733_s14, %s5467_s14   ;;  %s3666_s13 = sphi %s3731_s13, %s5466_s13   ;;  %s3662_s12 = sphi %s3729_s12, %s5465_s12  }
   0x8   : > { %p34_p0 = scmp.ge.s32.totalorder %s32_s18, 2  ;;  %p46_p1 = scmp.ne.s32.totalorder %s3670_s14, %s3666_s13 }
   0x9   : > { %p47_p2 = scmp.eq.s32.totalorder %s3682_s17, 0  ;;  %p3413_p5 = scmp.lt.s32.totalorder %s3682_s17, 2 }
   0xa   : > { %s5471_s18 = smov (%p34_p0, %s32_s18), 0  ;;  %s162_s21 = sand.u32 1, %s3682_s17  }
   0xb   : > { %p48_p4 = por %p47_p2, %p46_p1  ;;  %s36_s20 = ssub.s32 %s3678_s16, %s5471_s18 }
   0xc   : > { %p37_p6 = scmp.eq.s32.totalorder %s36_s20, 0  ;;  %s164_s22 = sand.u32 1, %s3670_s14  }
   0xd   : > { %s3344_s23 = sshll.u32 %s3678_s16, 4  ;;  %s165_s28 = scalar_lea.vmem [#allocation3], %s164_s22 }
   0xe   : > { %s3777_s24 = scalar_select %p37_p6, %s3670_s14, %s39_s19  }
   0xf   : > { %s170_s27 = scalar_lea.hbm %s5363_s0, %s3344_s23  ;;  %s172_s29 = sshll.u32 %s165_s28, 4  ;;  %s173_s29 = int_to_ptr.vmem [resolvable:$true] %s172_s29 }
  0x10   : > { %p3782_p7 = pnand %p3413_p5, %p48_p4  ;;  %s3345_s4 = sshll.u32 %s164_s22, 6 }
  0x11   : > { %s3786_s5 = scalar_lea.sflag [#allocation4], %s162_s21  ;;  %s3525_s6 = scalar_lea.vmem %s173_s29, 16 }
  0x12   : > { %p3514_p8 = pneg %p3782_p7  ;;  %p3526_p9 = scmp.ne.s32.totalorder %s173_s29, %s3525_s6 }
  0x13   : > { %s3684_s7 = smov [#allocation3]  }
  0x14   : > { %p3528_p10 = pnand %p3526_p9, %p3514_p8  ;;  %s3530_s8 = sshll.u32 %s3684_s7, 4  ;;  %s3531_s8 = int_to_ptr.vmem [resolvable:$false] %s3530_s8 }
  0x15   : > { %s3532_s9 = scalar_lea.vmem %s3531_s8, 32  ;;  %p3533_p12 = scmp.lt.s32.totalorder %s173_s29, %s3531_s8 }
  0x16   : > { %p3529_p11 = pneg %p3528_p10  ;;  %p3534_p13 = scmp.lt.s32.totalorder %s3532_s9, %s3525_s6 }
  0x18   : > { %p3535_p0 = por %p3534_p13, %p3533_p12 }
  0x1a   : > { %p3536_p2 = pnand %p3535_p0, %p3529_p11 }
  0x1c   : > { %3539 = shalt.err (!%p3536_p2)
}
  0x1d   : > { %3404 = dma.hbm_to_vmem [thread:$0]  (!%p3782_p7), %s170_s27, 16, %s173_s29, %s3786_s5  }
  0x1e   : > { %s3385_s10 = sshll.u32 %s3678_s16, 10  ;;  %s183_s11 = scalar_lea.vmem [#allocation8], %s3345_s4 }
  0x1f   : > { %s190_s19 = sshll.u32 %s183_s11, 4  ;;  %s3798_s20 = sadd.s32 4294967295, %s3682_s17   ;;  %s191_s19 = int_to_ptr.vmem [resolvable:$true] %s190_s19 }
  0x20   : > { %s3340_s21 = sadd.s32 4294967294, %s3682_s17   ;;  %p52_p4 = scmp.ne.s32.totalorder %s3666_s13, %s3662_s12 }
  0x21   : > { %p5368_p5 = scmp.eq.s32.totalorder %s3798_s20, 0  ;;  %p125_p6 = scmp.eq.s32.totalorder %s3798_s20, 1 }
  0x22   : > { %p131_p9 = scmp.eq.s32.totalorder %s3340_s21, 1  ;;  %p3341_p10 = scmp.ge.s32.totalorder %s3682_s17, 1 }
  0x23   : > { %p3808_p11 = por %p5368_p5, %p52_p4  ;;  %p3815_p12 = por %p125_p6, %p46_p1 }
  0x24   : > { %p3819_p13 = por %p131_p9, %p52_p4  ;;  %p138_p0 = scmp.lt.s32.totalorder %s3682_s17, 3 }
  0x25   : > { %s5393_s22 = scalar_select %p3808_p11, 1, 0 }
  0x26   : > { %s5394_s23 = scalar_select %p3815_p12, 1, 0 }
  0x27   : > { %s5395_s25 = scalar_select %p3819_p13, 1, 0 }
  0x28   : > { %p3824_p2 = pnand %p3341_p10, %p138_p0  ;;  %s3685_s27 = smov [#allocation6]  }
  0x29   : > { %s151_s28 = sshll.u32 %s3685_s27, 4  ;;  %s189_s6 = scalar_lea.hbm %s5365_s2, %s3385_s10  ;;  %s152_s28 = int_to_ptr.vmem [resolvable:$true] %s151_s28 }
  0x2a   : > { %s5396_s26 = scalar_select %p3824_p2, 1, 0 }
  0x2b   : > { %p3397_p1 = pneg %p3824_p2  ;;  %s3553_s8 = scalar_lea.vmem %s191_s19, 1024 }
  0x2c   : > { %p3554_p6 = scmp.ne.s32.totalorder %s191_s19, %s3553_s8  ;;  %s3686_s9 = smov [#allocation8]  }
  0x2d   : > { %p3835_p4 = pnand %p3397_p1, %p5368_p5  ;;  %s3558_s11 = sshll.u32 %s3686_s9, 4  ;;  %s3559_s11 = int_to_ptr.vmem [resolvable:$false] %s3558_s11 }
  0x2e   : > { %p3556_p9 = pnand %p3554_p6, %p3514_p8  ;;  %s3560_s21 = scalar_lea.vmem %s3559_s11, 2048 }
  0x2f   : > { %p3561_p0 = scmp.lt.s32.totalorder %s191_s19, %s3559_s11  ;;  %p3562_p3 = scmp.lt.s32.totalorder %s3560_s21, %s3553_s8 }
  0x30   : > { %p3557_p10 = pneg %p3556_p9 }
  0x31   : > { %p3563_p13 = por %p3562_p3, %p3561_p0 }
  0x33   : > { %p3564_p12 = pnand %p3563_p13, %p3557_p10 }
  0x35   : > { %3567 = shalt.err (!%p3564_p12)
}
  0x36   : > { %s3687_s10 = smov 128   ;;  %s3688_s27 = smov 8  }
  0x37   : > { %3407 = dma.hbm_to_vmem [thread:$0]  (!%p3782_p7), %s189_s6, 1024, %s191_s19, %s3786_s5, %s3687_s10, %s3687_s10, %s3688_s27  }
  0x38   : > { %p3570_p1 = pneg %p3835_p4  ;;  %s3579_s29 = scalar_lea.vmem %s152_s28, 128 }
  0x39   : > { %p3580_p8 = scmp.ne.s32.totalorder %s152_s28, %s3579_s29  ;;  %p3587_p5 = scmp.lt.s32.totalorder %s152_s28, %s152_s28 }
  0x3a   : > { %p3588_p11 = scmp.lt.s32.totalorder %s3579_s29, %s3579_s29 }
  0x3b   : > { %p3582_p6 = pnand %p3580_p8, %p3570_p1 }
  0x3c   : > { %p3589_p2 = por %p3588_p11, %p3587_p5 }
  0x3d   : > { %p3583_p9 = pneg %p3582_p6 }
  0x3f   : > { %p3590_p0 = pnand %p3589_p2, %p3583_p9 }
  0x41   : > { %3593 = shalt.err (!%p3590_p0)
}
  0x42   : > { %3400 = dma.hbm_to_vmem [thread:$0]  (!%p3835_p4), %s5364_s1, 128, %s152_s28, [#allocation7]  }
  0x43   : > { %p5398_p3 = scmp.ne.s32.totalorder %s5396_s26, 0 }
  0x45   : > { %202 = sbr.rel (%p5398_p3) target bundleno = 925 (0x39d), region = 32 }
  0x4a   : > { %s204_s30 = sand.u32 1, %s3798_s20   ;;  %s3856_s5 = sand.u32 1, %s3666_s13  }
  0x4b   : > { %s205_s19 = scalar_lea.sflag [#allocation4], %s204_s30  ;;  %s207_s6 = scalar_lea.vmem [#allocation3], %s3856_s5 }
  0x4c   : > { %p5399_p7 = scmp.ne.s32.totalorder %s5393_s22, 0 }
  0x4e   : > { %3645 = dma.done.wait (%p5399_p7), %s205_s19, 16  }
  0x4f   : > { %3647 = vsyncadd (%p5399_p7), %s205_s19, 4294967280  ;;  %p5400_p5 = scmp.eq.s32.totalorder %s3798_s20, 0 }
  0x51   : > { %3649 = dma.done.wait (%p5400_p5), [#allocation7], 128   ;;  %p5401_p11 = pmov %p5400_p5 }
  0x52   : > { %s3350_s26 = sshll.u32 %s3856_s5, 6 }
  0x53   : > { %3651 = vsyncadd (%p5401_p11), [#allocation7], 4294967168  ;;  %s3868_s28 = scalar_lea.vmem [#allocation8], %s3350_s26 }
  0x54   : > { %3653 = dma.done.wait (%p5399_p7), %s205_s19, 1024  }
  0x55   : > { %3655 = vsyncadd (%p5399_p7), %s205_s19, 4294966272  ;;  %vm265_vm0 = vcmask 7168   ;;  %vm279_vm1 = vcmask 146568   ;;  %vm293_vm2 = vcmask 139264   ;;  %v5371_v0 = vmov 0.0   ;;  %v304_v1 = vld [vmem:[%s3868_s28 + $0x10] sm:$0xff] }
  0x56   : > { %270 = vst.msk [vmem:[#allocation2 + $0x18] sm:$0xff] %vm265_vm0, %v5371_v0  ;;  %271 = vst.msk [vmem:[#allocation2 + $0x20] sm:$0xff] %vm265_vm0, %v5371_v0  ;;  %vm268_vm3 = vcmask 1024   ;;  %vm282_vm4 = vcmask 140424   ;;  %966 = vmatprep.mubr.f32.mxu1 %v5371_v0  ;;  %887 = vmatprep.mubr.f32.mxu0 %v5371_v0  ;;  %v302_v2 = vld [vmem:[%s3868_s28] sm:$0xff]  ;;  %s3690_s20 = smov 1   ;;  %v364_v22 = vlaneseq }
  0x57   : > { %266 = vst.msk [vmem:[#allocation2] sm:$0xff] %vm265_vm0, %v5371_v0  ;;  %267 = vst.msk [vmem:[#allocation2 + $0x8] sm:$0xff] %vm265_vm0, %v5371_v0  ;;  %322 = vrot.lane.b32.xlu1 %v304_v1, %s3690_s20  ;;  %318 = vrot.lane.b32.xlu0 %v302_v2, %s3690_s20  ;;  %v305_v3 = vld [vmem:[%s3868_s28 + $0x18] sm:$0xff]  ;;  %v303_v4 = vld [vmem:[%s3868_s28 + $0x8] sm:$0xff]  ;;  %vm258_vm5 = vcmask 293888   ;;  %vm342_vm6 = vcmask 138248  }
  0x58   : > { %273 = vst.msk [vmem:[#allocation2 + $0x30] sm:$0xff] %vm265_vm0, %v5371_v0  ;;  %274 = vst.msk [vmem:[#allocation2 + $0x38] sm:$0xff] %vm265_vm0, %v5371_v0  ;;  %v307_v5 = vld [vmem:[%s3868_s28 + $0x28] sm:$0xff]  ;;  %v306_v6 = vld [vmem:[%s3868_s28 + $0x20] sm:$0xff]  ;;  %v3691_v20 = vmov 1983009808  }
  0x59   : > { %276 = vst.msk [vmem:[#allocation2 + $0x48] sm:$0xff] %vm265_vm0, %v5371_v0  ;;  %277 = vst.msk [vmem:[#allocation2 + $0x50] sm:$0xff] %vm265_vm0, %v5371_v0  ;;  %v309_v7 = vld [vmem:[%s3868_s28 + $0x38] sm:$0xff]  ;;  %v308_v8 = vld [vmem:[%s3868_s28 + $0x30] sm:$0xff]  ;;  %v362_v21 = vunpack.c.l.s4 %v3691_v20  ;;  %s3692_s22 = smov 127   ;;  %v3954_v27 = vshrl.u32 %v364_v22, 7 }
  0x5a   : > { %284 = vst.msk [vmem:[#allocation2 + $0x18] sm:$0xff] %vm279_vm1, %v5371_v0  ;;  %285 = vst.msk [vmem:[#allocation2 + $0x20] sm:$0xff] %vm279_vm1, %v5371_v0  ;;  %v248_v9 = vld [vmem:[#allocation6] sm:$0xff]  ;;  %v3352_v10 = vld [vmem:[%s207_s6] ss:$0 sm:$0xff]  ;;  %s3693_s7 = smov 126  }
  0x5b   : > { %280 = vst.msk [vmem:[#allocation2] sm:$0xff] %vm279_vm1, %v5371_v0  ;;  %281 = vst.msk [vmem:[#allocation2 + $0x8] sm:$0xff] %vm279_vm1, %v5371_v0  ;;  %324 = vrot.lane.b32.xlu1 %v305_v3, %s3690_s20  ;;  %320 = vrot.lane.b32.xlu0 %v303_v4, %s3690_s20  ;;  %v3938_v11 = vmul.f32 %v3352_v10, %v248_v9  ;;  %v363_v26 = vunpack.c.0.s8 %v362_v21  ;;  %v3694_v22 = vmov 1934713408   ;;  %s3695_s9 = smov 32   ;;  %s3696_s11 = smov 48  }
  0x5c   : > { %287 = vst.msk [vmem:[#allocation2 + $0x30] sm:$0xff] %vm279_vm1, %v5371_v0  ;;  %288 = vst.msk [vmem:[#allocation2 + $0x38] sm:$0xff] %vm279_vm1, %v5371_v0  ;;  %s3697_s21 = smov 64   ;;  %s3698_s10 = smov 16   ;;  %vm551_vm7 = vcmask 130048   ;;  %vm553_vm8 = vcmask 261120  }
  0x5d   : > { %290 = vst.msk [vmem:[#allocation2 + $0x48] sm:$0xff] %vm279_vm1, %v5371_v0  ;;  %291 = vst.msk [vmem:[#allocation2 + $0x50] sm:$0xff] %vm279_vm1, %v5371_v0  ;;  %v257_v12 = vmul.f32 %v3938_v11, %v3938_v11  ;;  %v3967_v33 = vsub.s32 %v363_v26, %v3954_v27  ;;  %s3699_s27 = smov 96   ;;  %s3700_s29 = smov 124   ;;  %vm555_vm9 = vcmask 392192   ;;  %vm557_vm10 = vcmask 523264  }
  0x5e   : > { %272 = vst.msk [vmem:[#allocation2 + $0x28] sm:$0x3] %vm268_vm3, %v5371_v0  ;;  %269 = vst.msk [vmem:[#allocation2 + $0x10] sm:$0x3] %vm268_vm3, %v5371_v0  ;;  %s3701_s4 = smov 80   ;;  %s3702_s8 = smov 112  }
  0x5f   : > { %275 = vst.msk [vmem:[#allocation2 + $0x40] sm:$0x3] %vm268_vm3, %v5371_v0  ;;  %278 = vst.msk [vmem:[#allocation2 + $0x58] sm:$0x3] %vm268_vm3, %v5371_v0  ;;  %328 = vrot.lane.b32.xlu1 %v307_v5, %s3690_s20  ;;  %326 = vrot.lane.b32.xlu0 %v306_v6, %s3690_s20  ;;  %v259_v13 = vsel %vm258_vm5, %v257_v12, 0.0  ;;  %s3703_s30 = smov 120  }
  0x60   : > { %295 = vst.msk [vmem:[#allocation2 + $0x18] sm:$0x1] %vm293_vm2, %v5371_v0  ;;  %294 = vst.msk [vmem:[#allocation2] sm:$0x1] %vm293_vm2, %v5371_v0  ;;  %vm559_vm11 = vcmask 654336   ;;  %vm561_vm12 = vcmask 785408  }
  0x61   : > { %286 = vst.msk [vmem:[#allocation2 + $0x28] sm:$0x3] %vm282_vm4, %v5371_v0  ;;  %283 = vst.msk [vmem:[#allocation2 + $0x10] sm:$0x3] %vm282_vm4, %v5371_v0  ;;  %vm563_vm13 = vcmask 916480   ;;  %vm816_vm14 = vcmask 1043456  }
  0x62   : > { %296 = vst.msk [vmem:[#allocation2 + $0x30] sm:$0x1] %vm293_vm2, %v5371_v0  ;;  %297 = vst.msk [vmem:[#allocation2 + $0x48] sm:$0x1] %vm293_vm2, %v5371_v0  ;;  %vm813_vm15 = vcmask 31744   ;;  %s3704_s19 = smov 116  }
  0x63   : > { %289 = vst.msk [vmem:[#allocation2 + $0x40] sm:$0x3] %vm282_vm4, %v5371_v0  ;;  %292 = vst.msk [vmem:[#allocation2 + $0x58] sm:$0x3] %vm282_vm4, %v5371_v0  ;;  %332 = vrot.lane.b32.xlu1 %v309_v7, %s3690_s20  ;;  %330 = vrot.lane.b32.xlu0 %v308_v8, %s3690_s20  ;;  %s3705_s6 = smov 108   ;;  %s3706_s26 = smov 104  }
  0x64   : > { %299 = vst.msk [vmem:[#allocation2 + $0x29] sm:$0x1] %vm293_vm2, %v5371_v0  ;;  %298 = vst.msk [vmem:[#allocation2 + $0x11] sm:$0x1] %vm293_vm2, %v5371_v0  ;;  %s3707_s28 = smov 100   ;;  %s3351_s20 = sshll.u32 %s3856_s5, 4 }
  0x65   : > { %300 = vst.msk [vmem:[#allocation2 + $0x41] sm:$0x1] %vm293_vm2, %v5371_v0  ;;  %301 = vst.msk [vmem:[#allocation2 + $0x59] sm:$0x1] %vm293_vm2, %v5371_v0  ;;  %p5462_p13 = scmp.ne.s32.totalorder %s5394_s23, 0 }
  0x82   : > { %260 = vadd.xlane.f32.xlu0 %v259_v13 }
  0xc9   : > { %v323_v14 = vpop.permute.xlu1 %322  ;;  %v319_v15 = vpop.permute.xlu0 %318 }
  0xca   : > { %345 = vst.msk [vmem:[#allocation2 + $0x19] sm:$0xff] %vm342_vm6, %v323_v14  ;;  %343 = vst.msk [vmem:[#allocation2 + $0x1] sm:$0xff] %vm342_vm6, %v319_v15 }
  0xcd   : > { %v325_v16 = vpop.permute.xlu1 %324  ;;  %v321_v17 = vpop.permute.xlu0 %320 }
  0xce   : > { %346 = vst.msk [vmem:[#allocation2 + $0x21] sm:$0xff] %vm342_vm6, %v325_v16  ;;  %344 = vst.msk [vmem:[#allocation2 + $0x9] sm:$0xff] %vm342_vm6, %v321_v17 }
  0xd1   : > { %v329_v18 = vpop.permute.xlu1 %328  ;;  %v327_v19 = vpop.permute.xlu0 %326  ;;  %v3958_v29 = vld [vmem:[#allocation2] sm:$0xff]  ;;  %v353_v47 = vld [vmem:[#allocation2 + $0x18] sm:$0xff] }
  0xd2   : > { %348 = vst.msk [vmem:[#allocation2 + $0x39] sm:$0xff] %vm342_vm6, %v329_v18  ;;  %347 = vst.msk [vmem:[#allocation2 + $0x31] sm:$0xff] %vm342_vm6, %v327_v19  ;;  %v3976_v38 = vld [vmem:[#allocation2 + $0x1] sm:$0xff]  ;;  %v4038_v4 = vld [vmem:[#allocation2 + $0x19] sm:$0xff] }
  0xd5   : > { %v333_v23 = vpop.permute.xlu1 %332  ;;  %v331_v24 = vpop.permute.xlu0 %330  ;;  %v3948_v25 = vld [vmem:[#allocation2 + $0x8] sm:$0xff]  ;;  %v3956_v28 = vld [vmem:[#allocation2 + $0x20] sm:$0xff] }
  0xd6   : > { %350 = vst.msk [vmem:[#allocation2 + $0x51] sm:$0xff] %vm342_vm6, %v333_v23  ;;  %349 = vst.msk [vmem:[#allocation2 + $0x49] sm:$0xff] %vm342_vm6, %v331_v24  ;;  %582 = vrot.lane.b32.xlu1 %v3948_v25, %s3692_s22  ;;  %v3973_v36 = vld [vmem:[#allocation2 + $0x9] sm:$0xff]  ;;  %v4101_v20 = vld [vmem:[#allocation2 + $0x21] sm:$0xff]  ;;  %v394_v23 = vunpack.c.l.s4 %v3694_v22 }
  0xd7   : > { %v4053_v10 = vld [vmem:[#allocation2 + $0x2] sm:$0xff]  ;;  %v4055_v12 = vld [vmem:[#allocation2 + $0xa] sm:$0xff] }
  0xd8   : > { %v395_v24 = vunpack.c.0.s8 %v394_v23 }
  0xd9   : > { %v3960_v30 = vld [vmem:[#allocation2 + $0x38] sm:$0xff]  ;;  %v977_v31 = vld [vmem:[#allocation2 + $0x30] sm:$0xff] }
  0xda   : > { %v3962_v32 = vld [vmem:[#allocation2 + $0x39] sm:$0xff]  ;;  %586 = vrot.lane.b32.xlu1 %v3956_v28, %s3692_s22  ;;  %v427_v34 = vcombine.low %v3948_v25, %v3960_v30  ;;  %v428_v35 = vcombine.high %v3948_v25, %v3960_v30  ;;  %v360_v37 = vcombine.high %v3958_v29, %v977_v31  ;;  %v3978_v39 = vld [vmem:[#allocation2 + $0x31] sm:$0xff]  ;;  %v359_v44 = vcombine.low %v3958_v29, %v977_v31 }
  0xdb   : > { %v1378_v40 = vcombine.low %v3973_v36, %v3962_v32  ;;  %v1310_v41 = vcombine.low %v3976_v38, %v3978_v39  ;;  %v1379_v42 = vcombine.high %v3973_v36, %v3962_v32  ;;  %v1311_v43 = vcombine.high %v3976_v38, %v3978_v39  ;;  %v4049_v8 = vld [vmem:[#allocation2 + $0x32] sm:$0xff]  ;;  %v4051_v9 = vld [vmem:[#allocation2 + $0x3a] sm:$0xff] }
  0xdc   : > { %v3995_v51 = vrot.slane %v427_v34, %v3967_v33  ;;  %v3998_v52 = vrot.slane %v428_v35, %v3967_v33  ;;  %v4010_v57 = vrot.slane %v359_v44, %v3967_v33  ;;  %v4016_v59 = vrot.slane %v360_v37, %v3967_v33 }
  0xdd   : > { %v357_v45 = vld [vmem:[#allocation2 + $0x48] sm:$0xff]  ;;  %v358_v46 = vld [vmem:[#allocation2 + $0x50] sm:$0xff]  ;;  %v4058_v13 = vrot.slane %v1311_v43, %v3967_v33 }
  0xde   : > { %590 = vrot.lane.b32.xlu1 %v3960_v30, %s3692_s22  ;;  %592 = vrot.lane.b32.xlu0 %v357_v45, %s3692_s22  ;;  %v443_v48 = vcombine.low %v3956_v28, %v358_v46  ;;  %v444_v49 = vcombine.high %v3956_v28, %v358_v46  ;;  %v375_v50 = vcombine.low %v353_v47, %v357_v45  ;;  %v4034_v2 = vld [vmem:[#allocation2 + $0x49] sm:$0xff]  ;;  %v4107_v21 = vld [vmem:[#allocation2 + $0x51] sm:$0xff] }
  0xdf   : > { %v376_v53 = vcombine.high %v353_v47, %v357_v45  ;;  %v1327_v7 = vcombine.high %v4038_v4, %v4034_v2  ;;  %v1326_v37 = vcombine.low %v4038_v4, %v4034_v2  ;;  %v4163_v43 = vld [vmem:[#allocation2 + $0x22] sm:$0xff] }
  0xe0   : > { %v4001_v54 = vrot.slane %v443_v48, %v3967_v33  ;;  %v4004_v55 = vrot.slane %v444_v49, %v3967_v33  ;;  %v4007_v56 = vrot.slane %v375_v50, %v3967_v33  ;;  %v1318_v49 = vrot.slane %v1310_v41, %v3967_v33 }
  0xe1   : > { %v4013_v58 = vrot.slane %v376_v53, %v3967_v33  ;;  %v4061_v14 = vrot.slane %v1327_v7, %v3967_v33 }
  0xe2   : > { %594 = vrot.lane.b32.xlu1 %v358_v46, %s3692_s22  ;;  %997 = vrot.lane.b32.xlu0 %v977_v31, %s3693_s7  ;;  %v460_v60 = vcombine.high %v3995_v51, %v4001_v54  ;;  %v392_v61 = vcombine.high %v4010_v57, %v4007_v56  ;;  %v476_v62 = vcombine.high %v3998_v52, %v4004_v55 }
  0xe3   : > { %v407_v63 = vcombine.low %v4016_v59, %v4013_v58  ;;  %v408_v1 = vcombine.high %v4016_v59, %v4013_v58  ;;  %v391_v3 = vcombine.low %v4010_v57, %v4007_v56  ;;  %v459_v5 = vcombine.low %v3995_v51, %v4001_v54 }
  0xe4   : > { %v475_v6 = vcombine.low %v3998_v52, %v4004_v55  ;;  %v1393_v59 = vrot.slane %v1379_v42, %v3967_v33 }
  0xe6   : > { %580 = vrot.lane.b32.xlu1 %v3958_v29, %s3692_s22  ;;  %1617 = vrot.lane.b32.xlu0 %v3973_v36, %s3692_s22 }
  0xea   : > { %584 = vrot.lane.b32.xlu1 %v353_v47, %s3692_s22  ;;  %1625 = vrot.lane.b32.xlu0 %v3962_v32, %s3692_s22 }
  0xee   : > { %588 = vrot.lane.b32.xlu1 %v977_v31, %s3692_s22  ;;  %1615 = vrot.lane.b32.xlu0 %v3976_v38, %s3692_s22  ;;  %v4155_v31 = vrot.slane %v1378_v40, %v3967_v33 }
  0xf2   : > { %991 = vrot.lane.b32.xlu1 %v3948_v25, %s3693_s7  ;;  %1623 = vrot.lane.b32.xlu0 %v3978_v39, %s3692_s22  ;;  %v4126_v25 = vsub.s32 %v395_v24, %v3954_v27 }
  0xf4   : > { %v474_v26 = vrot.slane %v460_v60, %v4126_v25  ;;  %v4172_v40 = vrot.slane %v407_v63, %v4126_v25  ;;  %v4190_v60 = vld [vmem:[#allocation2 + $0x1a] sm:$0xff] }
  0xf6   : > { %995 = vrot.lane.b32.xlu1 %v3956_v28, %s3693_s7  ;;  %1946 = vrot.lane.b32.xlu0 %v3973_v36, %s3693_s7  ;;  %v1394_v28 = vcombine.low %v4101_v20, %v4107_v21  ;;  %v492_v27 = vcombine.high %v474_v26, %v5371_v0  ;;  %v4258_v36 = vrot.slane %v459_v5, %v4126_v25 }
  0xf8   : > { %v491_v57 = vcombine.high %v4258_v36, %v5371_v0 }
  0xfa   : > { %999 = vrot.lane.b32.xlu1 %v3960_v30, %s3693_s7  ;;  %1954 = vrot.lane.b32.xlu0 %v3962_v32, %s3693_s7  ;;  %v4146_v30 = vrot.slane %v1394_v28, %v3967_v33 }
  0xfc   : > { %v1410_v35 = vcombine.low %v4155_v31, %v4146_v30 }
  0xfe   : > { %1003 = vrot.lane.b32.xlu1 %v358_v46, %s3693_s7  ;;  %1944 = vrot.lane.b32.xlu0 %v3976_v38, %s3693_s7  ;;  %v1334_v46 = vrot.slane %v1326_v37, %v3967_v33 }
 0x100   : > { %v1342_v53 = vcombine.low %v1318_v49, %v1334_v46  ;;  %v1343_v63 = vcombine.high %v1318_v49, %v1334_v46 }
 0x102   : > { %989 = vrot.lane.b32.xlu1 %v3958_v29, %s3693_s7  ;;  %1952 = vrot.lane.b32.xlu0 %v3978_v39, %s3693_s7  ;;  %v4143_v29 = vrot.slane %v392_v61, %v4126_v25  ;;  %v4199_v61 = vrot.slane %v476_v62, %v4126_v25  ;;  %v4202_v38 = vrot.slane %v1342_v53, %v4126_v25  ;;  %v4204_v39 = vld [vmem:[#allocation2 + $0x4a] sm:$0xff] }
 0x103   : > { %v4219_v62 = vrot.slane %v408_v1, %v4126_v25  ;;  %v4228_v7 = vrot.slane %v1343_v63, %v4126_v25  ;;  %v1411_v63 = vcombine.high %v4155_v31, %v4146_v30 }
 0x104   : > { %v424_v34 = vcombine.high %v4143_v29, %v5371_v0  ;;  %5403 = vst [vmem:[#allocation15_spill] sm:$0xff] %v4202_v38  ;;  %v1374_v41 = vcombine.high %v4202_v38, %v5371_v0 }
 0x105   : > { %v1425_v30 = vrot.slane %v1411_v63, %v4126_v25  ;;  %v1375_v63 = vcombine.high %v4228_v7, %v5371_v0 }
 0x106   : > { %993 = vrot.lane.b32.xlu1 %v353_v47, %s3693_s7  ;;  %2572 = vrot.lane.b32.xlu0 %v4055_v12, %s3692_s22  ;;  %v4178_v47 = vld [vmem:[#allocation2 + $0x52] sm:$0xff] }
 0x10a   : > { %1001 = vrot.lane.b32.xlu1 %v357_v45, %s3693_s7  ;;  %2580 = vrot.lane.b32.xlu0 %v4051_v9, %s3692_s22  ;;  %v4175_v45 = vrot.slane %v1410_v35, %v4126_v25 }
 0x10b   : > { %v261_v44 = vpop.xlane.xlu0 %260 }
 0x10c   : > { %5402 = vst [vmem:[#allocation14_spill] sm:$0xff] %v4175_v45  ;;  %v262_v48 = vadd.f32 1e-08, %v261_v44  ;;  %v1442_v50 = vcombine.high %v4175_v45, %v5371_v0  ;;  %v483_v44 = vrot.slane %v475_v6, %v4126_v25 }
 0x10e   : > { %1621 = vrot.lane.b32.xlu1 %v4101_v20, %s3692_s22  ;;  %2570 = vrot.lane.b32.xlu0 %v4053_v10, %s3692_s22  ;;  %3510 = vrsqrt.f32 %v262_v48 }
 0x112   : > { %1629 = vrot.lane.b32.xlu1 %v4107_v21, %s3692_s22  ;;  %2578 = vrot.lane.b32.xlu0 %v4049_v8, %s3692_s22 }
 0x116   : > { %1619 = vrot.lane.b32.xlu1 %v4038_v4, %s3692_s22  ;;  %2901 = vrot.lane.b32.xlu0 %v4055_v12, %s3693_s7 }
 0x11a   : > { %1627 = vrot.lane.b32.xlu1 %v4034_v2, %s3692_s22  ;;  %2909 = vrot.lane.b32.xlu0 %v4051_v9, %s3693_s7 }
 0x11e   : > { %1950 = vrot.lane.b32.xlu1 %v4101_v20, %s3693_s7  ;;  %2899 = vrot.lane.b32.xlu0 %v4053_v10, %s3693_s7 }
 0x122   : > { %1958 = vrot.lane.b32.xlu1 %v4107_v21, %s3693_s7  ;;  %2907 = vrot.lane.b32.xlu0 %v4049_v8, %s3693_s7 }
 0x126   : > { %1948 = vrot.lane.b32.xlu1 %v4038_v4, %s3693_s7  ;;  %528 = vrot.lane.b32.xlu0 %v474_v26, %s3695_s9  ;;  %v3511_v4 = vpop.eup %3510 }
 0x127   : > { %v4232_v58 = vmul.f32 %v3511_v4, %v3938_v11 }
 0x12a   : > { %1956 = vrot.lane.b32.xlu1 %v4034_v2, %s3693_s7  ;;  %532 = vrot.lane.b32.xlu0 %v492_v27, %s3696_s11  ;;  %v1395_v2 = vcombine.high %v4101_v20, %v4107_v21  ;;  %v4246_v20 = vrot.slane %v391_v3, %v4126_v25 }
 0x12c   : > { %v1409_v22 = vrot.slane %v1395_v2, %v3967_v33  ;;  %v423_v23 = vcombine.high %v4246_v20, %v5371_v0 }
 0x12e   : > { %2576 = vrot.lane.b32.xlu1 %v4163_v43, %s3692_s22  ;;  %504 = vrot.lane.b32.xlu0 %v424_v34, %s3696_s11  ;;  %v1426_v11 = vcombine.low %v1393_v59, %v1409_v22  ;;  %v1427_v24 = vcombine.high %v1393_v59, %v1409_v22 }
 0x130   : > { %v1434_v32 = vrot.slane %v1426_v11, %v4126_v25  ;;  %v4270_v26 = vrot.slane %v1427_v24, %v4126_v25 }
 0x132   : > { %2584 = vrot.lane.b32.xlu1 %v4178_v47, %s3692_s22  ;;  %508 = vrot.lane.b32.xlu0 %v4172_v40, %s3697_s21  ;;  %v1444_v3 = vcombine.high %v1434_v32, %v5371_v0 }
 0x136   : > { %2574 = vrot.lane.b32.xlu1 %v4190_v60, %s3692_s22  ;;  %1475 = vrot.lane.b32.xlu0 %v1442_v50, %s3698_s10  ;;  %v493_v50 = vcombine.high %v483_v44, %v5371_v0 }
 0x13a   : > { %2582 = vrot.lane.b32.xlu1 %v4204_v39, %s3692_s22  ;;  %544 = vrot.lane.b32.xlu0 %v4199_v61, %s3699_s27  ;;  %s3386_s22 = sshll.u32 %s3674_s15, 8  ;;  %s3708_s15 = smov [#allocation9]  }
 0x13e   : > { %2905 = vrot.lane.b32.xlu1 %v4163_v43, %s3693_s7  ;;  %1447 = vrot.lane.b32.xlu0 %v1374_v41, %s3698_s10  ;;  %v425_v41 = vcombine.high %v4172_v40, %v5371_v0 }
 0x142   : > { %2913 = vrot.lane.b32.xlu1 %v4178_v47, %s3693_s7  ;;  %516 = vrot.lane.b32.xlu0 %v4219_v62, %s3699_s27 }
 0x146   : > { %2903 = vrot.lane.b32.xlu1 %v4190_v60, %s3693_s7  ;;  %1451 = vrot.lane.b32.xlu0 %v4228_v7, %s3695_s9 }
 0x148   : > { %v583_v1 = vpop.permute.xlu1 %582 }
 0x14a   : > { %2911 = vrot.lane.b32.xlu1 %v4204_v39, %s3693_s7  ;;  %811 = vrot.lane.b32.xlu0 %v4232_v58, %s3700_s29  ;;  %s246_s7 = scalar_lea.vmem [#allocation9], %s3351_s20 }
 0x14c   : > { %v587_v21 = vpop.permute.xlu1 %586 }
 0x14e   : > { %496 = vrot.lane.b32.xlu1 %v423_v23, %s3698_s10  ;;  %1487 = vrot.lane.b32.xlu0 %v1434_v32, %s3697_s21 }
 0x150   : > { %v591_v42 = vpop.permute.xlu1 %590  ;;  %v593_v56 = vpop.permute.xlu0 %592 }
 0x151   : > { %v672_v51 = vcombine.low %v583_v1, %v591_v42  ;;  %v673_v2 = vcombine.high %v583_v1, %v591_v42 }
 0x152   : > { %524 = vrot.lane.b32.xlu1 %v491_v57, %s3698_s10  ;;  %1491 = vrot.lane.b32.xlu0 %v1444_v3, %s3701_s4 }
 0x153   : > { %v4277_v27 = vrot.slane %v672_v51, %v3967_v33  ;;  %v4322_v31 = vrot.slane %v673_v2, %v3967_v33  ;;  %v1358_v2 = vcombine.low %v4058_v13, %v4061_v14 }
 0x154   : > { %v595_v54 = vpop.permute.xlu1 %594  ;;  %v4267_v5 = vpop.permute.xlu0 %997 }
 0x155   : > { %v688_v28 = vcombine.low %v587_v21, %v595_v54  ;;  %v689_v52 = vcombine.high %v587_v21, %v595_v54  ;;  %v494_v54 = vcombine.high %v4199_v61, %v5371_v0 }
 0x156   : > { %500 = vrot.lane.b32.xlu1 %v4143_v29, %s3695_s9  ;;  %1495 = vrot.lane.b32.xlu0 %v4270_v26, %s3699_s27 }
 0x157   : > { %v4280_v34 = vrot.slane %v688_v28, %v3967_v33  ;;  %v4308_v22 = vrot.slane %v689_v52, %v3967_v33 }
 0x158   : > { %v581_v35 = vpop.permute.xlu1 %580  ;;  %v4282_v37 = vpop.permute.xlu0 %1617 }
 0x159   : > { %v705_v29 = vcombine.high %v4277_v27, %v4280_v34  ;;  %v720_v3 = vcombine.low %v4322_v31, %v4308_v22 }
 0x15a   : > { %536 = vrot.lane.b32.xlu1 %v483_v44, %s3697_s21 }
 0x15b   : > { %v4292_v46 = vrot.slane %v705_v29, %v4126_v25  ;;  %v4342_v28 = vrot.slane %v720_v3, %v4126_v25 }
 0x15c   : > { %v585_v48 = vpop.permute.xlu1 %584  ;;  %v4294_v49 = vpop.permute.xlu0 %1625 }
 0x15d   : > { %773 = vrot.lane.b32.xlu0 %v4292_v46, %s3695_s9  ;;  %v620_v55 = vcombine.low %v585_v48, %v593_v56  ;;  %v621_v1 = vcombine.high %v585_v48, %v593_v56  ;;  %v1443_v48 = vcombine.high %v1425_v30, %v5371_v0 }
 0x15e   : > { %540 = vrot.lane.b32.xlu1 %v493_v50, %s3701_s4 }
 0x15f   : > { %v4311_v59 = vrot.slane %v620_v55, %v3967_v33  ;;  %v635_v56 = vrot.slane %v621_v1, %v3967_v33  ;;  %v426_v55 = vcombine.high %v4219_v62, %v5371_v0  ;;  %v1366_v62 = vrot.slane %v1358_v2, %v4126_v25 }
 0x160   : > { %v589_v6 = vpop.permute.xlu1 %588  ;;  %v4300_v53 = vpop.permute.xlu0 %1615 }
 0x161   : > { %v604_v4 = vcombine.low %v581_v35, %v589_v6  ;;  %v605_v11 = vcombine.high %v581_v35, %v589_v6  ;;  %v1376_v7 = vcombine.high %v1366_v62, %v5371_v0 }
 0x162   : > { %512 = vrot.lane.b32.xlu1 %v425_v41, %s3701_s4 }
 0x163   : > { %v4314_v21 = vrot.slane %v604_v4, %v3967_v33  ;;  %v619_v42 = vrot.slane %v605_v11, %v3967_v33 }
 0x164   : > { %v4316_v23 = vpop.permute.xlu1 %991  ;;  %v4318_v40 = vpop.permute.xlu0 %1623 }
 0x165   : > { %v637_v32 = vcombine.high %v4314_v21, %v4311_v59  ;;  %v653_v35 = vcombine.high %v619_v42, %v635_v56 }
 0x166   : > { %1479 = vrot.lane.b32.xlu1 %v1425_v30, %s3695_s9 }
 0x167   : > { %v4329_v57 = vrot.slane %v637_v32, %v4126_v25  ;;  %v4351_v61 = vrot.slane %v653_v35, %v4126_v25 }
 0x168   : > { %v996_v24 = vpop.permute.xlu1 %995  ;;  %v4333_v51 = vpop.permute.xlu0 %1946 }
 0x169   : > { %745 = vrot.lane.b32.xlu0 %v4329_v57, %s3695_s9 }
 0x16a   : > { %548 = vrot.lane.b32.xlu1 %v494_v54, %s3702_s8  ;;  %v652_v54 = vcombine.low %v619_v42, %v635_v56 }
 0x16c   : > { %v1000_v44 = vpop.permute.xlu1 %999  ;;  %v4344_v29 = vpop.permute.xlu0 %1954  ;;  %v4393_v56 = vrot.slane %v652_v54, %v4126_v25  ;;  %v1707_v54 = vcombine.low %v4282_v37, %v4294_v49 }
 0x16d   : > { %781 = vrot.lane.b32.xlu0 %v4342_v28, %s3697_s21 }
 0x16e   : > { %1483 = vrot.lane.b32.xlu1 %v1443_v48, %s3696_s11  ;;  %v1715_v18 = vrot.slane %v1707_v54, %v3967_v33 }
 0x170   : > { %v1004_v50 = vpop.permute.xlu1 %1003  ;;  %v4353_v52 = vpop.permute.xlu0 %1944 }
 0x171   : > { %761 = vrot.lane.b32.xlu0 %v4351_v61, %s3699_s27  ;;  %v1097_v1 = vcombine.low %v996_v24, %v1004_v50  ;;  %v1098_v2 = vcombine.high %v996_v24, %v1004_v50  ;;  %v721_v24 = vcombine.high %v4322_v31, %v4308_v22  ;;  %v1082_v50 = vcombine.high %v4316_v23, %v1000_v44 }
 0x172   : > { %520 = vrot.lane.b32.xlu1 %v426_v55, %s3702_s8 }
 0x174   : > { %v990_v6 = vpop.permute.xlu1 %989  ;;  %v4360_v41 = vpop.permute.xlu0 %1952 }
 0x175   : > { %v1013_v30 = vcombine.low %v990_v6, %v4267_v5  ;;  %v1014_v35 = vcombine.high %v990_v6, %v4267_v5 }
 0x176   : > { %1455 = vrot.lane.b32.xlu1 %v1375_v63, %s3696_s11  ;;  %v1081_v63 = vcombine.low %v4316_v23, %v1000_v44  ;;  %v4417_v44 = vrot.slane %v721_v24, %v4126_v25 }
 0x177   : > { %v4379_v19 = vrot.slane %v1013_v30, %v3967_v33  ;;  %v1028_v6 = vrot.slane %v1014_v35, %v3967_v33  ;;  %v1096_v35 = vrot.slane %v1082_v50, %v3967_v33 }
 0x178   : > { %v994_v4 = vpop.permute.xlu1 %993  ;;  %v4367_v11 = vpop.permute.xlu0 %2572  ;;  %v4402_v30 = vrot.slane %v1081_v63, %v3967_v33 }
 0x17a   : > { %1459 = vrot.lane.b32.xlu1 %v1366_v62, %s3697_s21  ;;  %v4386_v62 = vrot.slane %v1097_v1, %v3967_v33  ;;  %v1112_v1 = vrot.slane %v1098_v2, %v3967_v33 }
 0x17c   : > { %v1002_v32 = vpop.permute.xlu1 %1001  ;;  %v4372_v3 = vpop.permute.xlu0 %2580  ;;  %v1114_v22 = vcombine.high %v4402_v30, %v4386_v62  ;;  %v1130_v2 = vcombine.high %v1096_v35, %v1112_v1  ;;  %v1129_v24 = vcombine.low %v1096_v35, %v1112_v1  ;;  %v1639_v1 = vcombine.low %v4300_v53, %v4318_v40 }
 0x17d   : > { %v1029_v48 = vcombine.low %v994_v4, %v1002_v32  ;;  %v1030_v55 = vcombine.high %v994_v4, %v1002_v32 }
 0x17e   : > { %1463 = vrot.lane.b32.xlu1 %v1376_v7, %s3701_s4  ;;  %v4439_v15 = vrot.slane %v1114_v22, %v4126_v25  ;;  %v4451_v35 = vrot.slane %v1130_v2, %v4126_v25  ;;  %v4459_v38 = vrot.slane %v1129_v24, %v4126_v25  ;;  %v636_v2 = vcombine.low %v4314_v21, %v4311_v59 }
 0x17f   : > { %v4382_v17 = vrot.slane %v1029_v48, %v3967_v33  ;;  %v1044_v16 = vrot.slane %v1030_v55, %v3967_v33 }
 0x180   : > { %v4388_v42 = vpop.permute.xlu1 %1621  ;;  %v4390_v5 = vpop.permute.xlu0 %2570 }
 0x181   : > { %5404 = vst [vmem:[#allocation16_spill] sm:$0xff] %v4390_v5  ;;  %v1046_v4 = vcombine.high %v4379_v19, %v4382_v17  ;;  %v1061_v7 = vcombine.low %v1028_v6, %v1044_v16 }
 0x182   : > { %753 = vrot.lane.b32.xlu1 %v4393_v56, %s3697_s21 }
 0x183   : > { %v4408_v32 = vrot.slane %v1046_v4, %v4126_v25  ;;  %v4432_v63 = vrot.slane %v1061_v7, %v4126_v25  ;;  %v704_v7 = vcombine.low %v4277_v27, %v4280_v34  ;;  %v4468_v27 = vrot.slane %v1639_v1, %v3967_v33 }
 0x184   : > { %v4412_v23 = vpop.permute.xlu1 %1629  ;;  %v4414_v31 = vpop.permute.xlu0 %2578 }
 0x185   : > { %5405 = vst [vmem:[#allocation17_spill] sm:$0xff] %v4414_v31  ;;  %v1723_v48 = vcombine.low %v4388_v42, %v4412_v23  ;;  %1154 = vrot.lane.b32.xlu0 %v4408_v32, %s3695_s9 }
 0x186   : > { %789 = vrot.lane.b32.xlu1 %v4417_v44, %s3699_s27 }
 0x187   : > { %v4429_v55 = vrot.slane %v1723_v48, %v3967_v33  ;;  %v1062_v48 = vcombine.high %v1028_v6, %v1044_v16  ;;  %v4475_v6 = vrot.slane %v704_v7, %v4126_v25 }
 0x188   : > { %v4434_v4 = vpop.permute.xlu1 %1619  ;;  %v4436_v50 = vpop.permute.xlu0 %2901 }
 0x189   : > { %5406 = vst [vmem:[#allocation18_spill] sm:$0xff] %v4436_v50  ;;  %1162 = vrot.lane.b32.xlu0 %v4432_v63, %s3697_s21  ;;  %v1740_v22 = vcombine.high %v1715_v18, %v4429_v55  ;;  %5408 = vst [vmem:[#allocation20_spill] sm:$0xff] %v4475_v6 }
 0x18a   : > { %1182 = vrot.lane.b32.xlu1 %v4439_v15, %s3695_s9 }
 0x18b   : > { %v1754_v34 = vrot.slane %v1740_v22, %v4126_v25 }
 0x18c   : > { %v4454_v0 = vpop.permute.xlu1 %1627  ;;  %v4456_v54 = vpop.permute.xlu0 %2909 }
 0x18d   : > { %5407 = vst [vmem:[#allocation19_spill] sm:$0xff] %v4456_v54  ;;  %v1655_v45 = vcombine.low %v4434_v4, %v4454_v0  ;;  %1198 = vrot.lane.b32.xlu0 %v4451_v35, %s3699_s27  ;;  %v4484_v54 = vrot.slane %v1062_v48, %v4126_v25  ;;  %v4501_v48 = vrot.slane %v636_v2, %v4126_v25 }
 0x18e   : > { %1190 = vrot.lane.b32.xlu1 %v4459_v38, %s3697_s21 }
 0x18f   : > { %v4471_v16 = vrot.slane %v1655_v45, %v3967_v33  ;;  %v5410_v45 = vmov 0.0  }
 0x190   : > { %v4479_v24 = vpop.permute.xlu1 %1950  ;;  %v4481_v50 = vpop.permute.xlu0 %2899  ;;  %v736_v7 = vcombine.high %v4475_v6, %v5410_v45  ;;  %v738_v6 = vcombine.high %v4342_v28, %v5410_v45  ;;  %v670_v2 = vcombine.high %v4393_v56, %v5410_v45 }
 0x191   : > { %5409 = vst [vmem:[#allocation21_spill] sm:$0xff] %v4481_v50  ;;  %v1672_v1 = vcombine.high %v4468_v27, %v4471_v16  ;;  %1808 = vrot.lane.b32.xlu0 %v1754_v34, %s3695_s9  ;;  %v1045_v50 = vcombine.low %v4379_v19, %v4382_v17  ;;  %v737_v17 = vcombine.high %v4292_v46, %v5410_v45 }
 0x192   : > { %1170 = vrot.lane.b32.xlu1 %v4484_v54, %s3699_s27  ;;  %v1113_v19 = vcombine.low %v4402_v30, %v4386_v62 }
 0x193   : > { %v4494_v59 = vrot.slane %v1672_v1, %v4126_v25 }
 0x194   : > { %v4496_v21 = vpop.permute.xlu1 %1958  ;;  %v4498_v22 = vpop.permute.xlu0 %2907  ;;  %v4541_v62 = vrot.slane %v1113_v19, %v4126_v25 }
 0x195   : > { %5411 = vst [vmem:[#allocation22_spill] sm:$0xff] %v4498_v22  ;;  %769 = vrot.lane.b32.xlu0 %v736_v7, %s3698_s10  ;;  %v668_v22 = vcombine.high %v4501_v48, %v5410_v45  ;;  %v4521_v7 = vrot.slane %v1045_v50, %v4126_v25  ;;  %v669_v50 = vcombine.high %v4329_v57, %v5410_v45 }
 0x196   : > { %1780 = vrot.lane.b32.xlu1 %v4494_v59, %s3695_s9  ;;  %5413 = vst [vmem:[#allocation24_spill] sm:$0xff] %v4541_v62  ;;  %v1145_v57 = vcombine.high %v4541_v62, %v5410_v45 }
 0x197   : > { %5412 = vst [vmem:[#allocation23_spill] sm:$0xff] %v4521_v7  ;;  %v1077_v56 = vcombine.high %v4521_v7, %v5410_v45 }
 0x198   : > { %v4510_v1 = vpop.permute.xlu1 %1948  ;;  %v4512_v5 = vpop.permute.xlu0 %528 }
 0x199   : > { %785 = vrot.lane.b32.xlu0 %v738_v6, %s3701_s4  ;;  %v1739_v6 = vcombine.low %v1715_v18, %v4429_v55  ;;  %v1078_v18 = vcombine.high %v4408_v32, %v5410_v45 }
 0x19a   : > { %741 = vrot.lane.b32.xlu1 %v668_v22, %s3698_s10 }
 0x19b   : > { %v4550_v55 = vrot.slane %v1739_v6, %v4126_v25  ;;  %v1724_v6 = vcombine.high %v4388_v42, %v4412_v23  ;;  %v1772_v42 = vcombine.high %v1754_v34, %v5410_v45  ;;  %v2052_v23 = vcombine.low %v4479_v24, %v4496_v21 }
 0x19c   : > { %v4527_v28 = vpop.permute.xlu1 %1956  ;;  %v4529_v31 = vpop.permute.xlu0 %532 }
 0x19d   : > { %757 = vrot.lane.b32.xlu0 %v670_v2, %s3701_s4  ;;  %5414 = vst [vmem:[#allocation25_spill] sm:$0xff] %v4550_v55  ;;  %v1771_v2 = vcombine.high %v4550_v55, %v5410_v45 }
 0x19e   : > { %777 = vrot.lane.b32.xlu1 %v737_v17, %s3696_s11  ;;  %v739_v17 = vcombine.high %v4417_v44, %v5410_v45  ;;  %v1708_v44 = vcombine.high %v4282_v37, %v4294_v49  ;;  %v2036_v49 = vcombine.low %v4333_v51, %v4344_v29 }
 0x1a0   : > { %v4538_v46 = vpop.permute.xlu1 %2576  ;;  %v4545_v30 = vpop.permute.xlu0 %504  ;;  %v4593_v37 = vrot.slane %v1708_v44, %v3967_v33  ;;  %v2044_v44 = vrot.slane %v2036_v49, %v3967_v33  ;;  %v1968_v49 = vcombine.low %v4353_v52, %v4360_v41 }
 0x1a1   : > { %1150 = vrot.lane.b32.xlu0 %v1077_v56, %s3698_s10  ;;  %v1148_v56 = vcombine.high %v4451_v35, %v5410_v45 }
 0x1a2   : > { %749 = vrot.lane.b32.xlu1 %v669_v50, %s3696_s11 }
 0x1a4   : > { %v4552_v22 = vpop.permute.xlu1 %2584  ;;  %v4564_v32 = vpop.permute.xlu0 %508 }
 0x1a5   : > { %1158 = vrot.lane.b32.xlu0 %v1078_v18, %s3696_s11  ;;  %v1146_v18 = vcombine.high %v4439_v15, %v5410_v45  ;;  %v671_v15 = vcombine.high %v4351_v61, %v5410_v45  ;;  %v1080_v61 = vcombine.high %v4484_v54, %v5410_v45  ;;  %v1079_v54 = vcombine.high %v4432_v63, %v5410_v45 }
 0x1a6   : > { %1178 = vrot.lane.b32.xlu1 %v1145_v57, %s3698_s10  ;;  %v4581_v57 = vrot.slane %v1724_v6, %v3967_v33  ;;  %v1671_v6 = vcombine.low %v4468_v27, %v4471_v16  ;;  %v1984_v16 = vcombine.low %v4510_v1, %v4527_v28 }
 0x1a8   : > { %v4562_v19 = vpop.permute.xlu1 %2574  ;;  %v4586_v35 = vpop.permute.xlu0 %1475  ;;  %v1755_v34 = vcombine.low %v4593_v37, %v4581_v57 }
 0x1a9   : > { %1804 = vrot.lane.b32.xlu0 %v1771_v2, %s3698_s10  ;;  %5415 = vst [vmem:[#allocation26_spill] sm:$0xff] %v4586_v35 }
 0x1aa   : > { %793 = vrot.lane.b32.xlu1 %v739_v17, %s3702_s8  ;;  %v2060_v17 = vrot.slane %v2052_v23, %v3967_v33 }
 0x1ac   : > { %v4572_v50 = vpop.permute.xlu1 %2582  ;;  %v2069_v23 = vcombine.high %v2044_v44, %v2060_v17  ;;  %v2068_v27 = vcombine.low %v2044_v44, %v2060_v17  ;;  %v1992_v17 = vrot.slane %v1984_v16, %v3967_v33  ;;  %v1976_v44 = vrot.slane %v1968_v49, %v3967_v33 }
 0x1ad   : > { %1202 = vrot.lane.b32.xlu0 %v1148_v56, %s3702_s8  ;;  %v1704_v49 = vcombine.high %v4494_v59, %v5410_v45 }
 0x1ae   : > { %1186 = vrot.lane.b32.xlu1 %v1146_v18, %s3696_s11  ;;  %v1147_v18 = vcombine.high %v4459_v38, %v5410_v45  ;;  %v4623_v38 = vrot.slane %v1671_v6, %v4126_v25  ;;  %v2083_v63 = vrot.slane %v2069_v23, %v4126_v25  ;;  %v4638_v6 = vrot.slane %v2068_v27, %v4126_v25 }
 0x1af   : > { %v1656_v23 = vcombine.high %v4434_v4, %v4454_v0  ;;  %v2000_v16 = vcombine.low %v1976_v44, %v1992_v17  ;;  %v1640_v27 = vcombine.high %v4300_v53, %v4318_v40  ;;  %v2281_v40 = vcombine.low %v4190_v60, %v4204_v39 }
 0x1b0   : > { %v4590_v2 = vpop.permute.xlu1 %2905  ;;  %5416 = vst [vmem:[#allocation27_spill] sm:$0xff] %v4623_v38  ;;  %5418 = vst [vmem:[#allocation29_spill] sm:$0xff] %v4638_v6  ;;  %v2101_v59 = vcombine.high %v2083_v63, %v5410_v45 }
 0x1b1   : > { %1812 = vrot.lane.b32.xlu0 %v1772_v42, %s3696_s11  ;;  %v4611_v42 = vpop.permute.xlu0 %544  ;;  %v4667_v53 = vrot.slane %v1640_v27, %v3967_v33  ;;  %v4685_v27 = vrot.slane %v2281_v40, %v3967_v33 }
 0x1b2   : > { %765 = vrot.lane.b32.xlu1 %v671_v15, %s3702_s8  ;;  %v1763_v15 = vrot.slane %v1755_v34, %v4126_v25 }
 0x1b4   : > { %v4606_v56 = vpop.permute.xlu1 %2913  ;;  %v1773_v0 = vcombine.high %v1763_v15, %v5410_v45 }
 0x1b5   : > { %1174 = vrot.lane.b32.xlu0 %v1080_v61, %s3702_s8  ;;  %v4629_v34 = vpop.permute.xlu0 %1447 }
 0x1b6   : > { %1194 = vrot.lane.b32.xlu1 %v1147_v18, %s3701_s4  ;;  %5417 = vst [vmem:[#allocation28_spill] sm:$0xff] %v4629_v34  ;;  %v1703_v18 = vcombine.high %v4623_v38, %v5410_v45  ;;  %v2100_v38 = vcombine.high %v4638_v6, %v5410_v45 }
 0x1b8   : > { %v4620_v55 = vpop.permute.xlu1 %2903 }
 0x1b9   : > { %1816 = vrot.lane.b32.xlu0 %v1763_v15, %s3697_s21  ;;  %v4653_v35 = vpop.permute.xlu0 %516 }
 0x1ba   : > { %1166 = vrot.lane.b32.xlu1 %v1079_v54, %s3701_s4  ;;  %v1445_v54 = vcombine.high %v4270_v26, %v5410_v45  ;;  %v4658_v26 = vrot.slane %v1656_v23, %v3967_v33 }
 0x1bc   : > { %v4633_v61 = vpop.permute.xlu1 %2911  ;;  %v1687_v15 = vcombine.low %v4667_v53, %v4658_v26 }
 0x1bd   : > { %2137 = vrot.lane.b32.xlu0 %v2083_v63, %s3695_s9  ;;  %v5421_v63 = vcombine.high %v4058_v13, %v4061_v14  ;;  %v5424_v14 = vcombine.low %v4055_v12, %v4051_v9 }
 0x1be   : > { %1776 = vrot.lane.b32.xlu1 %v1703_v18, %s3698_s10  ;;  %v4664_v18 = vrot.slane %v2000_v16, %v4126_v25  ;;  %v2349_v16 = vcombine.low %v4163_v43, %v4178_v47 }
 0x1c0   : > { %v4647_v34 = vpop.permute.xlu1 %496  ;;  %5419 = vst [vmem:[#allocation30_spill] sm:$0xff] %v4664_v18  ;;  %v2032_v23 = vcombine.high %v4664_v18, %v5410_v45  ;;  %v5422_v18 = vcombine.low %v4053_v10, %v4049_v8 }
 0x1c1   : > { %1499 = vrot.lane.b32.xlu0 %v1445_v54, %s3702_s8 }
 0x1c2   : > { %2133 = vrot.lane.b32.xlu1 %v2100_v38, %s3698_s10  ;;  %v4675_v38 = vpop.permute.xlu0 %1451  ;;  %v4696_v7 = vrot.slane %v5422_v18, %v3967_v33 }
 0x1c3   : > { %5420 = vst [vmem:[#allocation31_spill] sm:$0xff] %v4675_v38  ;;  %v1373_v38 = vrot.slane %v5421_v63, %v4126_v25 }
 0x1c4   : > { %v525_v4 = vpop.permute.xlu1 %524  ;;  %v2297_v13 = vcombine.low %v4696_v7, %v4685_v27 }
 0x1c5   : > { %1820 = vrot.lane.b32.xlu0 %v1773_v0, %s3701_s4  ;;  %v2001_v0 = vcombine.high %v1976_v44, %v1992_v17  ;;  %v4711_v17 = vrot.slane %v5424_v14, %v3967_v33  ;;  %v1985_v14 = vcombine.high %v4510_v1, %v4527_v28 }
 0x1c6   : > { %1784 = vrot.lane.b32.xlu1 %v1704_v49, %s3696_s11  ;;  %v1695_v49 = vrot.slane %v1687_v15, %v4126_v25  ;;  %v4701_v40 = vpop.permute.xlu0 %811  ;;  %v4722_v63 = vrot.slane %v2297_v13, %v4126_v25  ;;  %v2678_v13 = vcombine.low %v4538_v46, %v4552_v22 }
 0x1c7   : > { %5423 = vst [vmem:[#allocation32_spill] sm:$0xff] %v4701_v40  ;;  %v2015_v18 = vrot.slane %v2001_v0, %v4126_v25  ;;  %v4743_v28 = vrot.slane %v1985_v14, %v3967_v33 }
 0x1c8   : > { %v501_v54 = vpop.permute.xlu1 %500  ;;  %v1705_v44 = vcombine.high %v1695_v49, %v5410_v45  ;;  %5425 = vst [vmem:[#allocation33_spill] sm:$0xff] %v4722_v63  ;;  %v2329_v1 = vcombine.high %v4722_v63, %v5410_v45 }
 0x1c9   : > { %2141 = vrot.lane.b32.xlu0 %v2101_v59, %s3696_s11  ;;  %v4699_v59 = vrot.slane %v2349_v16, %v3967_v33  ;;  %v565_v16 = vsel %vm551_vm7, %v4258_v36, %v525_v4  ;;  %v2033_v40 = vcombine.high %v2015_v18, %v5410_v45 }
 0x1ca   : > { %2105 = vrot.lane.b32.xlu1 %v2032_v23, %s3698_s10  ;;  %v4726_v0 = vpop.permute.xlu0 %1487  ;;  %v566_v62 = vsel %vm553_vm8, %v565_v16, %v4512_v5  ;;  %v1688_v5 = vcombine.high %v4667_v53, %v4658_v26  ;;  %v2662_v53 = vcombine.low %v4367_v11, %v4372_v3  ;;  %v4775_v16 = vrot.slane %v2678_v13, %v3967_v33 }
 0x1cb   : > { %v2365_v23 = vcombine.low %v4711_v17, %v4699_v59 }
 0x1cc   : > { %v537_v6 = vpop.permute.xlu1 %536  ;;  %v4785_v14 = vrot.slane %v2662_v53, %v3967_v33 }
 0x1cd   : > { %1219 = vrot.lane.b32.xlu0 %v4232_v58, %s3703_s30  ;;  %v4732_v4 = vrot.slane %v2365_v23, %v4126_v25 }
 0x1ce   : > { %1467 = vrot.lane.b32.xlu1 %v1373_v38, %s3699_s27 }
 0x1cf   : > { %5426 = vst [vmem:[#allocation34_spill] sm:$0xff] %v4732_v4 }
 0x1d0   : > { %v541_v15 = vpop.permute.xlu1 %540 }
 0x1d1   : > { %1792 = vrot.lane.b32.xlu0 %v1705_v44, %s3701_s4 }
 0x1d2   : > { %1788 = vrot.lane.b32.xlu1 %v1695_v49, %s3697_s21  ;;  %v1969_v49 = vcombine.high %v4353_v52, %v4360_v41  ;;  %v567_v52 = vsel %vm555_vm9, %v566_v62, %v4529_v31  ;;  %v2053_v41 = vcombine.high %v4479_v24, %v4496_v21  ;;  %v552_v31 = vsel %vm551_vm7, %v4246_v20, %v4647_v34  ;;  %v4764_v62 = vpop.permute.xlu0 %1491 }
 0x1d3   : > { %v2037_v21 = vcombine.high %v4333_v51, %v4344_v29  ;;  %v1702_v20 = vrot.slane %v1688_v5, %v4126_v25  ;;  %v1756_v34 = vcombine.high %v4593_v37, %v4581_v57  ;;  %v1377_v29 = vcombine.high %v1373_v38, %v5410_v45 }
 0x1d4   : > { %v513_v36 = vpop.permute.xlu1 %512  ;;  %v4757_v26 = vrot.slane %v1969_v49, %v3967_v33  ;;  %v2694_v37 = vcombine.low %v4785_v14, %v4775_v16 }
 0x1d5   : > { %2113 = vrot.lane.b32.xlu0 %v2033_v40, %s3696_s11  ;;  %v568_v40 = vsel %vm557_vm10, %v567_v52, %v537_v6  ;;  %v554_v6 = vsel %vm553_vm8, %v552_v31, %v501_v54  ;;  %v2051_v57 = vrot.slane %v2037_v21, %v3967_v33 }
 0x1d6   : > { %2109 = vrot.lane.b32.xlu1 %v2015_v18, %s3695_s9  ;;  %v2397_v18 = vcombine.high %v4732_v4, %v5410_v45  ;;  %v569_v24 = vsel %vm559_vm11, %v568_v40, %v541_v15  ;;  %v2016_v23 = vcombine.low %v4757_v26, %v4743_v28  ;;  %v2067_v15 = vrot.slane %v2053_v41, %v3967_v33 }
 0x1d7   : > { %v570_v54 = vsel %vm561_vm12, %v569_v24, %v4611_v42  ;;  %v556_v49 = vsel %vm555_vm9, %v554_v6, %v4545_v30  ;;  %v4796_v42 = vpop.permute.xlu0 %1495  ;;  %v2298_v30 = vcombine.high %v4696_v7, %v4685_v27  ;;  %v1770_v41 = vrot.slane %v1756_v34, %v4126_v25 }
 0x1d8   : > { %v4752_v44 = vpop.permute.xlu1 %1479  ;;  %v4799_v38 = vrot.slane %v2016_v23, %v4126_v25  ;;  %v2084_v5 = vcombine.low %v2051_v57, %v2067_v15  ;;  %v558_v13 = vsel %vm557_vm10, %v556_v49, %v4564_v32  ;;  %v4818_v7 = vrot.slane %v2694_v37, %v4126_v25 }
 0x1d9   : > { %2402 = vrot.lane.b32.xlu0 %v2329_v1, %s3698_s10  ;;  %v560_v40 = vsel %vm559_vm11, %v558_v13, %v513_v36  ;;  %v4815_v53 = vrot.slane %v2298_v30, %v4126_v25  ;;  %v2366_v36 = vcombine.high %v4711_v17, %v4699_v59  ;;  %v2350_v59 = vcombine.high %v4163_v43, %v4178_v47 }
 0x1da   : > { %2430 = vrot.lane.b32.xlu1 %v2397_v18, %s3698_s10  ;;  %5427 = vst [vmem:[#allocation35_spill] sm:$0xff] %v4818_v7  ;;  %v2092_v27 = vrot.slane %v2084_v5, %v4126_v25  ;;  %v562_v31 = vsel %vm561_vm12, %v560_v40, %v4653_v35  ;;  %v2726_v35 = vcombine.high %v4818_v7, %v5410_v45  ;;  %v5432_v40 = vld [vmem:[#allocation16_spill] sm:$0xff] }
 0x1db   : > { %v4812_v18 = vpop.permute.xlu0 %773  ;;  %v2380_v6 = vrot.slane %v2366_v36, %v4126_v25  ;;  %v2085_v23 = vcombine.high %v2051_v57, %v2067_v15  ;;  %v1706_v34 = vcombine.high %v1702_v20, %v5410_v45  ;;  %v1774_v43 = vcombine.high %v1770_v41, %v5410_v45 }
 0x1dc   : > { %v549_v51 = vpop.permute.xlu1 %548  ;;  %v2102_v57 = vcombine.high %v2092_v27, %v5410_v45  ;;  %v2610_v30 = vcombine.low %v4562_v19, %v4572_v50 }
 0x1dd   : > { %1796 = vrot.lane.b32.xlu0 %v1702_v20, %s3699_s27  ;;  %v571_v1 = vsel %vm563_vm13, %v570_v54, %v549_v51  ;;  %v4846_v51 = vrot.slane %v2350_v59, %v3967_v33  ;;  %v5429_v54 = vcombine.high %v4055_v12, %v4051_v9  ;;  %v2099_v20 = vrot.slane %v2085_v23, %v4126_v25 }
 0x1de   : > { %1471 = vrot.lane.b32.xlu1 %v1377_v29, %s3702_s8  ;;  %3356 = vmatprep.subr.msk.mxu1 %vm816_vm14, %v571_v1  ;;  %v2695_v9 = vcombine.high %v4785_v14, %v4775_v16  ;;  %v2398_v13 = vcombine.high %v2380_v6, %v5410_v45  ;;  %v2618_v14 = vrot.slane %v2610_v30, %v3967_v33 }
 0x1df   : > { %v4830_v21 = vpop.permute.xlu0 %745  ;;  %v4858_v49 = vrot.slane %v5429_v54, %v3967_v33  ;;  %v2282_v59 = vcombine.high %v4190_v60, %v4204_v39  ;;  %v2330_v60 = vcombine.high %v4815_v53, %v5410_v45 }
 0x1e0   : > { %v4805_v52 = vpop.permute.xlu1 %1483  ;;  %v2709_v16 = vrot.slane %v2695_v9, %v4126_v25  ;;  %v2939_v9 = vcombine.low %v4620_v55, %v4633_v61 }
 0x1e1   : > { %2117 = vrot.lane.b32.xlu0 %v4799_v38, %s3697_s21  ;;  %v2381_v15 = vcombine.low %v4858_v49, %v4846_v51 }
 0x1e2   : > { %1824 = vrot.lane.b32.xlu1 %v1770_v41, %s3699_s27  ;;  %v5431_v41 = vld [vmem:[#allocation17_spill] sm:$0xff]  ;;  %v2727_v30 = vcombine.high %v2709_v16, %v5410_v45 }
 0x1e3   : > { %v4851_v47 = vpop.permute.xlu0 %781  ;;  %v2389_v37 = vrot.slane %v2381_v15, %v4126_v25  ;;  %v4907_v15 = vrot.slane %v2282_v59, %v3967_v33  ;;  %v5437_v59 = vld [vmem:[#allocation21_spill] sm:$0xff] }
 0x1e4   : > { %v521_v32 = vpop.permute.xlu1 %520 }
 0x1e5   : > { %2406 = vrot.lane.b32.xlu0 %v4815_v53, %s3695_s9  ;;  %v564_v24 = vsel %vm563_vm13, %v562_v31, %v521_v32  ;;  %v2594_v32 = vcombine.low %v5432_v40, %v5431_v41  ;;  %v2399_v54 = vcombine.high %v2389_v37, %v5410_v45 }
 0x1e6   : > { %2145 = vrot.lane.b32.xlu1 %v2092_v27, %s3697_s21  ;;  %3357 = vmatpush1.msk.msra.mxu1 %vm816_vm14, %v564_v24 }
 0x1e7   : > { %3358 = vmatmul.mubr.msk.f32.vlgmr.msra.gmra.mxu1 %vm813_vm15, %v4232_v58  ;;  %v4871_v12 = vpop.permute.xlu0 %761  ;;  %v2602_v36 = vrot.slane %v2594_v32, %v3967_v33  ;;  %v3007_v32 = vcombine.low %v4590_v2, %v4606_v56 }
 0x1e8   : > { %v4838_v17 = vpop.permute.xlu1 %1455  ;;  %1590 = vmatprep.mubr.f32.mxu1 %v5410_v45 }
 0x1e9   : > { %2759 = vrot.lane.b32.xlu0 %v2726_v35, %s3698_s10  ;;  %v2103_v35 = vcombine.high %v2099_v20, %v5410_v45  ;;  %v4947_v4 = vrot.slane %v3007_v32, %v3967_v33 }
 0x1ea   : > { %2434 = vrot.lane.b32.xlu1 %v2380_v6, %s3695_s9  ;;  %v2626_v6 = vcombine.low %v2602_v36, %v2618_v14 }
 0x1ec   : > { %v4848_v29 = vpop.permute.xlu1 %1459  ;;  %v4914_v39 = vrot.slane %v2626_v6, %v4126_v25 }
 0x1ed   : > { %5428 = vst [vmem:[#allocation36_spill] sm:$0xff] %v4848_v29  ;;  %1800 = vrot.lane.b32.xlu0 %v1706_v34, %s3702_s8  ;;  %v2034_v34 = vcombine.high %v4799_v38, %v5410_v45  ;;  %v5434_v38 = vcombine.high %v4053_v10, %v4049_v8  ;;  %v5436_v10 = vld [vmem:[#allocation22_spill] sm:$0xff] }
 0x1ee   : > { %1828 = vrot.lane.b32.xlu1 %v1774_v43, %s3702_s8  ;;  %5433 = vst [vmem:[#allocation17_spill] sm:$0xff] %v4914_v39  ;;  %v2658_v8 = vcombine.high %v4914_v39, %v5410_v45  ;;  %v2923_v6 = vcombine.low %v5437_v59, %v5436_v10 }
 0x1f0   : > { %v4864_v1 = vpop.permute.xlu1 %1463 }
 0x1f1   : > { %5430 = vst [vmem:[#allocation37_spill] sm:$0xff] %v4864_v1  ;;  %2153 = vrot.lane.b32.xlu0 %v2099_v20, %s3699_s27 }
 0x1f2   : > { %2149 = vrot.lane.b32.xlu1 %v2102_v57, %s3701_s4  ;;  %v2280_v57 = vrot.slane %v5434_v38, %v3967_v33 }
 0x1f4   : > { %v4876_v5 = vpop.permute.xlu1 %753  ;;  %v2313_v53 = vcombine.low %v2280_v57, %v4907_v15 }
 0x1f5   : > { %2442 = vrot.lane.b32.xlu0 %v2389_v37, %s3697_s21 }
 0x1f6   : > { %2438 = vrot.lane.b32.xlu1 %v2398_v13, %s3696_s11  ;;  %v2017_v13 = vcombine.high %v4757_v26, %v4743_v28  ;;  %v4943_v28 = vrot.slane %v2939_v9, %v3967_v33  ;;  %v2321_v38 = vrot.slane %v2313_v53, %v4126_v25 }
 0x1f7   : > { %v4883_v27 = vpop.permute.xlu0 %1154 }
 0x1f8   : > { %v4887_v31 = vpop.permute.xlu1 %789  ;;  %v2031_v7 = vrot.slane %v2017_v13, %v4126_v25  ;;  %v2331_v53 = vcombine.high %v2321_v38, %v5410_v45 }
 0x1f9   : > { %2763 = vrot.lane.b32.xlu0 %v2709_v16, %s3695_s9  ;;  %v5439_v16 = vld [vmem:[#allocation18_spill] sm:$0xff] }
 0x1fa   : > { %1516 = vrot.lane.b32.xlu1 %v4232_v58, %s3704_s19 }
 0x1fb   : > { %v4892_v24 = vpop.permute.xlu0 %1162 }
 0x1fc   : > { %v4897_v23 = vpop.permute.xlu1 %1182 }
 0x1fd   : > { %2157 = vrot.lane.b32.xlu0 %v2103_v35, %s3702_s8 }
 0x1fe   : > { %2121 = vrot.lane.b32.xlu1 %v2034_v34, %s3701_s4  ;;  %v5438_v34 = vld [vmem:[#allocation19_spill] sm:$0xff] }
 0x1ff   : > { %v4903_v43 = vpop.permute.xlu0 %1198 }
 0x200   : > { %v4909_v20 = vpop.permute.xlu1 %1190 }
 0x201   : > { %2446 = vrot.lane.b32.xlu0 %v2399_v54, %s3701_s4  ;;  %v2991_v54 = vcombine.low %v5439_v16, %v5438_v34 }
 0x202   : > { %2410 = vrot.lane.b32.xlu1 %v2330_v60, %s3696_s11  ;;  %v2627_v60 = vcombine.high %v2602_v36, %v2618_v14 }
 0x203   : > { %v4924_v37 = vpop.permute.xlu0 %1808  ;;  %v4958_v14 = vrot.slane %v2991_v54, %v3967_v33  ;;  %v5441_v54 = vld [vmem:[#allocation20_spill] sm:$0xff] }
 0x204   : > { %5435 = vst [vmem:[#allocation16_spill] sm:$0xff] %v4924_v37  ;;  %v4932_v35 = vpop.permute.xlu1 %1170  ;;  %v2641_v32 = vrot.slane %v2627_v60, %v4126_v25 }
 0x205   : > { %2767 = vrot.lane.b32.xlu0 %v2727_v30, %s3696_s11  ;;  %v4953_v30 = vrot.slane %v2923_v6, %v3967_v33  ;;  %v3023_v13 = vcombine.low %v4958_v14, %v4947_v4  ;;  %v2611_v6 = vcombine.high %v4562_v19, %v4572_v50 }
 0x206   : > { %2731 = vrot.lane.b32.xlu1 %v2658_v8, %s3698_s10  ;;  %v2659_v63 = vcombine.high %v2641_v32, %v5410_v45 }
 0x207   : > { %v770_v26 = vpop.permute.xlu0 %769  ;;  %v2955_v36 = vcombine.low %v4953_v30, %v4943_v28  ;;  %v4978_v29 = vrot.slane %v3023_v13, %v4126_v25  ;;  %v4987_v50 = vrot.slane %v2611_v6, %v3967_v33  ;;  %v2314_v13 = vcombine.high %v2280_v57, %v4907_v15 }
 0x208   : > { %v4949_v39 = vpop.permute.xlu1 %1780  ;;  %v803_v37 = vsel %vm551_vm7, %v5441_v54, %v770_v26 }
 0x209   : > { %5440 = vst [vmem:[#allocation22_spill] sm:$0xff] %v4949_v39  ;;  %1845 = vrot.lane.b32.xlu0 %v4232_v58, %s3702_s8  ;;  %v4975_v1 = vrot.slane %v2955_v36, %v4126_v25  ;;  %v804_v19 = vsel %vm553_vm8, %v803_v37, %v4812_v18  ;;  %v3055_v18 = vcombine.high %v4978_v29, %v5410_v45 }
 0x20a   : > { %2125 = vrot.lane.b32.xlu1 %v2031_v7, %s3699_s27  ;;  %v2663_v37 = vcombine.high %v4367_v11, %v4372_v3  ;;  %v5011_v57 = vrot.slane %v2314_v13, %v4126_v25  ;;  %v2035_v11 = vcombine.high %v2031_v7, %v5410_v45  ;;  %v2382_v3 = vcombine.high %v4858_v49, %v4846_v51 }
 0x20b   : > { %v786_v9 = vpop.permute.xlu0 %785  ;;  %v2987_v36 = vcombine.high %v4975_v1, %v5410_v45  ;;  %v3024_v13 = vcombine.high %v4958_v14, %v4947_v4 }
 0x20c   : > { %v742_v8 = vpop.permute.xlu1 %741 }
 0x20d   : > { %2418 = vrot.lane.b32.xlu0 %v2331_v53, %s3701_s4  ;;  %v2595_v53 = vcombine.high %v5432_v40, %v5431_v41  ;;  %v2679_v41 = vcombine.high %v4538_v46, %v4552_v22  ;;  %v796_v22 = vsel %vm551_vm7, %v4501_v48, %v742_v8  ;;  %v5023_v48 = vrot.slane %v2663_v37, %v3967_v33 }
 0x20e   : > { %2414 = vrot.lane.b32.xlu1 %v2321_v38, %s3697_s21  ;;  %v797_v8 = vsel %vm553_vm8, %v796_v22, %v4830_v21  ;;  %v3038_v4 = vrot.slane %v3024_v13, %v4126_v25  ;;  %v5443_v22 = vld [vmem:[#allocation23_spill] sm:$0xff] }
 0x20f   : > { %v758_v39 = vpop.permute.xlu0 %757  ;;  %v4998_v40 = vrot.slane %v2595_v53, %v3967_v33  ;;  %v5014_v6 = vrot.slane %v2679_v41, %v3967_v33 }
 0x210   : > { %v778_v60 = vpop.permute.xlu1 %777 }
 0x211   : > { %2739 = vrot.lane.b32.xlu0 %v2659_v63, %s3696_s11  ;;  %v805_v26 = vsel %vm555_vm9, %v804_v19, %v778_v60  ;;  %v2642_v46 = vcombine.low %v4998_v40, %v4987_v50  ;;  %v2956_v60 = vcombine.high %v4953_v30, %v4943_v28  ;;  %v2710_v49 = vcombine.low %v5023_v48, %v5014_v6 }
 0x212   : > { %2735 = vrot.lane.b32.xlu1 %v2641_v32, %s3695_s9  ;;  %v806_v32 = vsel %vm557_vm10, %v805_v26, %v4851_v47  ;;  %v2396_v19 = vrot.slane %v2382_v3, %v4126_v25  ;;  %v5444_v3 = vld [vmem:[#allocation32_spill] sm:$0xff] }
 0x213   : > { %v1151_v38 = vpop.permute.xlu0 %1150  ;;  %v807_v47 = vsel %vm559_vm11, %v806_v32, %v786_v9  ;;  %v2650_v51 = vrot.slane %v2642_v46, %v4126_v25 }
 0x214   : > { %v750_v63 = vpop.permute.xlu1 %749  ;;  %v808_v21 = vsel %vm561_vm12, %v807_v47, %v4887_v31  ;;  %v2718_v31 = vrot.slane %v2710_v49, %v4126_v25  ;;  %v5445_v47 = vld [vmem:[#allocation26_spill] sm:$0xff] }
 0x215   : > { %3060 = vrot.lane.b32.xlu0 %v2987_v36, %s3698_s10  ;;  %v798_v7 = vsel %vm555_vm9, %v797_v8, %v750_v63  ;;  %v2970_v36 = vrot.slane %v2956_v60, %v4126_v25  ;;  %v5442_v63 = vld [vmem:[#allocation24_spill] sm:$0xff]  ;;  %v5446_v8 = vld [vmem:[#allocation14_spill] sm:$0xff] }
 0x216   : > { %3088 = vrot.lane.b32.xlu1 %v3055_v18, %s3698_s10  ;;  %v799_v28 = vsel %vm557_vm10, %v798_v7, %v4876_v5  ;;  %v1509_v60 = vsel %vm551_vm7, %v5446_v8, %v5445_v47  ;;  %s3229_s10 = scalar_lea.hbm %s5366_s3, %s3386_s22 }
 0x217   : > { %v1159_v15 = vpop.permute.xlu0 %1158  ;;  %v800_v5 = vsel %vm559_vm11, %v799_v28, %v758_v39 }
 0x218   : > { %v1179_v54 = vpop.permute.xlu1 %1178  ;;  %v801_v14 = vsel %vm561_vm12, %v800_v5, %v4871_v12  ;;  %v2992_v5 = vcombine.high %v5439_v16, %v5438_v34  ;;  %v2332_v34 = vcombine.high %v5011_v57, %v5410_v45 }
 0x219   : > { %2422 = vrot.lane.b32.xlu0 %v5011_v57, %s3699_s27  ;;  %v1212_v18 = vsel %vm551_vm7, %v5442_v63, %v1179_v54  ;;  %v1205_v54 = vsel %vm551_vm7, %v5443_v22, %v1151_v38  ;;  %v2660_v38 = vcombine.high %v2650_v51, %v5410_v45  ;;  %v3008_v63 = vcombine.high %v4590_v2, %v4606_v56 }
 0x21a   : > { %2129 = vrot.lane.b32.xlu1 %v2035_v11, %s3702_s8  ;;  %v1213_v32 = vsel %vm553_vm8, %v1212_v18, %v4897_v23  ;;  %v2940_v23 = vcombine.high %v4620_v55, %v4633_v61  ;;  %v1206_v7 = vsel %vm553_vm8, %v1205_v54, %v4883_v27  ;;  %v2924_v55 = vcombine.high %v5437_v59, %v5436_v10 }
 0x21b   : > { %v5031_v53 = vpop.permute.xlu0 %1804  ;;  %v1510_v61 = vsel %vm553_vm8, %v1509_v60, %v4752_v44  ;;  %v2643_v10 = vcombine.high %v4998_v40, %v4987_v50  ;;  %v3056_v18 = vcombine.high %v3038_v4, %v5410_v45 }
 0x21c   : > { %v794_v9 = vpop.permute.xlu1 %793  ;;  %v1511_v27 = vsel %vm555_vm9, %v1510_v61, %v4805_v52  ;;  %v2954_v59 = vrot.slane %v2940_v23, %v3967_v33  ;;  %v2938_v13 = vrot.slane %v2924_v55, %v3967_v33 }
 0x21d   : > { %2743 = vrot.lane.b32.xlu0 %v2650_v51, %s3697_s21  ;;  %v809_v26 = vsel %vm563_vm13, %v808_v21, %v794_v9  ;;  %v2400_v21 = vcombine.high %v2396_v19, %v5410_v45  ;;  %v1207_v51 = vsel %vm555_vm9, %v1206_v7, %v1159_v15  ;;  %v1512_v50 = vsel %vm557_vm10, %v1511_v27, %v4726_v0  ;;  %v5448_v27 = vld [vmem:[#allocation28_spill] sm:$0xff] }
 0x21e   : > { %2450 = vrot.lane.b32.xlu1 %v2396_v19, %s3699_s27  ;;  %3353 = vmatprep.subr.msk.mxu0 %vm816_vm14, %v809_v26  ;;  %v2988_v19 = vcombine.high %v2970_v36, %v5410_v45  ;;  %v1208_v52 = vsel %vm557_vm10, %v1207_v51, %v4892_v24  ;;  %v2972_v57 = vcombine.high %v2938_v13, %v2954_v59 }
 0x21f   : > { %v1203_v30 = vpop.permute.xlu0 %1202 }
 0x220   : > { %v1187_v41 = vpop.permute.xlu1 %1186 }
 0x221   : > { %3064 = vrot.lane.b32.xlu0 %v2970_v36, %s3695_s9  ;;  %v1214_v11 = vsel %vm555_vm9, %v1213_v32, %v1187_v41  ;;  %v2971_v36 = vcombine.low %v2938_v13, %v2954_v59 }
 0x222   : > { %2771 = vrot.lane.b32.xlu1 %v2718_v31, %s3697_s21  ;;  %v1215_v49 = vsel %vm557_vm10, %v1214_v11, %v4909_v20 }
 0x223   : > { %v5054_v37 = vpop.permute.xlu0 %1812  ;;  %v2979_v56 = vrot.slane %v2971_v36, %v4126_v25 }
 0x224   : > { %v766_v46 = vpop.permute.xlu1 %765 }
 0x225   : > { %2174 = vrot.lane.b32.xlu0 %v4232_v58, %s3705_s6  ;;  %v802_v39 = vsel %vm563_vm13, %v801_v14, %v766_v46  ;;  %v2711_v46 = vcombine.high %v5023_v48, %v5014_v6  ;;  %v2989_v11 = vcombine.high %v2979_v56, %v5410_v45 }
 0x226   : > { %3092 = vrot.lane.b32.xlu1 %v3038_v4, %s3695_s9  ;;  %3354 = vmatpush1.msk.msra.mxu0 %vm816_vm14, %v802_v39  ;;  %v3022_v4 = vrot.slane %v3008_v63, %v3967_v33  ;;  %s3231_s9 = sshll.u32 %s246_s7, 4  ;;  %s3232_s9 = int_to_ptr.vmem [resolvable:$true] %s3231_s9 }
 0x227   : > { %3355 = vmatmul.mubr.msk.f32.vlgmr.msra.gmra.mxu0 %vm813_vm15, %v5444_v3  ;;  %v1175_v12 = vpop.permute.xlu0 %1174  ;;  %v2725_v22 = vrot.slane %v2711_v46, %v4126_v25  ;;  %v2986_v3 = vrot.slane %v2972_v57, %v4126_v25  ;;  %v5457_v57 = vld [vmem:[#allocation16_spill] sm:$0xff]  ;;  %s3594_s29 = scalar_lea.vmem %s3232_s9, 256 }
 0x228   : > { %v1195_v9 = vpop.permute.xlu1 %1194  ;;  %1293 = vmatprep.mubr.f32.mxu0 %v5410_v45  ;;  %p3595_p12 = scmp.ne.s32.totalorder %s3232_s9, %s3594_s29 }
 0x229   : > { %v1216_v26 = vsel %vm559_vm11, %v1215_v49, %v1195_v9  ;;  %2747 = vrot.lane.b32.xlu0 %v2660_v38, %s3701_s4  ;;  %v2729_v38 = vcombine.high %v2725_v22, %v5410_v45  ;;  %v5447_v9 = vld [vmem:[#allocation30_spill] sm:$0xff] }
 0x22a   : > { %v1217_v20 = vsel %vm561_vm12, %v1216_v26, %v4903_v43  ;;  %2454 = vrot.lane.b32.xlu1 %v2400_v21, %s3702_s8  ;;  %v2728_v43 = vcombine.high %v2718_v31, %v5410_v45  ;;  %v2657_v31 = vrot.slane %v2643_v10, %v4126_v25  ;;  %p3596_p2 = pnand %p3595_p12, %p5462_p13 }
 0x22b   : > { %v5097_v44 = vpop.permute.xlu0 %1816  ;;  %v1218_v15 = vsel %vm563_vm13, %v1217_v20, %v1203_v30  ;;  %v5449_v20 = vld [vmem:[#allocation15_spill] sm:$0xff] }
 0x22c   : > { %v1167_v28 = vpop.permute.xlu1 %1166  ;;  %3359 = vmatprep.subr.msk.mxu0 %vm816_vm14, %v1218_v15  ;;  %v2661_v61 = vcombine.high %v2657_v31, %v5410_v45  ;;  %v1502_v10 = vsel %vm551_vm7, %v5449_v20, %v5448_v27  ;;  %v5450_v15 = vld [vmem:[#allocation31_spill] sm:$0xff]  ;;  %p3597_p4 = pneg %p3596_p2 }
 0x22d   : > { %v1209_v40 = vsel %vm559_vm11, %v1208_v52, %v1167_v28  ;;  %3068 = vrot.lane.b32.xlu0 %v2988_v19, %s3696_s11  ;;  %v1503_v19 = vsel %vm553_vm8, %v1502_v10, %v5450_v15  ;;  %v5459_v27 = vld [vmem:[#allocation35_spill] sm:$0xff] }
 0x22e   : > { %v1210_v30 = vsel %vm561_vm12, %v1209_v40, %v4932_v35  ;;  %2775 = vrot.lane.b32.xlu1 %v2728_v43, %s3701_s4  ;;  %v1513_v35 = vsel %vm559_vm11, %v1512_v50, %v4764_v62  ;;  %v5451_v43 = vld [vmem:[#allocation36_spill] sm:$0xff]  ;;  %v5452_v50 = vld [vmem:[#allocation37_spill] sm:$0xff] }
 0x22f   : > { %v5113_v24 = vpop.permute.xlu0 %2137  ;;  %v1211_v41 = vsel %vm563_vm13, %v1210_v30, %v1175_v12  ;;  %v1514_v32 = vsel %vm561_vm12, %v1513_v35, %v4796_v42  ;;  %v3006_v42 = vrot.slane %v2992_v5, %v3967_v33  ;;  %v5453_v35 = vld [vmem:[#allocation33_spill] sm:$0xff] }
 0x230   : > { %v5119_v0 = vpop.permute.xlu1 %1776  ;;  %3360 = vmatpush1.msk.msra.mxu0 %vm816_vm14, %v1211_v41 }
 0x231   : > { %2751 = vrot.lane.b32.xlu0 %v2657_v31, %s3699_s27  ;;  %v3039_v6 = vcombine.low %v3006_v42, %v3022_v4  ;;  %v3040_v49 = vcombine.high %v3006_v42, %v3022_v4  ;;  %v5456_v42 = vld [vmem:[#allocation22_spill] sm:$0xff] }
 0x232   : > { %3096 = vrot.lane.b32.xlu1 %v3056_v18, %s3696_s11  ;;  %v2990_v18 = vcombine.high %v2986_v3, %v5410_v45 }
 0x233   : > { %v1500_v2 = vpop.permute.xlu0 %1499  ;;  %v3047_v39 = vrot.slane %v3039_v6, %v4126_v25  ;;  %v3054_v52 = vrot.slane %v3040_v49, %v4126_v25 }
 0x234   : > { %v1515_v62 = vsel %vm563_vm13, %v1514_v32, %v1500_v2  ;;  %v5136_v14 = vpop.permute.xlu1 %2133  ;;  %v5454_v2 = vld [vmem:[#allocation27_spill] sm:$0xff] }
 0x235   : > { %3072 = vrot.lane.b32.xlu0 %v2979_v56, %s3697_s21  ;;  %3362 = vmatprep.subr.msk.mxu1 %vm816_vm14, %v1515_v62  ;;  %v3057_v60 = vcombine.high %v3047_v39, %v5410_v45  ;;  %v3058_v31 = vcombine.high %v3054_v52, %v5410_v45  ;;  %v1831_v56 = vsel %vm551_vm7, %v5454_v2, %v5119_v0  ;;  %v5455_v62 = vld [vmem:[#allocation25_spill] sm:$0xff] }
 0x236   : > { %2426 = vrot.lane.b32.xlu1 %v2332_v34, %s3702_s8  ;;  %v1838_v34 = vsel %vm551_vm7, %v5455_v62, %v5031_v53  ;;  %v1832_v6 = vsel %vm553_vm8, %v1831_v56, %v5456_v42 }
 0x237   : > { %v5144_v16 = vpop.permute.xlu0 %1820 }
 0x238   : > { %v5146_v48 = vpop.permute.xlu1 %1784 }
 0x239   : > { %2471 = vrot.lane.b32.xlu0 %v4232_v58, %s3706_s26 }
 0x23a   : > { %2779 = vrot.lane.b32.xlu1 %v2725_v22, %s3699_s27 }
 0x23b   : > { %v5151_v54 = vpop.permute.xlu0 %2141 }
 0x23c   : > { %v2106_v33 = vpop.permute.xlu1 %2105 }
 0x23d   : > { %3076 = vrot.lane.b32.xlu0 %v2989_v11, %s3701_s4  ;;  %v2160_v21 = vsel %vm551_vm7, %v5447_v9, %v2106_v33  ;;  %v1839_v11 = vsel %vm553_vm8, %v1838_v34, %v5457_v57  ;;  %v1833_v33 = vsel %vm555_vm9, %v1832_v6, %v5146_v48 }
 0x23e   : > { %3100 = vrot.lane.b32.xlu1 %v3047_v39, %s3697_s21  ;;  %v1840_v0 = vsel %vm555_vm9, %v1839_v11, %v5054_v37 }
 0x23f   : > { %v1220_v23 = vpop.permute.xlu0 %1219 }
 0x240   : > { %v1468_v12 = vpop.permute.xlu1 %1467  ;;  %3361 = vmatmul.mubr.msk.f32.vlgmr.msra.gmra.mxu0 %vm813_vm15, %v1220_v23 }
 0x241   : > { %3080 = vrot.lane.b32.xlu0 %v2986_v3, %s3699_s27  ;;  %1919 = vmatprep.mubr.f32.mxu0 %v5410_v45  ;;  %v1841_v3 = vsel %vm557_vm10, %v1840_v0, %v5097_v44 }
 0x242   : > { %2783 = vrot.lane.b32.xlu1 %v2729_v38, %s3702_s8  ;;  %v1842_v53 = vsel %vm559_vm11, %v1841_v3, %v5144_v16  ;;  %v5458_v16 = vld [vmem:[#allocation29_spill] sm:$0xff] }
 0x243   : > { %v1793_v47 = vpop.permute.xlu0 %1792  ;;  %v2167_v9 = vsel %vm551_vm7, %v5458_v16, %v5136_v14 }
 0x244   : > { %v1789_v8 = vpop.permute.xlu1 %1788 }
 0x245   : > { %2800 = vrot.lane.b32.xlu0 %v4232_v58, %s3707_s28  ;;  %v1834_v23 = vsel %vm557_vm10, %v1833_v33, %v1789_v8 }
 0x246   : > { %3104 = vrot.lane.b32.xlu1 %v3057_v60, %s3701_s4  ;;  %v1835_v38 = vsel %vm559_vm11, %v1834_v23, %v1793_v47  ;;  %s3598_s4 = sshll.u32 %s3708_s15, 4  ;;  %s3599_s4 = int_to_ptr.vmem [resolvable:$false] %s3598_s4 }
 0x247   : > { %v2114_v7 = vpop.permute.xlu0 %2113  ;;  %p3601_p10 = scmp.lt.s32.totalorder %s3232_s9, %s3599_s4 }
 0x248   : > { %v2110_v55 = vpop.permute.xlu1 %2109 }
 0x249   : > { %v2161_v51 = vsel %vm553_vm8, %v2160_v21, %v2110_v55  ;;  %3129 = vrot.lane.b32.xlu0 %v4232_v58, %s3699_s27  ;;  %v1504_v58 = vsel %vm555_vm9, %v1503_v19, %v4838_v17  ;;  %v2168_v55 = vsel %vm553_vm8, %v2167_v9, %v5113_v24 }
 0x24a   : > { %2755 = vrot.lane.b32.xlu1 %v2661_v61, %s3702_s8  ;;  %v5174_v26 = vsel %vm555_vm9, %v2161_v51, %v2114_v7  ;;  %v1505_v13 = vsel %vm557_vm10, %v1504_v58, %v5451_v43  ;;  %v2169_v61 = vsel %vm555_vm9, %v2168_v55, %v5151_v54 }
 0x24b   : > { %v2403_v59 = vpop.permute.xlu0 %2402  ;;  %v1506_v40 = vsel %vm559_vm11, %v1505_v13, %v5452_v50 }
 0x24c   : > { %v5181_v28 = vpop.permute.xlu1 %2430  ;;  %v1507_v36 = vsel %vm561_vm12, %v1506_v40, %v1468_v12  ;;  %v2457_v5 = vsel %vm551_vm7, %v5453_v35, %v2403_v59 }
 0x24e   : > { %3108 = vrot.lane.b32.xlu1 %v3054_v52, %s3699_s27  ;;  %s3215_s27 = scalar_lea.sflag [#allocation5], %s3856_s5 }
 0x24f   : > { %v1797_v30 = vpop.permute.xlu0 %1796 }
 0x250   : > { %v1472_v41 = vpop.permute.xlu1 %1471  ;;  %v1836_v48 = vsel %vm561_vm12, %v1835_v38, %v1797_v30 }
 0x251   : > { %v1508_v63 = vsel %vm563_vm13, %v1507_v36, %v1472_v41 }
 0x252   : > { %3112 = vrot.lane.b32.xlu1 %v3058_v31, %s3702_s8  ;;  %3363 = vmatpush1.msk.msra.mxu1 %vm816_vm14, %v1508_v63 }
 0x253   : > { %v5196_v25 = vpop.permute.xlu0 %2117 }
 0x254   : > { %v1825_v17 = vpop.permute.xlu1 %1824  ;;  %v2163_v35 = vsel %vm557_vm10, %v5174_v26, %v5196_v25 }
 0x255   : > { %v1843_v60 = vsel %vm561_vm12, %v1842_v53, %v1825_v17 }
 0x256   : > { %3084 = vrot.lane.b32.xlu1 %v2990_v18, %s3702_s8  ;;  %s3600_s8 = scalar_lea.vmem %s3599_s4, 512 }
 0x257   : > { %v2407_v32 = vpop.permute.xlu0 %2406  ;;  %p3602_p1 = scmp.lt.s32.totalorder %s3600_s8, %s3594_s29 }
 0x258   : > { %v5206_v46 = vsel %vm553_vm8, %v2457_v5, %v2407_v32  ;;  %v2146_v4 = vpop.permute.xlu1 %2145 }
 0x259   : > { %v2170_v51 = vsel %vm557_vm10, %v2169_v61, %v2146_v4  ;;  %p3603_p8 = por %p3602_p1, %p3601_p10 }
 0x25b   : > { %v2760_v22 = vpop.permute.xlu0 %2759  ;;  %p3604_p6 = pnand %p3603_p8, %p3597_p4 }
 0x25c   : > { %v2435_v39 = vpop.permute.xlu1 %2434  ;;  %v2793_v20 = vsel %vm551_vm7, %v5459_v27, %v2760_v22  ;;  %v5460_v22 = vld [vmem:[#allocation34_spill] sm:$0xff] }
 0x25d   : > { %v2464_v57 = vsel %vm551_vm7, %v5460_v22, %v5181_v28 }
 0x25e   : > { %v2465_v26 = vsel %vm553_vm8, %v2464_v57, %v2435_v39 }
 0x25f   : > { %v1801_v12 = vpop.permute.xlu0 %1800 }
 0x260   : > { %v1829_v7 = vpop.permute.xlu1 %1828  ;;  %v1837_v37 = vsel %vm563_vm13, %v1836_v48, %v1801_v12 }
 0x261   : > { %v1844_v49 = vsel %vm563_vm13, %v1843_v60, %v1829_v7 }
 0x262   : > { %3365 = vmatprep.subr.msk.mxu0 %vm816_vm14, %v1844_v49 }
 0x263   : > { %3366 = vmatpush1.msk.msra.mxu0 %vm816_vm14, %v1837_v37  ;;  %v2154_v44 = vpop.permute.xlu0 %2153 }
 0x264   : > { %v2150_v8 = vpop.permute.xlu1 %2149 }
 0x265   : > { %v2171_v59 = vsel %vm559_vm11, %v2170_v51, %v2150_v8 }
 0x266   : > { %v2172_v24 = vsel %vm561_vm12, %v2171_v59, %v2154_v44  ;;  %v5461_v59 = vld [vmem:[#allocation17_spill] sm:$0xff] }
 0x267   : > { %v2443_v47 = vpop.permute.xlu0 %2442 }
 0x268   : > { %v2439_v21 = vpop.permute.xlu1 %2438 }
 0x269   : > { %v2466_v25 = vsel %vm555_vm9, %v2465_v26, %v2439_v21 }
 0x26a   : > { %v2467_v0 = vsel %vm557_vm10, %v2466_v25, %v2443_v47 }
 0x26b   : > { %v2764_v10 = vpop.permute.xlu0 %2763 }
 0x26c   : > { %v5243_v15 = vsel %vm553_vm8, %v2793_v20, %v2764_v10  ;;  %v1517_v14 = vpop.permute.xlu1 %1516 }
 0x26d   : > { %3364 = vmatmul.mubr.msk.f32.vlgmr.msra.gmra.mxu1 %vm813_vm15, %v1517_v14 }
 0x26e   : > { %2248 = vmatprep.mubr.f32.mxu1 %v5410_v45 }
 0x26f   : > { %v2158_v19 = vpop.permute.xlu0 %2157 }
 0x270   : > { %v2173_v54 = vsel %vm563_vm13, %v2172_v24, %v2158_v19  ;;  %v2122_v52 = vpop.permute.xlu1 %2121 }
 0x271   : > { %3368 = vmatprep.subr.msk.mxu1 %vm816_vm14, %v2173_v54  ;;  %v2164_v5 = vsel %vm559_vm11, %v2163_v35, %v2122_v52 }
 0x273   : > { %v2447_v58 = vpop.permute.xlu0 %2446 }
 0x274   : > { %v2411_v43 = vpop.permute.xlu1 %2410  ;;  %v2468_v23 = vsel %vm559_vm11, %v2467_v0, %v2447_v58 }
 0x275   : > { %v2459_v60 = vsel %vm555_vm9, %v5206_v46, %v2411_v43 }
 0x277   : > { %v2768_v13 = vpop.permute.xlu0 %2767 }
 0x278   : > { %v2732_v50 = vpop.permute.xlu1 %2731  ;;  %v2795_v55 = vsel %vm555_vm9, %v5243_v15, %v2768_v13 }
 0x279   : > { %v2786_v14 = vsel %vm551_vm7, %v5461_v59, %v2732_v50 }
 0x27b   : > { %v1846_v40 = vpop.permute.xlu0 %1845 }
 0x27c   : > { %v2126_v30 = vpop.permute.xlu1 %2125  ;;  %3367 = vmatmul.mubr.msk.f32.vlgmr.msra.gmra.mxu0 %vm813_vm15, %v1846_v40 }
 0x27d   : > { %2545 = vmatprep.mubr.f32.mxu0 %v5410_v45  ;;  %v2165_v2 = vsel %vm561_vm12, %v2164_v5, %v2126_v30 }
 0x27f   : > { %v2419_v36 = vpop.permute.xlu0 %2418 }
 0x280   : > { %v2415_v41 = vpop.permute.xlu1 %2414 }
 0x281   : > { %v2460_v48 = vsel %vm557_vm10, %v2459_v60, %v2415_v41 }
 0x282   : > { %v2461_v37 = vsel %vm559_vm11, %v2460_v48, %v2419_v36 }
 0x283   : > { %v2740_v31 = vpop.permute.xlu0 %2739 }
 0x284   : > { %v2736_v63 = vpop.permute.xlu1 %2735 }
 0x285   : > { %v2787_v19 = vsel %vm553_vm8, %v2786_v14, %v2736_v63 }
 0x286   : > { %v2788_v15 = vsel %vm555_vm9, %v2787_v19, %v2740_v31 }
 0x287   : > { %v5252_v17 = vpop.permute.xlu0 %3060 }
 0x288   : > { %v5254_v18 = vpop.permute.xlu1 %3088  ;;  %v3115_v35 = vsel %vm551_vm7, %v4975_v1, %v5252_v17 }
 0x289   : > { %v3122_v30 = vsel %vm551_vm7, %v4978_v29, %v5254_v18 }
 0x28b   : > { %v2423_v32 = vpop.permute.xlu0 %2422 }
 0x28c   : > { %v2130_v56 = vpop.permute.xlu1 %2129  ;;  %v2462_v8 = vsel %vm561_vm12, %v2461_v37, %v2423_v32 }
 0x28d   : > { %v2166_v4 = vsel %vm563_vm13, %v2165_v2, %v2130_v56 }
 0x28e   : > { %3369 = vmatpush1.msk.msra.mxu1 %vm816_vm14, %v2166_v4 }
 0x28f   : > { %v2744_v62 = vpop.permute.xlu0 %2743 }
 0x290   : > { %v2451_v34 = vpop.permute.xlu1 %2450  ;;  %v2789_v52 = vsel %vm557_vm10, %v2788_v15, %v2744_v62 }
 0x291   : > { %v2469_v53 = vsel %vm561_vm12, %v2468_v23, %v2451_v34 }
 0x293   : > { %v3065_v42 = vpop.permute.xlu0 %3064 }
 0x294   : > { %v2772_v6 = vpop.permute.xlu1 %2771  ;;  %v3116_v32 = vsel %vm553_vm8, %v3115_v35, %v3065_v42 }
 0x295   : > { %v2796_v61 = vsel %vm557_vm10, %v2795_v55, %v2772_v6 }
 0x297   : > { %v2175_v11 = vpop.permute.xlu0 %2174 }
 0x298   : > { %v3093_v33 = vpop.permute.xlu1 %3092  ;;  %3370 = vmatmul.mubr.msk.f32.vlgmr.msra.gmra.mxu1 %vm813_vm15, %v2175_v11 }
 0x299   : > { %2874 = vmatprep.mubr.f32.mxu1 %v5410_v45  ;;  %v3123_v36 = vsel %vm553_vm8, %v3122_v30, %v3093_v33 }
 0x29b   : > { %v2748_v3 = vpop.permute.xlu0 %2747 }
 0x29c   : > { %v2455_v12 = vpop.permute.xlu1 %2454  ;;  %v2790_v58 = vsel %vm559_vm11, %v2789_v52, %v2748_v3 }
 0x29d   : > { %v2470_v28 = vsel %vm563_vm13, %v2469_v53, %v2455_v12 }
 0x29e   : > { %3371 = vmatprep.subr.msk.mxu0 %vm816_vm14, %v2470_v28 }
 0x29f   : > { %v3069_v39 = vpop.permute.xlu0 %3068 }
 0x2a0   : > { %v2776_v38 = vpop.permute.xlu1 %2775  ;;  %v3117_v18 = vsel %vm555_vm9, %v3116_v32, %v3069_v39 }
 0x2a1   : > { %v2797_v27 = vsel %vm559_vm11, %v2796_v61, %v2776_v38 }
 0x2a3   : > { %v2752_v7 = vpop.permute.xlu0 %2751 }
 0x2a4   : > { %v3097_v49 = vpop.permute.xlu1 %3096  ;;  %v2791_v43 = vsel %vm561_vm12, %v2790_v58, %v2752_v7 }
 0x2a5   : > { %v3124_v31 = vsel %vm555_vm9, %v3123_v36, %v3097_v49 }
 0x2a7   : > { %v3073_v44 = vpop.permute.xlu0 %3072  ;;  %v968_v22 = vpop.f32.mrf.mxu1 }
 0x2a8   : > { %v2427_v16 = vpop.permute.xlu1 %2426  ;;  %v3118_v4 = vsel %vm557_vm10, %v3117_v18, %v3073_v44 }
 0x2a9   : > { %v2463_v9 = vsel %vm563_vm13, %v2462_v8, %v2427_v16  ;;  %v970_v26 = vpop.f32.mrf.mxu1 }
 0x2aa   : > { %3372 = vmatpush1.msk.msra.mxu0 %vm816_vm14, %v2463_v9 }
 0x2ab   : > { %v2472_v47 = vpop.permute.xlu0 %2471 }
 0x2ac   : > { %v2780_v21 = vpop.permute.xlu1 %2779  ;;  %3373 = vmatmul.mubr.msk.f32.vlgmr.msra.gmra.mxu0 %vm813_vm15, %v2472_v47 }
 0x2ad   : > { %3203 = vmatprep.mubr.f32.mxu0 %v5410_v45  ;;  %v2798_v20 = vsel %vm561_vm12, %v2797_v27, %v2780_v21 }
 0x2af   : > { %v3077_v51 = vpop.permute.xlu0 %3076 }
 0x2b0   : > { %v3101_v46 = vpop.permute.xlu1 %3100  ;;  %v3119_v62 = vsel %vm559_vm11, %v3118_v4, %v3077_v51 }
 0x2b1   : > { %v3125_v63 = vsel %vm557_vm10, %v3124_v31, %v3101_v46 }
 0x2b3   : > { %v3081_v45 = vpop.permute.xlu0 %3080 }
 0x2b4   : > { %v2784_v10 = vpop.permute.xlu1 %2783  ;;  %v3120_v34 = vsel %vm561_vm12, %v3119_v62, %v3081_v45 }
 0x2b5   : > { %v2799_v24 = vsel %vm563_vm13, %v2798_v20, %v2784_v10 }
 0x2b6   : > { %3374 = vmatprep.subr.msk.mxu1 %vm816_vm14, %v2799_v24 }
 0x2b7   : > { %v2801_v50 = vpop.permute.xlu0 %2800 }
 0x2b8   : > { %v3105_v54 = vpop.permute.xlu1 %3104 }
 0x2b9   : > { %v3126_v5 = vsel %vm559_vm11, %v3125_v63, %v3105_v54 }
 0x2bb   : > { %v3130_v6 = vpop.permute.xlu0 %3129 }
 0x2bc   : > { %v2756_v13 = vpop.permute.xlu1 %2755 }
 0x2bd   : > { %v2792_v40 = vsel %vm563_vm13, %v2791_v43, %v2756_v13 }
 0x2be   : > { %3375 = vmatpush1.msk.msra.mxu1 %vm816_vm14, %v2792_v40 }
 0x2bf   : > { %3376 = vmatmul.mubr.msk.f32.vlgmr.msra.gmra.mxu1 %vm813_vm15, %v2801_v50 }
 0x2c0   : > { %v3109_v41 = vpop.permute.xlu1 %3108 }
 0x2c1   : > { %v3127_v2 = vsel %vm561_vm12, %v3126_v5, %v3109_v41 }
 0x2c4   : > { %v3113_v29 = vpop.permute.xlu1 %3112 }
 0x2c5   : > { %v3128_v56 = vsel %vm563_vm13, %v3127_v2, %v3113_v29 }
 0x2c6   : > { %3377 = vmatprep.subr.msk.mxu0 %vm816_vm14, %v3128_v56 }
 0x2c8   : > { %v3085_v1 = vpop.permute.xlu1 %3084 }
 0x2c9   : > { %v3121_v17 = vsel %vm563_vm13, %v3120_v34, %v3085_v1 }
 0x2ca   : > { %3378 = vmatpush1.msk.msra.mxu0 %vm816_vm14, %v3121_v17 }
 0x2cb   : > { %3379 = vmatmul.mubr.msk.f32.vlgmr.msra.gmra.mxu0 %vm813_vm15, %v3130_v6 }
 0x2e7   : > { %v889_v42 = vpop.f32.mrf.mxu0 }
 0x2e8   : > { %v969_v3 = vadd.f32 %v968_v22, %v889_v42 }
 0x2e9   : > { %v891_v57 = vpop.f32.mrf.mxu0 }
 0x2ea   : > { %v971_v12 = vadd.f32 %v970_v26, %v891_v57 }
 0x300   : > { %v1295_v25 = vpop.f32.mrf.mxu0 }
 0x301   : > { %v1300_v28 = vadd.f32 %v1295_v25, %v969_v3 }
 0x302   : > { %v1297_v33 = vpop.f32.mrf.mxu0 }
 0x303   : > { %v1301_v38 = vadd.f32 %v1297_v33, %v971_v12 }
 0x32d   : > { %v1592_v11 = vpop.f32.mrf.mxu1 }
 0x32e   : > { %v1597_v60 = vadd.f32 %v1592_v11, %v1300_v28 }
 0x32f   : > { %v1594_v0 = vpop.f32.mrf.mxu1 }
 0x330   : > { %v1598_v49 = vadd.f32 %v1594_v0, %v1301_v38 }
 0x33c   : > { %v1921_v23 = vpop.f32.mrf.mxu0 }
 0x33d   : > { %v1926_v37 = vadd.f32 %v1921_v23, %v1597_v60 }
 0x33e   : > { %v1923_v39 = vpop.f32.mrf.mxu0 }
 0x33f   : > { %v1927_v8 = vadd.f32 %v1923_v39, %v1598_v49 }
 0x358   : > { %v2250_v53 = vpop.f32.mrf.mxu1 }
 0x359   : > { %v2255_v16 = vadd.f32 %v2250_v53, %v1926_v37 }
 0x35a   : > { %v2252_v7 = vpop.f32.mrf.mxu1 }
 0x35b   : > { %v2256_v47 = vadd.f32 %v2252_v7, %v1927_v8 }
 0x36c   : > { %v2547_v48 = vpop.f32.mrf.mxu0 }
 0x36d   : > { %v2552_v21 = vadd.f32 %v2547_v48, %v2255_v16 }
 0x36e   : > { %v2549_v9 = vpop.f32.mrf.mxu0 }
 0x36f   : > { %v2553_v55 = vadd.f32 %v2549_v9, %v2256_v47 }
 0x37f   : > { %v2876_v44 = vpop.f32.mrf.mxu1 }
 0x380   : > { %v2881_v61 = vadd.f32 %v2876_v44, %v2552_v21 }
 0x381   : > { %v2878_v46 = vpop.f32.mrf.mxu1 }
 0x382   : > { %v2882_v27 = vadd.f32 %v2878_v46, %v2553_v55 }
 0x38b   : > { %v3205_v51 = vpop.f32.mrf.mxu0 }
 0x38c   : > { %v3210_v20 = vadd.f32 %v3205_v51, %v2881_v61 }
 0x38d   : > { %v3207_v10 = vpop.f32.mrf.mxu0 }
 0x38e   : > { %3212 = vst [vmem:[%s246_s7] sm:$0xff] %v3210_v20  ;;  %v3211_v59 = vadd.f32 %v3207_v10, %v2882_v27 }
 0x390   : > { %3213 = vst [vmem:[%s246_s7 + $0x8] sm:$0xff] %v3211_v59 }
 0x391   : > { %3607 = shalt.err (!%p3604_p6)
}
 0x392   : > { %s3608_s30 = scalar_lea.hbm %s3229_s10, 256  ;;  %s3612_s6 = scalar_lea.hbm %s5366_s3, 512 }
 0x393   : > { %p3609_p9 = scmp.ne.s32.totalorder %s3229_s10, %s3608_s30  ;;  %p3613_p7 = scmp.lt.s32.totalorder %s3229_s10, %s5366_s3 }
 0x394   : > { %p3614_p5 = scmp.lt.s32.totalorder %s3612_s6, %s3608_s30 }
 0x395   : > { %p3610_p0 = pnand %p3609_p9, %p5462_p13 }
 0x396   : > { %p3615_p11 = por %p3614_p5, %p3613_p7 }
 0x397   : > { %p3611_p3 = pneg %p3610_p0 }
 0x399   : > { %p3616_p12 = pnand %p3615_p11, %p3611_p3 }
 0x39b   : > { %3619 = shalt.err (!%p3616_p12)
}
 0x39c   : > { %3395 = dma.vmem_to_hbm [thread:$0]  (%p5462_p13), %s3232_s9, 256, %s3229_s10, %s3215_s27  }
 0x39d PF: > { %s3243_s20 = sand.u32 1, %s3662_s12   ;;  %p5463_p2 = scmp.ne.s32.totalorder %s5395_s25, 0 }
 0x39e   : > { %p5464_p4 = scmp.ge.s32.totalorder %s3682_s17, 2  ;;  %s3244_s22 = scalar_lea.sflag [#allocation5], %s3243_s20 }
 0x3a0   : > { %p3409_p10 = pnand %p5464_p4, %p5463_p2 }
 0x3a2   : > { %p3410_p1 = pneg %p3409_p10 }
 0x3a4   : > { %3657 = dma.done.wait (%p3410_p1), %s3244_s22, 256  }
 0x3a5   : > { %3659 = vsyncadd (%p3410_p1), %s3244_s22, 4294967040  ;;  %s20_s17 = sadd.s32 1, %s3682_s17   ;;  %s5465_s12 = smov %s3666_s13 }
 0x3a6   : > { %p17_p8 = scmp.ge.s32.totalorder %s20_s17, 4   ;;  %s5466_s13 = smov %s3670_s14 }
 0x3a7   : > { %s5467_s14 = smov %s3777_s24  ;;  %s5468_s15 = smov %s3678_s16 }
 0x3a8   : > { %s5469_s16 = smov %s5471_s18  ;;  %19 = sbr.rel (!%p17_p8) target bundleno = 7 (0x7), region = 92 }
 0x3ad   :  { %3249 = vsyncpa [#allocation4], 1 }
 0x3ae   :  { %3251 = vsyncpa [#allocation4 + $0x1], 1 }
 0x3af   :  { %3252 = vsyncpa [#allocation7], 1 }
 0x3b0   :  { %3253 = vsyncpa [#allocation5], 1 }
 0x3b1   :  { %3255 = vsyncpa [#allocation5 + $0x1], 1 }

// kernel: tpu_custom_call.1
= control target key start
LH: loop header
LB: loop body
LE: loop exit
PB: predicated region body
PF: predicated region fallthrough
CT: control target
= control target key end

     0   :  { %8 = vsyncpa [#allocation4], 0  ;;  %s5363_s0 = inlined_call_operand.hbm [shape: f32[2,1,36], index: 0, kind: input, shape index: {}]   ;;  %s5364_s1 = inlined_call_operand.hbm [shape: f32[8,36], index: 1, kind: input, shape index: {}]   ;;  %s5365_s2 = inlined_call_operand.hbm [shape: f32[2,4,16,16], index: 2, kind: input, shape index: {}]   ;;  %s5366_s3 = inlined_call_operand.hbm [shape: f32[2,8,256], index: 3, kind: output, shape index: {}]  }
   0x1   :  { %10 = vsyncpa [#allocation4 + $0x1], 0 }
   0x2   :  { %11 = vsyncpa [#allocation7], 0 }
   0x3   :  { %12 = vsyncpa [#allocation5], 0 }
   0x4   :  { %14 = vsyncpa [#allocation5 + $0x1], 0  ;;  %s3729_s12 = smov 0   ;;  %s3731_s13 = smov 0  }
   0x5   :  { %s3733_s14 = smov 0   ;;  %s3735_s15 = smov 0  }
   0x6   :  { %s3737_s16 = smov 0   ;;  %s3739_s17 = smov 0  }
   0x7 LB: > { %s32_s18 = sadd.s32 1, %s3678_s16  ;;  %s39_s19 = sadd.s32 1, %s3670_s14  ;;  %s3682_s17 = sphi %s3739_s17, %s20_s17   ;;  %s3678_s16 = sphi %s3737_s16, %s5469_s16   ;;  %s3674_s15 = sphi %s3735_s15, %s5468_s15   ;;  %s3670_s14 = sphi %s3733_s14, %s5467_s14   ;;  %s3666_s13 = sphi %s3731_s13, %s5466_s13   ;;  %s3662_s12 = sphi %s3729_s12, %s5465_s12  }
   0x8   : > { %p34_p0 = scmp.ge.s32.totalorder %s32_s18, 2  ;;  %p46_p1 = scmp.ne.s32.totalorder %s3670_s14, %s3666_s13 }
   0x9   : > { %p47_p2 = scmp.eq.s32.totalorder %s3682_s17, 0  ;;  %p3413_p5 = scmp.lt.s32.totalorder %s3682_s17, 2 }
   0xa   : > { %s5471_s18 = smov (%p34_p0, %s32_s18), 0  ;;  %s162_s21 = sand.u32 1, %s3682_s17  }
   0xb   : > { %p48_p4 = por %p47_p2, %p46_p1  ;;  %s36_s20 = ssub.s32 %s3678_s16, %s5471_s18 }
   0xc   : > { %p37_p6 = scmp.eq.s32.totalorder %s36_s20, 0  ;;  %s164_s22 = sand.u32 1, %s3670_s14  }
   0xd   : > { %s3344_s23 = sshll.u32 %s3678_s16, 4  ;;  %s165_s28 = scalar_lea.vmem [#allocation3], %s164_s22 }
   0xe   : > { %s3777_s24 = scalar_select %p37_p6, %s3670_s14, %s39_s19  }
   0xf   : > { %s170_s27 = scalar_lea.hbm %s5363_s0, %s3344_s23  ;;  %s172_s29 = sshll.u32 %s165_s28, 4  ;;  %s173_s29 = int_to_ptr.vmem [resolvable:$true] %s172_s29 }
  0x10   : > { %p3782_p7 = pnand %p3413_p5, %p48_p4  ;;  %s3345_s4 = sshll.u32 %s164_s22, 6 }
  0x11   : > { %s3786_s5 = scalar_lea.sflag [#allocation4], %s162_s21  ;;  %s3525_s6 = scalar_lea.vmem %s173_s29, 16 }
  0x12   : > { %p3514_p8 = pneg %p3782_p7  ;;  %p3526_p9 = scmp.ne.s32.totalorder %s173_s29, %s3525_s6 }
  0x13   : > { %s3684_s7 = smov [#allocation3]  }
  0x14   : > { %p3528_p10 = pnand %p3526_p9, %p3514_p8  ;;  %s3530_s8 = sshll.u32 %s3684_s7, 4  ;;  %s3531_s8 = int_to_ptr.vmem [resolvable:$false] %s3530_s8 }
  0x15   : > { %s3532_s9 = scalar_lea.vmem %s3531_s8, 32  ;;  %p3533_p12 = scmp.lt.s32.totalorder %s173_s29, %s3531_s8 }
  0x16   : > { %p3529_p11 = pneg %p3528_p10  ;;  %p3534_p13 = scmp.lt.s32.totalorder %s3532_s9, %s3525_s6 }
  0x18   : > { %p3535_p0 = por %p3534_p13, %p3533_p12 }
  0x1a   : > { %p3536_p2 = pnand %p3535_p0, %p3529_p11 }
  0x1c   : > { %3539 = shalt.err (!%p3536_p2)
}
  0x1d   : > { %3404 = dma.hbm_to_vmem [thread:$0]  (!%p3782_p7), %s170_s27, 16, %s173_s29, %s3786_s5  }
  0x1e   : > { %s3385_s10 = sshll.u32 %s3678_s16, 10  ;;  %s183_s11 = scalar_lea.vmem [#allocation8], %s3345_s4 }
  0x1f   : > { %s190_s19 = sshll.u32 %s183_s11, 4  ;;  %s3798_s20 = sadd.s32 4294967295, %s3682_s17   ;;  %s191_s19 = int_to_ptr.vmem [resolvable:$true] %s190_s19 }
  0x20   : > { %s3340_s21 = sadd.s32 4294967294, %s3682_s17   ;;  %p52_p4 = scmp.ne.s32.totalorder %s3666_s13, %s3662_s12 }
  0x21   : > { %p5368_p5 = scmp.eq.s32.totalorder %s3798_s20, 0  ;;  %p125_p6 = scmp.eq.s32.totalorder %s3798_s20, 1 }
  0x22   : > { %p131_p9 = scmp.eq.s32.totalorder %s3340_s21, 1  ;;  %p3341_p10 = scmp.ge.s32.totalorder %s3682_s17, 1 }
  0x23   : > { %p3808_p11 = por %p5368_p5, %p52_p4  ;;  %p3815_p12 = por %p125_p6, %p46_p1 }
  0x24   : > { %p3819_p13 = por %p131_p9, %p52_p4  ;;  %p138_p0 = scmp.lt.s32.totalorder %s3682_s17, 3 }
  0x25   : > { %s5393_s22 = scalar_select %p3808_p11, 1, 0 }
  0x26   : > { %s5394_s23 = scalar_select %p3815_p12, 1, 0 }
  0x27   : > { %s5395_s25 = scalar_select %p3819_p13, 1, 0 }
  0x28   : > { %p3824_p2 = pnand %p3341_p10, %p138_p0  ;;  %s3685_s27 = smov [#allocation6]  }
  0x29   : > { %s151_s28 = sshll.u32 %s3685_s27, 4  ;;  %s189_s6 = scalar_lea.hbm %s5365_s2, %s3385_s10  ;;  %s152_s28 = int_to_ptr.vmem [resolvable:$true] %s151_s28 }
  0x2a   : > { %s5396_s26 = scalar_select %p3824_p2, 1, 0 }
  0x2b   : > { %p3397_p1 = pneg %p3824_p2  ;;  %s3553_s8 = scalar_lea.vmem %s191_s19, 1024 }
  0x2c   : > { %p3554_p6 = scmp.ne.s32.totalorder %s191_s19, %s3553_s8  ;;  %s3686_s9 = smov [#allocation8]  }
  0x2d   : > { %p3835_p4 = pnand %p3397_p1, %p5368_p5  ;;  %s3558_s11 = sshll.u32 %s3686_s9, 4  ;;  %s3559_s11 = int_to_ptr.vmem [resolvable:$false] %s3558_s11 }
  0x2e   : > { %p3556_p9 = pnand %p3554_p6, %p3514_p8  ;;  %s3560_s21 = scalar_lea.vmem %s3559_s11, 2048 }
  0x2f   : > { %p3561_p0 = scmp.lt.s32.totalorder %s191_s19, %s3559_s11  ;;  %p3562_p3 = scmp.lt.s32.totalorder %s3560_s21, %s3553_s8 }
  0x30   : > { %p3557_p10 = pneg %p3556_p9 }
  0x31   : > { %p3563_p13 = por %p3562_p3, %p3561_p0 }
  0x33   : > { %p3564_p12 = pnand %p3563_p13, %p3557_p10 }
  0x35   : > { %3567 = shalt.err (!%p3564_p12)
}
  0x36   : > { %s3687_s10 = smov 128   ;;  %s3688_s27 = smov 8  }
  0x37   : > { %3407 = dma.hbm_to_vmem [thread:$0]  (!%p3782_p7), %s189_s6, 1024, %s191_s19, %s3786_s5, %s3687_s10, %s3687_s10, %s3688_s27  }
  0x38   : > { %p3570_p1 = pneg %p3835_p4  ;;  %s3579_s29 = scalar_lea.vmem %s152_s28, 128 }
  0x39   : > { %p3580_p8 = scmp.ne.s32.totalorder %s152_s28, %s3579_s29  ;;  %p3587_p5 = scmp.lt.s32.totalorder %s152_s28, %s152_s28 }
  0x3a   : > { %p3588_p11 = scmp.lt.s32.totalorder %s3579_s29, %s3579_s29 }
  0x3b   : > { %p3582_p6 = pnand %p3580_p8, %p3570_p1 }
  0x3c   : > { %p3589_p2 = por %p3588_p11, %p3587_p5 }
  0x3d   : > { %p3583_p9 = pneg %p3582_p6 }
  0x3f   : > { %p3590_p0 = pnand %p3589_p2, %p3583_p9 }
  0x41   : > { %3593 = shalt.err (!%p3590_p0)
}
  0x42   : > { %3400 = dma.hbm_to_vmem [thread:$0]  (!%p3835_p4), %s5364_s1, 128, %s152_s28, [#allocation7]  }
  0x43   : > { %p5398_p3 = scmp.ne.s32.totalorder %s5396_s26, 0 }
  0x45   : > { %202 = sbr.rel (%p5398_p3) target bundleno = 925 (0x39d), region = 32 }
  0x4a   : > { %s204_s30 = sand.u32 1, %s3798_s20   ;;  %s3856_s5 = sand.u32 1, %s3666_s13  }
  0x4b   : > { %s205_s19 = scalar_lea.sflag [#allocation4], %s204_s30  ;;  %s207_s6 = scalar_lea.vmem [#allocation3], %s3856_s5 }
  0x4c   : > { %p5399_p7 = scmp.ne.s32.totalorder %s5393_s22, 0 }
  0x4e   : > { %3645 = dma.done.wait (%p5399_p7), %s205_s19, 16  }
  0x4f   : > { %3647 = vsyncadd (%p5399_p7), %s205_s19, 4294967280  ;;  %p5400_p5 = scmp.eq.s32.totalorder %s3798_s20, 0 }
  0x51   : > { %3649 = dma.done.wait (%p5400_p5), [#allocation7], 128   ;;  %p5401_p11 = pmov %p5400_p5 }
  0x52   : > { %s3350_s26 = sshll.u32 %s3856_s5, 6 }
  0x53   : > { %3651 = vsyncadd (%p5401_p11), [#allocation7], 4294967168  ;;  %s3868_s28 = scalar_lea.vmem [#allocation8], %s3350_s26 }
  0x54   : > { %3653 = dma.done.wait (%p5399_p7), %s205_s19, 1024  }
  0x55   : > { %3655 = vsyncadd (%p5399_p7), %s205_s19, 4294966272  ;;  %vm265_vm0 = vcmask 7168   ;;  %vm279_vm1 = vcmask 146568   ;;  %vm293_vm2 = vcmask 139264   ;;  %v5371_v0 = vmov 0.0   ;;  %v304_v1 = vld [vmem:[%s3868_s28 + $0x10] sm:$0xff] }
  0x56   : > { %270 = vst.msk [vmem:[#allocation2 + $0x18] sm:$0xff] %vm265_vm0, %v5371_v0  ;;  %271 = vst.msk [vmem:[#allocation2 + $0x20] sm:$0xff] %vm265_vm0, %v5371_v0  ;;  %vm268_vm3 = vcmask 1024   ;;  %vm282_vm4 = vcmask 140424   ;;  %966 = vmatprep.mubr.f32.mxu1 %v5371_v0  ;;  %887 = vmatprep.mubr.f32.mxu0 %v5371_v0  ;;  %v302_v2 = vld [vmem:[%s3868_s28] sm:$0xff]  ;;  %s3690_s20 = smov 1   ;;  %v364_v22 = vlaneseq }
  0x57   : > { %266 = vst.msk [vmem:[#allocation2] sm:$0xff] %vm265_vm0, %v5371_v0  ;;  %267 = vst.msk [vmem:[#allocation2 + $0x8] sm:$0xff] %vm265_vm0, %v5371_v0  ;;  %322 = vrot.lane.b32.xlu1 %v304_v1, %s3690_s20  ;;  %318 = vrot.lane.b32.xlu0 %v302_v2, %s3690_s20  ;;  %v305_v3 = vld [vmem:[%s3868_s28 + $0x18] sm:$0xff]  ;;  %v303_v4 = vld [vmem:[%s3868_s28 + $0x8] sm:$0xff]  ;;  %vm258_vm5 = vcmask 293888   ;;  %vm342_vm6 = vcmask 138248  }
  0x58   : > { %273 = vst.msk [vmem:[#allocation2 + $0x30] sm:$0xff] %vm265_vm0, %v5371_v0  ;;  %274 = vst.msk [vmem:[#allocation2 + $0x38] sm:$0xff] %vm265_vm0, %v5371_v0  ;;  %v307_v5 = vld [vmem:[%s3868_s28 + $0x28] sm:$0xff]  ;;  %v306_v6 = vld [vmem:[%s3868_s28 + $0x20] sm:$0xff]  ;;  %v3691_v20 = vmov 1983009808  }
  0x59   : > { %276 = vst.msk [vmem:[#allocation2 + $0x48] sm:$0xff] %vm265_vm0, %v5371_v0  ;;  %277 = vst.msk [vmem:[#allocation2 + $0x50] sm:$0xff] %vm265_vm0, %v5371_v0  ;;  %v309_v7 = vld [vmem:[%s3868_s28 + $0x38] sm:$0xff]  ;;  %v308_v8 = vld [vmem:[%s3868_s28 + $0x30] sm:$0xff]  ;;  %v362_v21 = vunpack.c.l.s4 %v3691_v20  ;;  %s3692_s22 = smov 127   ;;  %v3954_v27 = vshrl.u32 %v364_v22, 7 }
  0x5a   : > { %284 = vst.msk [vmem:[#allocation2 + $0x18] sm:$0xff] %vm279_vm1, %v5371_v0  ;;  %285 = vst.msk [vmem:[#allocation2 + $0x20] sm:$0xff] %vm279_vm1, %v5371_v0  ;;  %v248_v9 = vld [vmem:[#allocation6] sm:$0xff]  ;;  %v3352_v10 = vld [vmem:[%s207_s6] ss:$0 sm:$0xff]  ;;  %s3693_s7 = smov 126  }
  0x5b   : > { %280 = vst.msk [vmem:[#allocation2] sm:$0xff] %vm279_vm1, %v5371_v0  ;;  %281 = vst.msk [vmem:[#allocation2 + $0x8] sm:$0xff] %vm279_vm1, %v5371_v0  ;;  %324 = vrot.lane.b32.xlu1 %v305_v3, %s3690_s20  ;;  %320 = vrot.lane.b32.xlu0 %v303_v4, %s3690_s20  ;;  %v3938_v11 = vmul.f32 %v3352_v10, %v248_v9  ;;  %v363_v26 = vunpack.c.0.s8 %v362_v21  ;;  %v3694_v22 = vmov 1934713408   ;;  %s3695_s9 = smov 32   ;;  %s3696_s11 = smov 48  }
  0x5c   : > { %287 = vst.msk [vmem:[#allocation2 + $0x30] sm:$0xff] %vm279_vm1, %v5371_v0  ;;  %288 = vst.msk [vmem:[#allocation2 + $0x38] sm:$0xff] %vm279_vm1, %v5371_v0  ;;  %s3697_s21 = smov 64   ;;  %s3698_s10 = smov 16   ;;  %vm551_vm7 = vcmask 130048   ;;  %vm553_vm8 = vcmask 261120  }
  0x5d   : > { %290 = vst.msk [vmem:[#allocation2 + $0x48] sm:$0xff] %vm279_vm1, %v5371_v0  ;;  %291 = vst.msk [vmem:[#allocation2 + $0x50] sm:$0xff] %vm279_vm1, %v5371_v0  ;;  %v257_v12 = vmul.f32 %v3938_v11, %v3938_v11  ;;  %v3967_v33 = vsub.s32 %v363_v26, %v3954_v27  ;;  %s3699_s27 = smov 96   ;;  %s3700_s29 = smov 124   ;;  %vm555_vm9 = vcmask 392192   ;;  %vm557_vm10 = vcmask 523264  }
  0x5e   : > { %272 = vst.msk [vmem:[#allocation2 + $0x28] sm:$0x3] %vm268_vm3, %v5371_v0  ;;  %269 = vst.msk [vmem:[#allocation2 + $0x10] sm:$0x3] %vm268_vm3, %v5371_v0  ;;  %s3701_s4 = smov 80   ;;  %s3702_s8 = smov 112  }
  0x5f   : > { %275 = vst.msk [vmem:[#allocation2 + $0x40] sm:$0x3] %vm268_vm3, %v5371_v0  ;;  %278 = vst.msk [vmem:[#allocation2 + $0x58] sm:$0x3] %vm268_vm3, %v5371_v0  ;;  %328 = vrot.lane.b32.xlu1 %v307_v5, %s3690_s20  ;;  %326 = vrot.lane.b32.xlu0 %v306_v6, %s3690_s20  ;;  %v259_v13 = vsel %vm258_vm5, %v257_v12, 0.0  ;;  %s3703_s30 = smov 120  }
  0x60   : > { %295 = vst.msk [vmem:[#allocation2 + $0x18] sm:$0x1] %vm293_vm2, %v5371_v0  ;;  %294 = vst.msk [vmem:[#allocation2] sm:$0x1] %vm293_vm2, %v5371_v0  ;;  %vm559_vm11 = vcmask 654336   ;;  %vm561_vm12 = vcmask 785408  }
  0x61   : > { %286 = vst.msk [vmem:[#allocation2 + $0x28] sm:$0x3] %vm282_vm4, %v5371_v0  ;;  %283 = vst.msk [vmem:[#allocation2 + $0x10] sm:$0x3] %vm282_vm4, %v5371_v0  ;;  %vm563_vm13 = vcmask 916480   ;;  %vm816_vm14 = vcmask 1043456  }
  0x62   : > { %296 = vst.msk [vmem:[#allocation2 + $0x30] sm:$0x1] %vm293_vm2, %v5371_v0  ;;  %297 = vst.msk [vmem:[#allocation2 + $0x48] sm:$0x1] %vm293_vm2, %v5371_v0  ;;  %vm813_vm15 = vcmask 31744   ;;  %s3704_s19 = smov 116  }
  0x63   : > { %289 = vst.msk [vmem:[#allocation2 + $0x40] sm:$0x3] %vm282_vm4, %v5371_v0  ;;  %292 = vst.msk [vmem:[#allocation2 + $0x58] sm:$0x3] %vm282_vm4, %v5371_v0  ;;  %332 = vrot.lane.b32.xlu1 %v309_v7, %s3690_s20  ;;  %330 = vrot.lane.b32.xlu0 %v308_v8, %s3690_s20  ;;  %s3705_s6 = smov 108   ;;  %s3706_s26 = smov 104  }
  0x64   : > { %299 = vst.msk [vmem:[#allocation2 + $0x29] sm:$0x1] %vm293_vm2, %v5371_v0  ;;  %298 = vst.msk [vmem:[#allocation2 + $0x11] sm:$0x1] %vm293_vm2, %v5371_v0  ;;  %s3707_s28 = smov 100   ;;  %s3351_s20 = sshll.u32 %s3856_s5, 4 }
  0x65   : > { %300 = vst.msk [vmem:[#allocation2 + $0x41] sm:$0x1] %vm293_vm2, %v5371_v0  ;;  %301 = vst.msk [vmem:[#allocation2 + $0x59] sm:$0x1] %vm293_vm2, %v5371_v0  ;;  %p5462_p13 = scmp.ne.s32.totalorder %s5394_s23, 0 }
  0x82   : > { %260 = vadd.xlane.f32.xlu0 %v259_v13 }
  0xc9   : > { %v323_v14 = vpop.permute.xlu1 %322  ;;  %v319_v15 = vpop.permute.xlu0 %318 }
  0xca   : > { %345 = vst.msk [vmem:[#allocation2 + $0x19] sm:$0xff] %vm342_vm6, %v323_v14  ;;  %343 = vst.msk [vmem:[#allocation2 + $0x1] sm:$0xff] %vm342_vm6, %v319_v15 }
  0xcd   : > { %v325_v16 = vpop.permute.xlu1 %324  ;;  %v321_v17 = vpop.permute.xlu0 %320 }
  0xce   : > { %346 = vst.msk [vmem:[#allocation2 + $0x21] sm:$0xff] %vm342_vm6, %v325_v16  ;;  %344 = vst.msk [vmem:[#allocation2 + $0x9] sm:$0xff] %vm342_vm6, %v321_v17 }
  0xd1   : > { %v329_v18 = vpop.permute.xlu1 %328  ;;  %v327_v19 = vpop.permute.xlu0 %326  ;;  %v3958_v29 = vld [vmem:[#allocation2] sm:$0xff]  ;;  %v353_v47 = vld [vmem:[#allocation2 + $0x18] sm:$0xff] }
  0xd2   : > { %348 = vst.msk [vmem:[#allocation2 + $0x39] sm:$0xff] %vm342_vm6, %v329_v18  ;;  %347 = vst.msk [vmem:[#allocation2 + $0x31] sm:$0xff] %vm342_vm6, %v327_v19  ;;  %v3976_v38 = vld [vmem:[#allocation2 + $0x1] sm:$0xff]  ;;  %v4038_v4 = vld [vmem:[#allocation2 + $0x19] sm:$0xff] }
  0xd5   : > { %v333_v23 = vpop.permute.xlu1 %332  ;;  %v331_v24 = vpop.permute.xlu0 %330  ;;  %v3948_v25 = vld [vmem:[#allocation2 + $0x8] sm:$0xff]  ;;  %v3956_v28 = vld [vmem:[#allocation2 + $0x20] sm:$0xff] }
  0xd6   : > { %350 = vst.msk [vmem:[#allocation2 + $0x51] sm:$0xff] %vm342_vm6, %v333_v23  ;;  %349 = vst.msk [vmem:[#allocation2 + $0x49] sm:$0xff] %vm342_vm6, %v331_v24  ;;  %582 = vrot.lane.b32.xlu1 %v3948_v25, %s3692_s22  ;;  %v3973_v36 = vld [vmem:[#allocation2 + $0x9] sm:$0xff]  ;;  %v4101_v20 = vld [vmem:[#allocation2 + $0x21] sm:$0xff]  ;;  %v394_v23 = vunpack.c.l.s4 %v3694_v22 }
  0xd7   : > { %v4053_v10 = vld [vmem:[#allocation2 + $0x2] sm:$0xff]  ;;  %v4055_v12 = vld [vmem:[#allocation2 + $0xa] sm:$0xff] }
  0xd8   : > { %v395_v24 = vunpack.c.0.s8 %v394_v23 }
  0xd9   : > { %v3960_v30 = vld [vmem:[#allocation2 + $0x38] sm:$0xff]  ;;  %v977_v31 = vld [vmem:[#allocation2 + $0x30] sm:$0xff] }
  0xda   : > { %v3962_v32 = vld [vmem:[#allocation2 + $0x39] sm:$0xff]  ;;  %586 = vrot.lane.b32.xlu1 %v3956_v28, %s3692_s22  ;;  %v427_v34 = vcombine.low %v3948_v25, %v3960_v30  ;;  %v428_v35 = vcombine.high %v3948_v25, %v3960_v30  ;;  %v360_v37 = vcombine.high %v3958_v29, %v977_v31  ;;  %v3978_v39 = vld [vmem:[#allocation2 + $0x31] sm:$0xff]  ;;  %v359_v44 = vcombine.low %v3958_v29, %v977_v31 }
  0xdb   : > { %v1378_v40 = vcombine.low %v3973_v36, %v3962_v32  ;;  %v1310_v41 = vcombine.low %v3976_v38, %v3978_v39  ;;  %v1379_v42 = vcombine.high %v3973_v36, %v3962_v32  ;;  %v1311_v43 = vcombine.high %v3976_v38, %v3978_v39  ;;  %v4049_v8 = vld [vmem:[#allocation2 + $0x32] sm:$0xff]  ;;  %v4051_v9 = vld [vmem:[#allocation2 + $0x3a] sm:$0xff] }
  0xdc   : > { %v3995_v51 = vrot.slane %v427_v34, %v3967_v33  ;;  %v3998_v52 = vrot.slane %v428_v35, %v3967_v33  ;;  %v4010_v57 = vrot.slane %v359_v44, %v3967_v33  ;;  %v4016_v59 = vrot.slane %v360_v37, %v3967_v33 }
  0xdd   : > { %v357_v45 = vld [vmem:[#allocation2 + $0x48] sm:$0xff]  ;;  %v358_v46 = vld [vmem:[#allocation2 + $0x50] sm:$0xff]  ;;  %v4058_v13 = vrot.slane %v1311_v43, %v3967_v33 }
  0xde   : > { %590 = vrot.lane.b32.xlu1 %v3960_v30, %s3692_s22  ;;  %592 = vrot.lane.b32.xlu0 %v357_v45, %s3692_s22  ;;  %v443_v48 = vcombine.low %v3956_v28, %v358_v46  ;;  %v444_v49 = vcombine.high %v3956_v28, %v358_v46  ;;  %v375_v50 = vcombine.low %v353_v47, %v357_v45  ;;  %v4034_v2 = vld [vmem:[#allocation2 + $0x49] sm:$0xff]  ;;  %v4107_v21 = vld [vmem:[#allocation2 + $0x51] sm:$0xff] }
  0xdf   : > { %v376_v53 = vcombine.high %v353_v47, %v357_v45  ;;  %v1327_v7 = vcombine.high %v4038_v4, %v4034_v2  ;;  %v1326_v37 = vcombine.low %v4038_v4, %v4034_v2  ;;  %v4163_v43 = vld [vmem:[#allocation2 + $0x22] sm:$0xff] }
  0xe0   : > { %v4001_v54 = vrot.slane %v443_v48, %v3967_v33  ;;  %v4004_v55 = vrot.slane %v444_v49, %v3967_v33  ;;  %v4007_v56 = vrot.slane %v375_v50, %v3967_v33  ;;  %v1318_v49 = vrot.slane %v1310_v41, %v3967_v33 }
  0xe1   : > { %v4013_v58 = vrot.slane %v376_v53, %v3967_v33  ;;  %v4061_v14 = vrot.slane %v1327_v7, %v3967_v33 }
  0xe2   : > { %594 = vrot.lane.b32.xlu1 %v358_v46, %s3692_s22  ;;  %997 = vrot.lane.b32.xlu0 %v977_v31, %s3693_s7  ;;  %v460_v60 = vcombine.high %v3995_v51, %v4001_v54  ;;  %v392_v61 = vcombine.high %v4010_v57, %v4007_v56  ;;  %v476_v62 = vcombine.high %v3998_v52, %v4004_v55 }
  0xe3   : > { %v407_v63 = vcombine.low %v4016_v59, %v4013_v58  ;;  %v408_v1 = vcombine.high %v4016_v59, %v4013_v58  ;;  %v391_v3 = vcombine.low %v4010_v57, %v4007_v56  ;;  %v459_v5 = vcombine.low %v3995_v51, %v4001_v54 }
  0xe4   : > { %v475_v6 = vcombine.low %v3998_v52, %v4004_v55  ;;  %v1393_v59 = vrot.slane %v1379_v42, %v3967_v33 }
  0xe6   : > { %580 = vrot.lane.b32.xlu1 %v3958_v29, %s3692_s22  ;;  %1617 = vrot.lane.b32.xlu0 %v3973_v36, %s3692_s22 }
  0xea   : > { %584 = vrot.lane.b32.xlu1 %v353_v47, %s3692_s22  ;;  %1625 = vrot.lane.b32.xlu0 %v3962_v32, %s3692_s22 }
  0xee   : > { %588 = vrot.lane.b32.xlu1 %v977_v31, %s3692_s22  ;;  %1615 = vrot.lane.b32.xlu0 %v3976_v38, %s3692_s22  ;;  %v4155_v31 = vrot.slane %v1378_v40, %v3967_v33 }
  0xf2   : > { %991 = vrot.lane.b32.xlu1 %v3948_v25, %s3693_s7  ;;  %1623 = vrot.lane.b32.xlu0 %v3978_v39, %s3692_s22  ;;  %v4126_v25 = vsub.s32 %v395_v24, %v3954_v27 }
  0xf4   : > { %v474_v26 = vrot.slane %v460_v60, %v4126_v25  ;;  %v4172_v40 = vrot.slane %v407_v63, %v4126_v25  ;;  %v4190_v60 = vld [vmem:[#allocation2 + $0x1a] sm:$0xff] }
  0xf6   : > { %995 = vrot.lane.b32.xlu1 %v3956_v28, %s3693_s7  ;;  %1946 = vrot.lane.b32.xlu0 %v3973_v36, %s3693_s7  ;;  %v1394_v28 = vcombine.low %v4101_v20, %v4107_v21  ;;  %v492_v27 = vcombine.high %v474_v26, %v5371_v0  ;;  %v4258_v36 = vrot.slane %v459_v5, %v4126_v25 }
  0xf8   : > { %v491_v57 = vcombine.high %v4258_v36, %v5371_v0 }
  0xfa   : > { %999 = vrot.lane.b32.xlu1 %v3960_v30, %s3693_s7  ;;  %1954 = vrot.lane.b32.xlu0 %v3962_v32, %s3693_s7  ;;  %v4146_v30 = vrot.slane %v1394_v28, %v3967_v33 }
  0xfc   : > { %v1410_v35 = vcombine.low %v4155_v31, %v4146_v30 }
  0xfe   : > { %1003 = vrot.lane.b32.xlu1 %v358_v46, %s3693_s7  ;;  %1944 = vrot.lane.b32.xlu0 %v3976_v38, %s3693_s7  ;;  %v1334_v46 = vrot.slane %v1326_v37, %v3967_v33 }
 0x100   : > { %v1342_v53 = vcombine.low %v1318_v49, %v1334_v46  ;;  %v1343_v63 = vcombine.high %v1318_v49, %v1334_v46 }
 0x102   : > { %989 = vrot.lane.b32.xlu1 %v3958_v29, %s3693_s7  ;;  %1952 = vrot.lane.b32.xlu0 %v3978_v39, %s3693_s7  ;;  %v4143_v29 = vrot.slane %v392_v61, %v4126_v25  ;;  %v4199_v61 = vrot.slane %v476_v62, %v4126_v25  ;;  %v4202_v38 = vrot.slane %v1342_v53, %v4126_v25  ;;  %v4204_v39 = vld [vmem:[#allocation2 + $0x4a] sm:$0xff] }
 0x103   : > { %v4219_v62 = vrot.slane %v408_v1, %v4126_v25  ;;  %v4228_v7 = vrot.slane %v1343_v63, %v4126_v25  ;;  %v1411_v63 = vcombine.high %v4155_v31, %v4146_v30 }
 0x104   : > { %v424_v34 = vcombine.high %v4143_v29, %v5371_v0  ;;  %5403 = vst [vmem:[#allocation15_spill] sm:$0xff] %v4202_v38  ;;  %v1374_v41 = vcombine.high %v4202_v38, %v5371_v0 }
 0x105   : > { %v1425_v30 = vrot.slane %v1411_v63, %v4126_v25  ;;  %v1375_v63 = vcombine.high %v4228_v7, %v5371_v0 }
 0x106   : > { %993 = vrot.lane.b32.xlu1 %v353_v47, %s3693_s7  ;;  %2572 = vrot.lane.b32.xlu0 %v4055_v12, %s3692_s22  ;;  %v4178_v47 = vld [vmem:[#allocation2 + $0x52] sm:$0xff] }
 0x10a   : > { %1001 = vrot.lane.b32.xlu1 %v357_v45, %s3693_s7  ;;  %2580 = vrot.lane.b32.xlu0 %v4051_v9, %s3692_s22  ;;  %v4175_v45 = vrot.slane %v1410_v35, %v4126_v25 }
 0x10b   : > { %v261_v44 = vpop.xlane.xlu0 %260 }
 0x10c   : > { %5402 = vst [vmem:[#allocation14_spill] sm:$0xff] %v4175_v45  ;;  %v262_v48 = vadd.f32 1e-08, %v261_v44  ;;  %v1442_v50 = vcombine.high %v4175_v45, %v5371_v0  ;;  %v483_v44 = vrot.slane %v475_v6, %v4126_v25 }
 0x10e   : > { %1621 = vrot.lane.b32.xlu1 %v4101_v20, %s3692_s22  ;;  %2570 = vrot.lane.b32.xlu0 %v4053_v10, %s3692_s22  ;;  %3510 = vrsqrt.f32 %v262_v48 }
 0x112   : > { %1629 = vrot.lane.b32.xlu1 %v4107_v21, %s3692_s22  ;;  %2578 = vrot.lane.b32.xlu0 %v4049_v8, %s3692_s22 }
 0x116   : > { %1619 = vrot.lane.b32.xlu1 %v4038_v4, %s3692_s22  ;;  %2901 = vrot.lane.b32.xlu0 %v4055_v12, %s3693_s7 }
 0x11a   : > { %1627 = vrot.lane.b32.xlu1 %v4034_v2, %s3692_s22  ;;  %2909 = vrot.lane.b32.xlu0 %v4051_v9, %s3693_s7 }
 0x11e   : > { %1950 = vrot.lane.b32.xlu1 %v4101_v20, %s3693_s7  ;;  %2899 = vrot.lane.b32.xlu0 %v4053_v10, %s3693_s7 }
 0x122   : > { %1958 = vrot.lane.b32.xlu1 %v4107_v21, %s3693_s7  ;;  %2907 = vrot.lane.b32.xlu0 %v4049_v8, %s3693_s7 }
 0x126   : > { %1948 = vrot.lane.b32.xlu1 %v4038_v4, %s3693_s7  ;;  %528 = vrot.lane.b32.xlu0 %v474_v26, %s3695_s9  ;;  %v3511_v4 = vpop.eup %3510 }
 0x127   : > { %v4232_v58 = vmul.f32 %v3511_v4, %v3938_v11 }
 0x12a   : > { %1956 = vrot.lane.b32.xlu1 %v4034_v2, %s3693_s7  ;;  %532 = vrot.lane.b32.xlu0 %v492_v27, %s3696_s11  ;;  %v1395_v2 = vcombine.high %v4101_v20, %v4107_v21  ;;  %v4246_v20 = vrot.slane %v391_v3, %v4126_v25 }
 0x12c   : > { %v1409_v22 = vrot.slane %v1395_v2, %v3967_v33  ;;  %v423_v23 = vcombine.high %v4246_v20, %v5371_v0 }
 0x12e   : > { %2576 = vrot.lane.b32.xlu1 %v4163_v43, %s3692_s22  ;;  %504 = vrot.lane.b32.xlu0 %v424_v34, %s3696_s11  ;;  %v1426_v11 = vcombine.low %v1393_v59, %v1409_v22  ;;  %v1427_v24 = vcombine.high %v1393_v59, %v1409_v22 }
 0x130   : > { %v1434_v32 = vrot.slane %v1426_v11, %v4126_v25  ;;  %v4270_v26 = vrot.slane %v1427_v24, %v4126_v25 }
 0x132   : > { %2584 = vrot.lane.b32.xlu1 %v4178_v47, %s3692_s22  ;;  %508 = vrot.lane.b32.xlu0 %v4172_v40, %s3697_s21  ;;  %v1444_v3 = vcombine.high %v1434_v32, %v5371_v0 }
 0x136   : > { %2574 = vrot.lane.b32.xlu1 %v4190_v60, %s3692_s22  ;;  %1475 = vrot.lane.b32.xlu0 %v1442_v50, %s3698_s10  ;;  %v493_v50 = vcombine.high %v483_v44, %v5371_v0 }
 0x13a   : > { %2582 = vrot.lane.b32.xlu1 %v4204_v39, %s3692_s22  ;;  %544 = vrot.lane.b32.xlu0 %v4199_v61, %s3699_s27  ;;  %s3386_s22 = sshll.u32 %s3674_s15, 8  ;;  %s3708_s15 = smov [#allocation9]  }
 0x13e   : > { %2905 = vrot.lane.b32.xlu1 %v4163_v43, %s3693_s7  ;;  %1447 = vrot.lane.b32.xlu0 %v1374_v41, %s3698_s10  ;;  %v425_v41 = vcombine.high %v4172_v40, %v5371_v0 }
 0x142   : > { %2913 = vrot.lane.b32.xlu1 %v4178_v47, %s3693_s7  ;;  %516 = vrot.lane.b32.xlu0 %v4219_v62, %s3699_s27 }
 0x146   : > { %2903 = vrot.lane.b32.xlu1 %v4190_v60, %s3693_s7  ;;  %1451 = vrot.lane.b32.xlu0 %v4228_v7, %s3695_s9 }
 0x148   : > { %v583_v1 = vpop.permute.xlu1 %582 }
 0x14a   : > { %2911 = vrot.lane.b32.xlu1 %v4204_v39, %s3693_s7  ;;  %811 = vrot.lane.b32.xlu0 %v4232_v58, %s3700_s29  ;;  %s246_s7 = scalar_lea.vmem [#allocation9], %s3351_s20 }
 0x14c   : > { %v587_v21 = vpop.permute.xlu1 %586 }
 0x14e   : > { %496 = vrot.lane.b32.xlu1 %v423_v23, %s3698_s10  ;;  %1487 = vrot.lane.b32.xlu0 %v1434_v32, %s3697_s21 }
 0x150   : > { %v591_v42 = vpop.permute.xlu1 %590  ;;  %v593_v56 = vpop.permute.xlu0 %592 }
 0x151   : > { %v672_v51 = vcombine.low %v583_v1, %v591_v42  ;;  %v673_v2 = vcombine.high %v583_v1, %v591_v42 }
 0x152   : > { %524 = vrot.lane.b32.xlu1 %v491_v57, %s3698_s10  ;;  %1491 = vrot.lane.b32.xlu0 %v1444_v3, %s3701_s4 }
 0x153   : > { %v4277_v27 = vrot.slane %v672_v51, %v3967_v33  ;;  %v4322_v31 = vrot.slane %v673_v2, %v3967_v33  ;;  %v1358_v2 = vcombine.low %v4058_v13, %v4061_v14 }
 0x154   : > { %v595_v54 = vpop.permute.xlu1 %594  ;;  %v4267_v5 = vpop.permute.xlu0 %997 }
 0x155   : > { %v688_v28 = vcombine.low %v587_v21, %v595_v54  ;;  %v689_v52 = vcombine.high %v587_v21, %v595_v54  ;;  %v494_v54 = vcombine.high %v4199_v61, %v5371_v0 }
 0x156   : > { %500 = vrot.lane.b32.xlu1 %v4143_v29, %s3695_s9  ;;  %1495 = vrot.lane.b32.xlu0 %v4270_v26, %s3699_s27 }
 0x157   : > { %v4280_v34 = vrot.slane %v688_v28, %v3967_v33  ;;  %v4308_v22 = vrot.slane %v689_v52, %v3967_v33 }
 0x158   : > { %v581_v35 = vpop.permute.xlu1 %580  ;;  %v4282_v37 = vpop.permute.xlu0 %1617 }
 0x159   : > { %v705_v29 = vcombine.high %v4277_v27, %v4280_v34  ;;  %v720_v3 = vcombine.low %v4322_v31, %v4308_v22 }
 0x15a   : > { %536 = vrot.lane.b32.xlu1 %v483_v44, %s3697_s21 }
 0x15b   : > { %v4292_v46 = vrot.slane %v705_v29, %v4126_v25  ;;  %v4342_v28 = vrot.slane %v720_v3, %v4126_v25 }
 0x15c   : > { %v585_v48 = vpop.permute.xlu1 %584  ;;  %v4294_v49 = vpop.permute.xlu0 %1625 }
 0x15d   : > { %773 = vrot.lane.b32.xlu0 %v4292_v46, %s3695_s9  ;;  %v620_v55 = vcombine.low %v585_v48, %v593_v56  ;;  %v621_v1 = vcombine.high %v585_v48, %v593_v56  ;;  %v1443_v48 = vcombine.high %v1425_v30, %v5371_v0 }
 0x15e   : > { %540 = vrot.lane.b32.xlu1 %v493_v50, %s3701_s4 }
 0x15f   : > { %v4311_v59 = vrot.slane %v620_v55, %v3967_v33  ;;  %v635_v56 = vrot.slane %v621_v1, %v3967_v33  ;;  %v426_v55 = vcombine.high %v4219_v62, %v5371_v0  ;;  %v1366_v62 = vrot.slane %v1358_v2, %v4126_v25 }
 0x160   : > { %v589_v6 = vpop.permute.xlu1 %588  ;;  %v4300_v53 = vpop.permute.xlu0 %1615 }
 0x161   : > { %v604_v4 = vcombine.low %v581_v35, %v589_v6  ;;  %v605_v11 = vcombine.high %v581_v35, %v589_v6  ;;  %v1376_v7 = vcombine.high %v1366_v62, %v5371_v0 }
 0x162   : > { %512 = vrot.lane.b32.xlu1 %v425_v41, %s3701_s4 }
 0x163   : > { %v4314_v21 = vrot.slane %v604_v4, %v3967_v33  ;;  %v619_v42 = vrot.slane %v605_v11, %v3967_v33 }
 0x164   : > { %v4316_v23 = vpop.permute.xlu1 %991  ;;  %v4318_v40 = vpop.permute.xlu0 %1623 }
 0x165   : > { %v637_v32 = vcombine.high %v4314_v21, %v4311_v59  ;;  %v653_v35 = vcombine.high %v619_v42, %v635_v56 }
 0x166   : > { %1479 = vrot.lane.b32.xlu1 %v1425_v30, %s3695_s9 }
 0x167   : > { %v4329_v57 = vrot.slane %v637_v32, %v4126_v25  ;;  %v4351_v61 = vrot.slane %v653_v35, %v4126_v25 }
 0x168   : > { %v996_v24 = vpop.permute.xlu1 %995  ;;  %v4333_v51 = vpop.permute.xlu0 %1946 }
 0x169   : > { %745 = vrot.lane.b32.xlu0 %v4329_v57, %s3695_s9 }
 0x16a   : > { %548 = vrot.lane.b32.xlu1 %v494_v54, %s3702_s8  ;;  %v652_v54 = vcombine.low %v619_v42, %v635_v56 }
 0x16c   : > { %v1000_v44 = vpop.permute.xlu1 %999  ;;  %v4344_v29 = vpop.permute.xlu0 %1954  ;;  %v4393_v56 = vrot.slane %v652_v54, %v4126_v25  ;;  %v1707_v54 = vcombine.low %v4282_v37, %v4294_v49 }
 0x16d   : > { %781 = vrot.lane.b32.xlu0 %v4342_v28, %s3697_s21 }
 0x16e   : > { %1483 = vrot.lane.b32.xlu1 %v1443_v48, %s3696_s11  ;;  %v1715_v18 = vrot.slane %v1707_v54, %v3967_v33 }
 0x170   : > { %v1004_v50 = vpop.permute.xlu1 %1003  ;;  %v4353_v52 = vpop.permute.xlu0 %1944 }
 0x171   : > { %761 = vrot.lane.b32.xlu0 %v4351_v61, %s3699_s27  ;;  %v1097_v1 = vcombine.low %v996_v24, %v1004_v50  ;;  %v1098_v2 = vcombine.high %v996_v24, %v1004_v50  ;;  %v721_v24 = vcombine.high %v4322_v31, %v4308_v22  ;;  %v1082_v50 = vcombine.high %v4316_v23, %v1000_v44 }
 0x172   : > { %520 = vrot.lane.b32.xlu1 %v426_v55, %s3702_s8 }
 0x174   : > { %v990_v6 = vpop.permute.xlu1 %989  ;;  %v4360_v41 = vpop.permute.xlu0 %1952 }
 0x175   : > { %v1013_v30 = vcombine.low %v990_v6, %v4267_v5  ;;  %v1014_v35 = vcombine.high %v990_v6, %v4267_v5 }
 0x176   : > { %1455 = vrot.lane.b32.xlu1 %v1375_v63, %s3696_s11  ;;  %v1081_v63 = vcombine.low %v4316_v23, %v1000_v44  ;;  %v4417_v44 = vrot.slane %v721_v24, %v4126_v25 }
 0x177   : > { %v4379_v19 = vrot.slane %v1013_v30, %v3967_v33  ;;  %v1028_v6 = vrot.slane %v1014_v35, %v3967_v33  ;;  %v1096_v35 = vrot.slane %v1082_v50, %v3967_v33 }
 0x178   : > { %v994_v4 = vpop.permute.xlu1 %993  ;;  %v4367_v11 = vpop.permute.xlu0 %2572  ;;  %v4402_v30 = vrot.slane %v1081_v63, %v3967_v33 }
 0x17a   : > { %1459 = vrot.lane.b32.xlu1 %v1366_v62, %s3697_s21  ;;  %v4386_v62 = vrot.slane %v1097_v1, %v3967_v33  ;;  %v1112_v1 = vrot.slane %v1098_v2, %v3967_v33 }
 0x17c   : > { %v1002_v32 = vpop.permute.xlu1 %1001  ;;  %v4372_v3 = vpop.permute.xlu0 %2580  ;;  %v1114_v22 = vcombine.high %v4402_v30, %v4386_v62  ;;  %v1130_v2 = vcombine.high %v1096_v35, %v1112_v1  ;;  %v1129_v24 = vcombine.low %v1096_v35, %v1112_v1  ;;  %v1639_v1 = vcombine.low %v4300_v53, %v4318_v40 }
 0x17d   : > { %v1029_v48 = vcombine.low %v994_v4, %v1002_v32  ;;  %v1030_v55 = vcombine.high %v994_v4, %v1002_v32 }
 0x17e   : > { %1463 = vrot.lane.b32.xlu1 %v1376_v7, %s3701_s4  ;;  %v4439_v15 = vrot.slane %v1114_v22, %v4126_v25  ;;  %v4451_v35 = vrot.slane %v1130_v2, %v4126_v25  ;;  %v4459_v38 = vrot.slane %v1129_v24, %v4126_v25  ;;  %v636_v2 = vcombine.low %v4314_v21, %v4311_v59 }
 0x17f   : > { %v4382_v17 = vrot.slane %v1029_v48, %v3967_v33  ;;  %v1044_v16 = vrot.slane %v1030_v55, %v3967_v33 }
 0x180   : > { %v4388_v42 = vpop.permute.xlu1 %1621  ;;  %v4390_v5 = vpop.permute.xlu0 %2570 }
 0x181   : > { %5404 = vst [vmem:[#allocation16_spill] sm:$0xff] %v4390_v5  ;;  %v1046_v4 = vcombine.high %v4379_v19, %v4382_v17  ;;  %v1061_v7 = vcombine.low %v1028_v6, %v1044_v16 }
 0x182   : > { %753 = vrot.lane.b32.xlu1 %v4393_v56, %s3697_s21 }
 0x183   : > { %v4408_v32 = vrot.slane %v1046_v4, %v4126_v25  ;;  %v4432_v63 = vrot.slane %v1061_v7, %v4126_v25  ;;  %v704_v7 = vcombine.low %v4277_v27, %v4280_v34  ;;  %v4468_v27 = vrot.slane %v1639_v1, %v3967_v33 }
 0x184   : > { %v4412_v23 = vpop.permute.xlu1 %1629  ;;  %v4414_v31 = vpop.permute.xlu0 %2578 }
 0x185   : > { %5405 = vst [vmem:[#allocation17_spill] sm:$0xff] %v4414_v31  ;;  %v1723_v48 = vcombine.low %v4388_v42, %v4412_v23  ;;  %1154 = vrot.lane.b32.xlu0 %v4408_v32, %s3695_s9 }
 0x186   : > { %789 = vrot.lane.b32.xlu1 %v4417_v44, %s3699_s27 }
 0x187   : > { %v4429_v55 = vrot.slane %v1723_v48, %v3967_v33  ;;  %v1062_v48 = vcombine.high %v1028_v6, %v1044_v16  ;;  %v4475_v6 = vrot.slane %v704_v7, %v4126_v25 }
 0x188   : > { %v4434_v4 = vpop.permute.xlu1 %1619  ;;  %v4436_v50 = vpop.permute.xlu0 %2901 }
 0x189   : > { %5406 = vst [vmem:[#allocation18_spill] sm:$0xff] %v4436_v50  ;;  %1162 = vrot.lane.b32.xlu0 %v4432_v63, %s3697_s21  ;;  %v1740_v22 = vcombine.high %v1715_v18, %v4429_v55  ;;  %5408 = vst [vmem:[#allocation20_spill] sm:$0xff] %v4475_v6 }
 0x18a   : > { %1182 = vrot.lane.b32.xlu1 %v4439_v15, %s3695_s9 }
 0x18b   : > { %v1754_v34 = vrot.slane %v1740_v22, %v4126_v25 }
 0x18c   : > { %v4454_v0 = vpop.permute.xlu1 %1627  ;;  %v4456_v54 = vpop.permute.xlu0 %2909 }
 0x18d   : > { %5407 = vst [vmem:[#allocation19_spill] sm:$0xff] %v4456_v54  ;;  %v1655_v45 = vcombine.low %v4434_v4, %v4454_v0  ;;  %1198 = vrot.lane.b32.xlu0 %v4451_v35, %s3699_s27  ;;  %v4484_v54 = vrot.slane %v1062_v48, %v4126_v25  ;;  %v4501_v48 = vrot.slane %v636_v2, %v4126_v25 }
 0x18e   : > { %1190 = vrot.lane.b32.xlu1 %v4459_v38, %s3697_s21 }
 0x18f   : > { %v4471_v16 = vrot.slane %v1655_v45, %v3967_v33  ;;  %v5410_v45 = vmov 0.0  }
 0x190   : > { %v4479_v24 = vpop.permute.xlu1 %1950  ;;  %v4481_v50 = vpop.permute.xlu0 %2899  ;;  %v736_v7 = vcombine.high %v4475_v6, %v5410_v45  ;;  %v738_v6 = vcombine.high %v4342_v28, %v5410_v45  ;;  %v670_v2 = vcombine.high %v4393_v56, %v5410_v45 }
 0x191   : > { %5409 = vst [vmem:[#allocation21_spill] sm:$0xff] %v4481_v50  ;;  %v1672_v1 = vcombine.high %v4468_v27, %v4471_v16  ;;  %1808 = vrot.lane.b32.xlu0 %v1754_v34, %s3695_s9  ;;  %v1045_v50 = vcombine.low %v4379_v19, %v4382_v17  ;;  %v737_v17 = vcombine.high %v4292_v46, %v5410_v45 }
 0x192   : > { %1170 = vrot.lane.b32.xlu1 %v4484_v54, %s3699_s27  ;;  %v1113_v19 = vcombine.low %v4402_v30, %v4386_v62 }
 0x193   : > { %v4494_v59 = vrot.slane %v1672_v1, %v4126_v25 }
 0x194   : > { %v4496_v21 = vpop.permute.xlu1 %1958  ;;  %v4498_v22 = vpop.permute.xlu0 %2907  ;;  %v4541_v62 = vrot.slane %v1113_v19, %v4126_v25 }
 0x195   : > { %5411 = vst [vmem:[#allocation22_spill] sm:$0xff] %v4498_v22  ;;  %769 = vrot.lane.b32.xlu0 %v736_v7, %s3698_s10  ;;  %v668_v22 = vcombine.high %v4501_v48, %v5410_v45  ;;  %v4521_v7 = vrot.slane %v1045_v50, %v4126_v25  ;;  %v669_v50 = vcombine.high %v4329_v57, %v5410_v45 }
 0x196   : > { %1780 = vrot.lane.b32.xlu1 %v4494_v59, %s3695_s9  ;;  %5413 = vst [vmem:[#allocation24_spill] sm:$0xff] %v4541_v62  ;;  %v1145_v57 = vcombine.high %v4541_v62, %v5410_v45 }
 0x197   : > { %5412 = vst [vmem:[#allocation23_spill] sm:$0xff] %v4521_v7  ;;  %v1077_v56 = vcombine.high %v4521_v7, %v5410_v45 }
 0x198   : > { %v4510_v1 = vpop.permute.xlu1 %1948  ;;  %v4512_v5 = vpop.permute.xlu0 %528 }
 0x199   : > { %785 = vrot.lane.b32.xlu0 %v738_v6, %s3701_s4  ;;  %v1739_v6 = vcombine.low %v1715_v18, %v4429_v55  ;;  %v1078_v18 = vcombine.high %v4408_v32, %v5410_v45 }
 0x19a   : > { %741 = vrot.lane.b32.xlu1 %v668_v22, %s3698_s10 }
 0x19b   : > { %v4550_v55 = vrot.slane %v1739_v6, %v4126_v25  ;;  %v1724_v6 = vcombine.high %v4388_v42, %v4412_v23  ;;  %v1772_v42 = vcombine.high %v1754_v34, %v5410_v45  ;;  %v2052_v23 = vcombine.low %v4479_v24, %v4496_v21 }
 0x19c   : > { %v4527_v28 = vpop.permute.xlu1 %1956  ;;  %v4529_v31 = vpop.permute.xlu0 %532 }
 0x19d   : > { %757 = vrot.lane.b32.xlu0 %v670_v2, %s3701_s4  ;;  %5414 = vst [vmem:[#allocation25_spill] sm:$0xff] %v4550_v55  ;;  %v1771_v2 = vcombine.high %v4550_v55, %v5410_v45 }
 0x19e   : > { %777 = vrot.lane.b32.xlu1 %v737_v17, %s3696_s11  ;;  %v739_v17 = vcombine.high %v4417_v44, %v5410_v45  ;;  %v1708_v44 = vcombine.high %v4282_v37, %v4294_v49  ;;  %v2036_v49 = vcombine.low %v4333_v51, %v4344_v29 }
 0x1a0   : > { %v4538_v46 = vpop.permute.xlu1 %2576  ;;  %v4545_v30 = vpop.permute.xlu0 %504  ;;  %v4593_v37 = vrot.slane %v1708_v44, %v3967_v33  ;;  %v2044_v44 = vrot.slane %v2036_v49, %v3967_v33  ;;  %v1968_v49 = vcombine.low %v4353_v52, %v4360_v41 }
 0x1a1   : > { %1150 = vrot.lane.b32.xlu0 %v1077_v56, %s3698_s10  ;;  %v1148_v56 = vcombine.high %v4451_v35, %v5410_v45 }
 0x1a2   : > { %749 = vrot.lane.b32.xlu1 %v669_v50, %s3696_s11 }
 0x1a4   : > { %v4552_v22 = vpop.permute.xlu1 %2584  ;;  %v4564_v32 = vpop.permute.xlu0 %508 }
 0x1a5   : > { %1158 = vrot.lane.b32.xlu0 %v1078_v18, %s3696_s11  ;;  %v1146_v18 = vcombine.high %v4439_v15, %v5410_v45  ;;  %v671_v15 = vcombine.high %v4351_v61, %v5410_v45  ;;  %v1080_v61 = vcombine.high %v4484_v54, %v5410_v45  ;;  %v1079_v54 = vcombine.high %v4432_v63, %v5410_v45 }
 0x1a6   : > { %1178 = vrot.lane.b32.xlu1 %v1145_v57, %s3698_s10  ;;  %v4581_v57 = vrot.slane %v1724_v6, %v3967_v33  ;;  %v1671_v6 = vcombine.low %v4468_v27, %v4471_v16  ;;  %v1984_v16 = vcombine.low %v4510_v1, %v4527_v28 }
 0x1a8   : > { %v4562_v19 = vpop.permute.xlu1 %2574  ;;  %v4586_v35 = vpop.permute.xlu0 %1475  ;;  %v1755_v34 = vcombine.low %v4593_v37, %v4581_v57 }
 0x1a9   : > { %1804 = vrot.lane.b32.xlu0 %v1771_v2, %s3698_s10  ;;  %5415 = vst [vmem:[#allocation26_spill] sm:$0xff] %v4586_v35 }
 0x1aa   : > { %793 = vrot.lane.b32.xlu1 %v739_v17, %s3702_s8  ;;  %v2060_v17 = vrot.slane %v2052_v23, %v3967_v33 }
 0x1ac   : > { %v4572_v50 = vpop.permute.xlu1 %2582  ;;  %v2069_v23 = vcombine.high %v2044_v44, %v2060_v17  ;;  %v2068_v27 = vcombine.low %v2044_v44, %v2060_v17  ;;  %v1992_v17 = vrot.slane %v1984_v16, %v3967_v33  ;;  %v1976_v44 = vrot.slane %v1968_v49, %v3967_v33 }
 0x1ad   : > { %1202 = vrot.lane.b32.xlu0 %v1148_v56, %s3702_s8  ;;  %v1704_v49 = vcombine.high %v4494_v59, %v5410_v45 }
 0x1ae   : > { %1186 = vrot.lane.b32.xlu1 %v1146_v18, %s3696_s11  ;;  %v1147_v18 = vcombine.high %v4459_v38, %v5410_v45  ;;  %v4623_v38 = vrot.slane %v1671_v6, %v4126_v25  ;;  %v2083_v63 = vrot.slane %v2069_v23, %v4126_v25  ;;  %v4638_v6 = vrot.slane %v2068_v27, %v4126_v25 }
 0x1af   : > { %v1656_v23 = vcombine.high %v4434_v4, %v4454_v0  ;;  %v2000_v16 = vcombine.low %v1976_v44, %v1992_v17  ;;  %v1640_v27 = vcombine.high %v4300_v53, %v4318_v40  ;;  %v2281_v40 = vcombine.low %v4190_v60, %v4204_v39 }
 0x1b0   : > { %v4590_v2 = vpop.permute.xlu1 %2905  ;;  %5416 = vst [vmem:[#allocation27_spill] sm:$0xff] %v4623_v38  ;;  %5418 = vst [vmem:[#allocation29_spill] sm:$0xff] %v4638_v6  ;;  %v2101_v59 = vcombine.high %v2083_v63, %v5410_v45 }
 0x1b1   : > { %1812 = vrot.lane.b32.xlu0 %v1772_v42, %s3696_s11  ;;  %v4611_v42 = vpop.permute.xlu0 %544  ;;  %v4667_v53 = vrot.slane %v1640_v27, %v3967_v33  ;;  %v4685_v27 = vrot.slane %v2281_v40, %v3967_v33 }
 0x1b2   : > { %765 = vrot.lane.b32.xlu1 %v671_v15, %s3702_s8  ;;  %v1763_v15 = vrot.slane %v1755_v34, %v4126_v25 }
 0x1b4   : > { %v4606_v56 = vpop.permute.xlu1 %2913  ;;  %v1773_v0 = vcombine.high %v1763_v15, %v5410_v45 }
 0x1b5   : > { %1174 = vrot.lane.b32.xlu0 %v1080_v61, %s3702_s8  ;;  %v4629_v34 = vpop.permute.xlu0 %1447 }
 0x1b6   : > { %1194 = vrot.lane.b32.xlu1 %v1147_v18, %s3701_s4  ;;  %5417 = vst [vmem:[#allocation28_spill] sm:$0xff] %v4629_v34  ;;  %v1703_v18 = vcombine.high %v4623_v38, %v5410_v45  ;;  %v2100_v38 = vcombine.high %v4638_v6, %v5410_v45 }
 0x1b8   : > { %v4620_v55 = vpop.permute.xlu1 %2903 }
 0x1b9   : > { %1816 = vrot.lane.b32.xlu0 %v1763_v15, %s3697_s21  ;;  %v4653_v35 = vpop.permute.xlu0 %516 }
 0x1ba   : > { %1166 = vrot.lane.b32.xlu1 %v1079_v54, %s3701_s4  ;;  %v1445_v54 = vcombine.high %v4270_v26, %v5410_v45  ;;  %v4658_v26 = vrot.slane %v1656_v23, %v3967_v33 }
 0x1bc   : > { %v4633_v61 = vpop.permute.xlu1 %2911  ;;  %v1687_v15 = vcombine.low %v4667_v53, %v4658_v26 }
 0x1bd   : > { %2137 = vrot.lane.b32.xlu0 %v2083_v63, %s3695_s9  ;;  %v5421_v63 = vcombine.high %v4058_v13, %v4061_v14  ;;  %v5424_v14 = vcombine.low %v4055_v12, %v4051_v9 }
 0x1be   : > { %1776 = vrot.lane.b32.xlu1 %v1703_v18, %s3698_s10  ;;  %v4664_v18 = vrot.slane %v2000_v16, %v4126_v25  ;;  %v2349_v16 = vcombine.low %v4163_v43, %v4178_v47 }
 0x1c0   : > { %v4647_v34 = vpop.permute.xlu1 %496  ;;  %5419 = vst [vmem:[#allocation30_spill] sm:$0xff] %v4664_v18  ;;  %v2032_v23 = vcombine.high %v4664_v18, %v5410_v45  ;;  %v5422_v18 = vcombine.low %v4053_v10, %v4049_v8 }
 0x1c1   : > { %1499 = vrot.lane.b32.xlu0 %v1445_v54, %s3702_s8 }
 0x1c2   : > { %2133 = vrot.lane.b32.xlu1 %v2100_v38, %s3698_s10  ;;  %v4675_v38 = vpop.permute.xlu0 %1451  ;;  %v4696_v7 = vrot.slane %v5422_v18, %v3967_v33 }
 0x1c3   : > { %5420 = vst [vmem:[#allocation31_spill] sm:$0xff] %v4675_v38  ;;  %v1373_v38 = vrot.slane %v5421_v63, %v4126_v25 }
 0x1c4   : > { %v525_v4 = vpop.permute.xlu1 %524  ;;  %v2297_v13 = vcombine.low %v4696_v7, %v4685_v27 }
 0x1c5   : > { %1820 = vrot.lane.b32.xlu0 %v1773_v0, %s3701_s4  ;;  %v2001_v0 = vcombine.high %v1976_v44, %v1992_v17  ;;  %v4711_v17 = vrot.slane %v5424_v14, %v3967_v33  ;;  %v1985_v14 = vcombine.high %v4510_v1, %v4527_v28 }
 0x1c6   : > { %1784 = vrot.lane.b32.xlu1 %v1704_v49, %s3696_s11  ;;  %v1695_v49 = vrot.slane %v1687_v15, %v4126_v25  ;;  %v4701_v40 = vpop.permute.xlu0 %811  ;;  %v4722_v63 = vrot.slane %v2297_v13, %v4126_v25  ;;  %v2678_v13 = vcombine.low %v4538_v46, %v4552_v22 }
 0x1c7   : > { %5423 = vst [vmem:[#allocation32_spill] sm:$0xff] %v4701_v40  ;;  %v2015_v18 = vrot.slane %v2001_v0, %v4126_v25  ;;  %v4743_v28 = vrot.slane %v1985_v14, %v3967_v33 }
 0x1c8   : > { %v501_v54 = vpop.permute.xlu1 %500  ;;  %v1705_v44 = vcombine.high %v1695_v49, %v5410_v45  ;;  %5425 = vst [vmem:[#allocation33_spill] sm:$0xff] %v4722_v63  ;;  %v2329_v1 = vcombine.high %v4722_v63, %v5410_v45 }
 0x1c9   : > { %2141 = vrot.lane.b32.xlu0 %v2101_v59, %s3696_s11  ;;  %v4699_v59 = vrot.slane %v2349_v16, %v3967_v33  ;;  %v565_v16 = vsel %vm551_vm7, %v4258_v36, %v525_v4  ;;  %v2033_v40 = vcombine.high %v2015_v18, %v5410_v45 }
 0x1ca   : > { %2105 = vrot.lane.b32.xlu1 %v2032_v23, %s3698_s10  ;;  %v4726_v0 = vpop.permute.xlu0 %1487  ;;  %v566_v62 = vsel %vm553_vm8, %v565_v16, %v4512_v5  ;;  %v1688_v5 = vcombine.high %v4667_v53, %v4658_v26  ;;  %v2662_v53 = vcombine.low %v4367_v11, %v4372_v3  ;;  %v4775_v16 = vrot.slane %v2678_v13, %v3967_v33 }
 0x1cb   : > { %v2365_v23 = vcombine.low %v4711_v17, %v4699_v59 }
 0x1cc   : > { %v537_v6 = vpop.permute.xlu1 %536  ;;  %v4785_v14 = vrot.slane %v2662_v53, %v3967_v33 }
 0x1cd   : > { %1219 = vrot.lane.b32.xlu0 %v4232_v58, %s3703_s30  ;;  %v4732_v4 = vrot.slane %v2365_v23, %v4126_v25 }
 0x1ce   : > { %1467 = vrot.lane.b32.xlu1 %v1373_v38, %s3699_s27 }
 0x1cf   : > { %5426 = vst [vmem:[#allocation34_spill] sm:$0xff] %v4732_v4 }
 0x1d0   : > { %v541_v15 = vpop.permute.xlu1 %540 }
 0x1d1   : > { %1792 = vrot.lane.b32.xlu0 %v1705_v44, %s3701_s4 }
 0x1d2   : > { %1788 = vrot.lane.b32.xlu1 %v1695_v49, %s3697_s21  ;;  %v1969_v49 = vcombine.high %v4353_v52, %v4360_v41  ;;  %v567_v52 = vsel %vm555_vm9, %v566_v62, %v4529_v31  ;;  %v2053_v41 = vcombine.high %v4479_v24, %v4496_v21  ;;  %v552_v31 = vsel %vm551_vm7, %v4246_v20, %v4647_v34  ;;  %v4764_v62 = vpop.permute.xlu0 %1491 }
 0x1d3   : > { %v2037_v21 = vcombine.high %v4333_v51, %v4344_v29  ;;  %v1702_v20 = vrot.slane %v1688_v5, %v4126_v25  ;;  %v1756_v34 = vcombine.high %v4593_v37, %v4581_v57  ;;  %v1377_v29 = vcombine.high %v1373_v38, %v5410_v45 }
 0x1d4   : > { %v513_v36 = vpop.permute.xlu1 %512  ;;  %v4757_v26 = vrot.slane %v1969_v49, %v3967_v33  ;;  %v2694_v37 = vcombine.low %v4785_v14, %v4775_v16 }
 0x1d5   : > { %2113 = vrot.lane.b32.xlu0 %v2033_v40, %s3696_s11  ;;  %v568_v40 = vsel %vm557_vm10, %v567_v52, %v537_v6  ;;  %v554_v6 = vsel %vm553_vm8, %v552_v31, %v501_v54  ;;  %v2051_v57 = vrot.slane %v2037_v21, %v3967_v33 }
 0x1d6   : > { %2109 = vrot.lane.b32.xlu1 %v2015_v18, %s3695_s9  ;;  %v2397_v18 = vcombine.high %v4732_v4, %v5410_v45  ;;  %v569_v24 = vsel %vm559_vm11, %v568_v40, %v541_v15  ;;  %v2016_v23 = vcombine.low %v4757_v26, %v4743_v28  ;;  %v2067_v15 = vrot.slane %v2053_v41, %v3967_v33 }
 0x1d7   : > { %v570_v54 = vsel %vm561_vm12, %v569_v24, %v4611_v42  ;;  %v556_v49 = vsel %vm555_vm9, %v554_v6, %v4545_v30  ;;  %v4796_v42 = vpop.permute.xlu0 %1495  ;;  %v2298_v30 = vcombine.high %v4696_v7, %v4685_v27  ;;  %v1770_v41 = vrot.slane %v1756_v34, %v4126_v25 }
 0x1d8   : > { %v4752_v44 = vpop.permute.xlu1 %1479  ;;  %v4799_v38 = vrot.slane %v2016_v23, %v4126_v25  ;;  %v2084_v5 = vcombine.low %v2051_v57, %v2067_v15  ;;  %v558_v13 = vsel %vm557_vm10, %v556_v49, %v4564_v32  ;;  %v4818_v7 = vrot.slane %v2694_v37, %v4126_v25 }
 0x1d9   : > { %2402 = vrot.lane.b32.xlu0 %v2329_v1, %s3698_s10  ;;  %v560_v40 = vsel %vm559_vm11, %v558_v13, %v513_v36  ;;  %v4815_v53 = vrot.slane %v2298_v30, %v4126_v25  ;;  %v2366_v36 = vcombine.high %v4711_v17, %v4699_v59  ;;  %v2350_v59 = vcombine.high %v4163_v43, %v4178_v47 }
 0x1da   : > { %2430 = vrot.lane.b32.xlu1 %v2397_v18, %s3698_s10  ;;  %5427 = vst [vmem:[#allocation35_spill] sm:$0xff] %v4818_v7  ;;  %v2092_v27 = vrot.slane %v2084_v5, %v4126_v25  ;;  %v562_v31 = vsel %vm561_vm12, %v560_v40, %v4653_v35  ;;  %v2726_v35 = vcombine.high %v4818_v7, %v5410_v45  ;;  %v5432_v40 = vld [vmem:[#allocation16_spill] sm:$0xff] }
 0x1db   : > { %v4812_v18 = vpop.permute.xlu0 %773  ;;  %v2380_v6 = vrot.slane %v2366_v36, %v4126_v25  ;;  %v2085_v23 = vcombine.high %v2051_v57, %v2067_v15  ;;  %v1706_v34 = vcombine.high %v1702_v20, %v5410_v45  ;;  %v1774_v43 = vcombine.high %v1770_v41, %v5410_v45 }
 0x1dc   : > { %v549_v51 = vpop.permute.xlu1 %548  ;;  %v2102_v57 = vcombine.high %v2092_v27, %v5410_v45  ;;  %v2610_v30 = vcombine.low %v4562_v19, %v4572_v50 }
 0x1dd   : > { %1796 = vrot.lane.b32.xlu0 %v1702_v20, %s3699_s27  ;;  %v571_v1 = vsel %vm563_vm13, %v570_v54, %v549_v51  ;;  %v4846_v51 = vrot.slane %v2350_v59, %v3967_v33  ;;  %v5429_v54 = vcombine.high %v4055_v12, %v4051_v9  ;;  %v2099_v20 = vrot.slane %v2085_v23, %v4126_v25 }
 0x1de   : > { %1471 = vrot.lane.b32.xlu1 %v1377_v29, %s3702_s8  ;;  %3356 = vmatprep.subr.msk.mxu1 %vm816_vm14, %v571_v1  ;;  %v2695_v9 = vcombine.high %v4785_v14, %v4775_v16  ;;  %v2398_v13 = vcombine.high %v2380_v6, %v5410_v45  ;;  %v2618_v14 = vrot.slane %v2610_v30, %v3967_v33 }
 0x1df   : > { %v4830_v21 = vpop.permute.xlu0 %745  ;;  %v4858_v49 = vrot.slane %v5429_v54, %v3967_v33  ;;  %v2282_v59 = vcombine.high %v4190_v60, %v4204_v39  ;;  %v2330_v60 = vcombine.high %v4815_v53, %v5410_v45 }
 0x1e0   : > { %v4805_v52 = vpop.permute.xlu1 %1483  ;;  %v2709_v16 = vrot.slane %v2695_v9, %v4126_v25  ;;  %v2939_v9 = vcombine.low %v4620_v55, %v4633_v61 }
 0x1e1   : > { %2117 = vrot.lane.b32.xlu0 %v4799_v38, %s3697_s21  ;;  %v2381_v15 = vcombine.low %v4858_v49, %v4846_v51 }
 0x1e2   : > { %1824 = vrot.lane.b32.xlu1 %v1770_v41, %s3699_s27  ;;  %v5431_v41 = vld [vmem:[#allocation17_spill] sm:$0xff]  ;;  %v2727_v30 = vcombine.high %v2709_v16, %v5410_v45 }
 0x1e3   : > { %v4851_v47 = vpop.permute.xlu0 %781  ;;  %v2389_v37 = vrot.slane %v2381_v15, %v4126_v25  ;;  %v4907_v15 = vrot.slane %v2282_v59, %v3967_v33  ;;  %v5437_v59 = vld [vmem:[#allocation21_spill] sm:$0xff] }
 0x1e4   : > { %v521_v32 = vpop.permute.xlu1 %520 }
 0x1e5   : > { %2406 = vrot.lane.b32.xlu0 %v4815_v53, %s3695_s9  ;;  %v564_v24 = vsel %vm563_vm13, %v562_v31, %v521_v32  ;;  %v2594_v32 = vcombine.low %v5432_v40, %v5431_v41  ;;  %v2399_v54 = vcombine.high %v2389_v37, %v5410_v45 }
 0x1e6   : > { %2145 = vrot.lane.b32.xlu1 %v2092_v27, %s3697_s21  ;;  %3357 = vmatpush1.msk.msra.mxu1 %vm816_vm14, %v564_v24 }
 0x1e7   : > { %3358 = vmatmul.mubr.msk.f32.vlgmr.msra.gmra.mxu1 %vm813_vm15, %v4232_v58  ;;  %v4871_v12 = vpop.permute.xlu0 %761  ;;  %v2602_v36 = vrot.slane %v2594_v32, %v3967_v33  ;;  %v3007_v32 = vcombine.low %v4590_v2, %v4606_v56 }
 0x1e8   : > { %v4838_v17 = vpop.permute.xlu1 %1455  ;;  %1590 = vmatprep.mubr.f32.mxu1 %v5410_v45 }
 0x1e9   : > { %2759 = vrot.lane.b32.xlu0 %v2726_v35, %s3698_s10  ;;  %v2103_v35 = vcombine.high %v2099_v20, %v5410_v45  ;;  %v4947_v4 = vrot.slane %v3007_v32, %v3967_v33 }
 0x1ea   : > { %2434 = vrot.lane.b32.xlu1 %v2380_v6, %s3695_s9  ;;  %v2626_v6 = vcombine.low %v2602_v36, %v2618_v14 }
 0x1ec   : > { %v4848_v29 = vpop.permute.xlu1 %1459  ;;  %v4914_v39 = vrot.slane %v2626_v6, %v4126_v25 }
 0x1ed   : > { %5428 = vst [vmem:[#allocation36_spill] sm:$0xff] %v4848_v29  ;;  %1800 = vrot.lane.b32.xlu0 %v1706_v34, %s3702_s8  ;;  %v2034_v34 = vcombine.high %v4799_v38, %v5410_v45  ;;  %v5434_v38 = vcombine.high %v4053_v10, %v4049_v8  ;;  %v5436_v10 = vld [vmem:[#allocation22_spill] sm:$0xff] }
 0x1ee   : > { %1828 = vrot.lane.b32.xlu1 %v1774_v43, %s3702_s8  ;;  %5433 = vst [vmem:[#allocation17_spill] sm:$0xff] %v4914_v39  ;;  %v2658_v8 = vcombine.high %v4914_v39, %v5410_v45  ;;  %v2923_v6 = vcombine.low %v5437_v59, %v5436_v10 }
 0x1f0   : > { %v4864_v1 = vpop.permute.xlu1 %1463 }
 0x1f1   : > { %5430 = vst [vmem:[#allocation37_spill] sm:$0xff] %v4864_v1  ;;  %2153 = vrot.lane.b32.xlu0 %v2099_v20, %s3699_s27 }
 0x1f2   : > { %2149 = vrot.lane.b32.xlu1 %v2102_v57, %s3701_s4  ;;  %v2280_v57 = vrot.slane %v5434_v38, %v3967_v33 }
 0x1f4   : > { %v4876_v5 = vpop.permute.xlu1 %753  ;;  %v2313_v53 = vcombine.low %v2280_v57, %v4907_v15 }
 0x1f5   : > { %2442 = vrot.lane.b32.xlu0 %v2389_v37, %s3697_s21 }
 0x1f6   : > { %2438 = vrot.lane.b32.xlu1 %v2398_v13, %s3696_s11  ;;  %v2017_v13 = vcombine.high %v4757_v26, %v4743_v28  ;;  %v4943_v28 = vrot.slane %v2939_v9, %v3967_v33  ;;  %v2321_v38 = vrot.slane %v2313_v53, %v4126_v25 }
 0x1f7   : > { %v4883_v27 = vpop.permute.xlu0 %1154 }
 0x1f8   : > { %v4887_v31 = vpop.permute.xlu1 %789  ;;  %v2031_v7 = vrot.slane %v2017_v13, %v4126_v25  ;;  %v2331_v53 = vcombine.high %v2321_v38, %v5410_v45 }
 0x1f9   : > { %2763 = vrot.lane.b32.xlu0 %v2709_v16, %s3695_s9  ;;  %v5439_v16 = vld [vmem:[#allocation18_spill] sm:$0xff] }
 0x1fa   : > { %1516 = vrot.lane.b32.xlu1 %v4232_v58, %s3704_s19 }
 0x1fb   : > { %v4892_v24 = vpop.permute.xlu0 %1162 }
 0x1fc   : > { %v4897_v23 = vpop.permute.xlu1 %1182 }
 0x1fd   : > { %2157 = vrot.lane.b32.xlu0 %v2103_v35, %s3702_s8 }
 0x1fe   : > { %2121 = vrot.lane.b32.xlu1 %v2034_v34, %s3701_s4  ;;  %v5438_v34 = vld [vmem:[#allocation19_spill] sm:$0xff] }
 0x1ff   : > { %v4903_v43 = vpop.permute.xlu0 %1198 }
 0x200   : > { %v4909_v20 = vpop.permute.xlu1 %1190 }
 0x201   : > { %2446 = vrot.lane.b32.xlu0 %v2399_v54, %s3701_s4  ;;  %v2991_v54 = vcombine.low %v5439_v16, %v5438_v34 }
 0x202   : > { %2410 = vrot.lane.b32.xlu1 %v2330_v60, %s3696_s11  ;;  %v2627_v60 = vcombine.high %v2602_v36, %v2618_v14 }
 0x203   : > { %v4924_v37 = vpop.permute.xlu0 %1808  ;;  %v4958_v14 = vrot.slane %v2991_v54, %v3967_v33  ;;  %v5441_v54 = vld [vmem:[#allocation20_spill] sm:$0xff] }
 0x204   : > { %5435 = vst [vmem:[#allocation16_spill] sm:$0xff] %v4924_v37  ;;  %v4932_v35 = vpop.permute.xlu1 %1170  ;;  %v2641_v32 = vrot.slane %v2627_v60, %v4126_v25 }
 0x205   : > { %2767 = vrot.lane.b32.xlu0 %v2727_v30, %s3696_s11  ;;  %v4953_v30 = vrot.slane %v2923_v6, %v3967_v33  ;;  %v3023_v13 = vcombine.low %v4958_v14, %v4947_v4  ;;  %v2611_v6 = vcombine.high %v4562_v19, %v4572_v50 }
 0x206   : > { %2731 = vrot.lane.b32.xlu1 %v2658_v8, %s3698_s10  ;;  %v2659_v63 = vcombine.high %v2641_v32, %v5410_v45 }
 0x207   : > { %v770_v26 = vpop.permute.xlu0 %769  ;;  %v2955_v36 = vcombine.low %v4953_v30, %v4943_v28  ;;  %v4978_v29 = vrot.slane %v3023_v13, %v4126_v25  ;;  %v4987_v50 = vrot.slane %v2611_v6, %v3967_v33  ;;  %v2314_v13 = vcombine.high %v2280_v57, %v4907_v15 }
 0x208   : > { %v4949_v39 = vpop.permute.xlu1 %1780  ;;  %v803_v37 = vsel %vm551_vm7, %v5441_v54, %v770_v26 }
 0x209   : > { %5440 = vst [vmem:[#allocation22_spill] sm:$0xff] %v4949_v39  ;;  %1845 = vrot.lane.b32.xlu0 %v4232_v58, %s3702_s8  ;;  %v4975_v1 = vrot.slane %v2955_v36, %v4126_v25  ;;  %v804_v19 = vsel %vm553_vm8, %v803_v37, %v4812_v18  ;;  %v3055_v18 = vcombine.high %v4978_v29, %v5410_v45 }
 0x20a   : > { %2125 = vrot.lane.b32.xlu1 %v2031_v7, %s3699_s27  ;;  %v2663_v37 = vcombine.high %v4367_v11, %v4372_v3  ;;  %v5011_v57 = vrot.slane %v2314_v13, %v4126_v25  ;;  %v2035_v11 = vcombine.high %v2031_v7, %v5410_v45  ;;  %v2382_v3 = vcombine.high %v4858_v49, %v4846_v51 }
 0x20b   : > { %v786_v9 = vpop.permute.xlu0 %785  ;;  %v2987_v36 = vcombine.high %v4975_v1, %v5410_v45  ;;  %v3024_v13 = vcombine.high %v4958_v14, %v4947_v4 }
 0x20c   : > { %v742_v8 = vpop.permute.xlu1 %741 }
 0x20d   : > { %2418 = vrot.lane.b32.xlu0 %v2331_v53, %s3701_s4  ;;  %v2595_v53 = vcombine.high %v5432_v40, %v5431_v41  ;;  %v2679_v41 = vcombine.high %v4538_v46, %v4552_v22  ;;  %v796_v22 = vsel %vm551_vm7, %v4501_v48, %v742_v8  ;;  %v5023_v48 = vrot.slane %v2663_v37, %v3967_v33 }
 0x20e   : > { %2414 = vrot.lane.b32.xlu1 %v2321_v38, %s3697_s21  ;;  %v797_v8 = vsel %vm553_vm8, %v796_v22, %v4830_v21  ;;  %v3038_v4 = vrot.slane %v3024_v13, %v4126_v25  ;;  %v5443_v22 = vld [vmem:[#allocation23_spill] sm:$0xff] }
 0x20f   : > { %v758_v39 = vpop.permute.xlu0 %757  ;;  %v4998_v40 = vrot.slane %v2595_v53, %v3967_v33  ;;  %v5014_v6 = vrot.slane %v2679_v41, %v3967_v33 }
 0x210   : > { %v778_v60 = vpop.permute.xlu1 %777 }
 0x211   : > { %2739 = vrot.lane.b32.xlu0 %v2659_v63, %s3696_s11  ;;  %v805_v26 = vsel %vm555_vm9, %v804_v19, %v778_v60  ;;  %v2642_v46 = vcombine.low %v4998_v40, %v4987_v50  ;;  %v2956_v60 = vcombine.high %v4953_v30, %v4943_v28  ;;  %v2710_v49 = vcombine.low %v5023_v48, %v5014_v6 }
 0x212   : > { %2735 = vrot.lane.b32.xlu1 %v2641_v32, %s3695_s9  ;;  %v806_v32 = vsel %vm557_vm10, %v805_v26, %v4851_v47  ;;  %v2396_v19 = vrot.slane %v2382_v3, %v4126_v25  ;;  %v5444_v3 = vld [vmem:[#allocation32_spill] sm:$0xff] }
 0x213   : > { %v1151_v38 = vpop.permute.xlu0 %1150  ;;  %v807_v47 = vsel %vm559_vm11, %v806_v32, %v786_v9  ;;  %v2650_v51 = vrot.slane %v2642_v46, %v4126_v25 }
 0x214   : > { %v750_v63 = vpop.permute.xlu1 %749  ;;  %v808_v21 = vsel %vm561_vm12, %v807_v47, %v4887_v31  ;;  %v2718_v31 = vrot.slane %v2710_v49, %v4126_v25  ;;  %v5445_v47 = vld [vmem:[#allocation26_spill] sm:$0xff] }
 0x215   : > { %3060 = vrot.lane.b32.xlu0 %v2987_v36, %s3698_s10  ;;  %v798_v7 = vsel %vm555_vm9, %v797_v8, %v750_v63  ;;  %v2970_v36 = vrot.slane %v2956_v60, %v4126_v25  ;;  %v5442_v63 = vld [vmem:[#allocation24_spill] sm:$0xff]  ;;  %v5446_v8 = vld [vmem:[#allocation14_spill] sm:$0xff] }
 0x216   : > { %3088 = vrot.lane.b32.xlu1 %v3055_v18, %s3698_s10  ;;  %v799_v28 = vsel %vm557_vm10, %v798_v7, %v4876_v5  ;;  %v1509_v60 = vsel %vm551_vm7, %v5446_v8, %v5445_v47  ;;  %s3229_s10 = scalar_lea.hbm %s5366_s3, %s3386_s22 }
 0x217   : > { %v1159_v15 = vpop.permute.xlu0 %1158  ;;  %v800_v5 = vsel %vm559_vm11, %v799_v28, %v758_v39 }
 0x218   : > { %v1179_v54 = vpop.permute.xlu1 %1178  ;;  %v801_v14 = vsel %vm561_vm12, %v800_v5, %v4871_v12  ;;  %v2992_v5 = vcombine.high %v5439_v16, %v5438_v34  ;;  %v2332_v34 = vcombine.high %v5011_v57, %v5410_v45 }
 0x219   : > { %2422 = vrot.lane.b32.xlu0 %v5011_v57, %s3699_s27  ;;  %v1212_v18 = vsel %vm551_vm7, %v5442_v63, %v1179_v54  ;;  %v1205_v54 = vsel %vm551_vm7, %v5443_v22, %v1151_v38  ;;  %v2660_v38 = vcombine.high %v2650_v51, %v5410_v45  ;;  %v3008_v63 = vcombine.high %v4590_v2, %v4606_v56 }
 0x21a   : > { %2129 = vrot.lane.b32.xlu1 %v2035_v11, %s3702_s8  ;;  %v1213_v32 = vsel %vm553_vm8, %v1212_v18, %v4897_v23  ;;  %v2940_v23 = vcombine.high %v4620_v55, %v4633_v61  ;;  %v1206_v7 = vsel %vm553_vm8, %v1205_v54, %v4883_v27  ;;  %v2924_v55 = vcombine.high %v5437_v59, %v5436_v10 }
 0x21b   : > { %v5031_v53 = vpop.permute.xlu0 %1804  ;;  %v1510_v61 = vsel %vm553_vm8, %v1509_v60, %v4752_v44  ;;  %v2643_v10 = vcombine.high %v4998_v40, %v4987_v50  ;;  %v3056_v18 = vcombine.high %v3038_v4, %v5410_v45 }
 0x21c   : > { %v794_v9 = vpop.permute.xlu1 %793  ;;  %v1511_v27 = vsel %vm555_vm9, %v1510_v61, %v4805_v52  ;;  %v2954_v59 = vrot.slane %v2940_v23, %v3967_v33  ;;  %v2938_v13 = vrot.slane %v2924_v55, %v3967_v33 }
 0x21d   : > { %2743 = vrot.lane.b32.xlu0 %v2650_v51, %s3697_s21  ;;  %v809_v26 = vsel %vm563_vm13, %v808_v21, %v794_v9  ;;  %v2400_v21 = vcombine.high %v2396_v19, %v5410_v45  ;;  %v1207_v51 = vsel %vm555_vm9, %v1206_v7, %v1159_v15  ;;  %v1512_v50 = vsel %vm557_vm10, %v1511_v27, %v4726_v0  ;;  %v5448_v27 = vld [vmem:[#allocation28_spill] sm:$0xff] }
 0x21e   : > { %2450 = vrot.lane.b32.xlu1 %v2396_v19, %s3699_s27  ;;  %3353 = vmatprep.subr.msk.mxu0 %vm816_vm14, %v809_v26  ;;  %v2988_v19 = vcombine.high %v2970_v36, %v5410_v45  ;;  %v1208_v52 = vsel %vm557_vm10, %v1207_v51, %v4892_v24  ;;  %v2972_v57 = vcombine.high %v2938_v13, %v2954_v59 }
 0x21f   : > { %v1203_v30 = vpop.permute.xlu0 %1202 }
 0x220   : > { %v1187_v41 = vpop.permute.xlu1 %1186 }
 0x221   : > { %3064 = vrot.lane.b32.xlu0 %v2970_v36, %s3695_s9  ;;  %v1214_v11 = vsel %vm555_vm9, %v1213_v32, %v1187_v41  ;;  %v2971_v36 = vcombine.low %v2938_v13, %v2954_v59 }
 0x222   : > { %2771 = vrot.lane.b32.xlu1 %v2718_v31, %s3697_s21  ;;  %v1215_v49 = vsel %vm557_vm10, %v1214_v11, %v4909_v20 }
 0x223   : > { %v5054_v37 = vpop.permute.xlu0 %1812  ;;  %v2979_v56 = vrot.slane %v2971_v36, %v4126_v25 }
 0x224   : > { %v766_v46 = vpop.permute.xlu1 %765 }
 0x225   : > { %2174 = vrot.lane.b32.xlu0 %v4232_v58, %s3705_s6  ;;  %v802_v39 = vsel %vm563_vm13, %v801_v14, %v766_v46  ;;  %v2711_v46 = vcombine.high %v5023_v48, %v5014_v6  ;;  %v2989_v11 = vcombine.high %v2979_v56, %v5410_v45 }
 0x226   : > { %3092 = vrot.lane.b32.xlu1 %v3038_v4, %s3695_s9  ;;  %3354 = vmatpush1.msk.msra.mxu0 %vm816_vm14, %v802_v39  ;;  %v3022_v4 = vrot.slane %v3008_v63, %v3967_v33  ;;  %s3231_s9 = sshll.u32 %s246_s7, 4  ;;  %s3232_s9 = int_to_ptr.vmem [resolvable:$true] %s3231_s9 }
 0x227   : > { %3355 = vmatmul.mubr.msk.f32.vlgmr.msra.gmra.mxu0 %vm813_vm15, %v5444_v3  ;;  %v1175_v12 = vpop.permute.xlu0 %1174  ;;  %v2725_v22 = vrot.slane %v2711_v46, %v4126_v25  ;;  %v2986_v3 = vrot.slane %v2972_v57, %v4126_v25  ;;  %v5457_v57 = vld [vmem:[#allocation16_spill] sm:$0xff]  ;;  %s3594_s29 = scalar_lea.vmem %s3232_s9, 256 }
 0x228   : > { %v1195_v9 = vpop.permute.xlu1 %1194  ;;  %1293 = vmatprep.mubr.f32.mxu0 %v5410_v45  ;;  %p3595_p12 = scmp.ne.s32.totalorder %s3232_s9, %s3594_s29 }
 0x229   : > { %v1216_v26 = vsel %vm559_vm11, %v1215_v49, %v1195_v9  ;;  %2747 = vrot.lane.b32.xlu0 %v2660_v38, %s3701_s4  ;;  %v2729_v38 = vcombine.high %v2725_v22, %v5410_v45  ;;  %v5447_v9 = vld [vmem:[#allocation30_spill] sm:$0xff] }
 0x22a   : > { %v1217_v20 = vsel %vm561_vm12, %v1216_v26, %v4903_v43  ;;  %2454 = vrot.lane.b32.xlu1 %v2400_v21, %s3702_s8  ;;  %v2728_v43 = vcombine.high %v2718_v31, %v5410_v45  ;;  %v2657_v31 = vrot.slane %v2643_v10, %v4126_v25  ;;  %p3596_p2 = pnand %p3595_p12, %p5462_p13 }
 0x22b   : > { %v5097_v44 = vpop.permute.xlu0 %1816  ;;  %v1218_v15 = vsel %vm563_vm13, %v1217_v20, %v1203_v30  ;;  %v5449_v20 = vld [vmem:[#allocation15_spill] sm:$0xff] }
 0x22c   : > { %v1167_v28 = vpop.permute.xlu1 %1166  ;;  %3359 = vmatprep.subr.msk.mxu0 %vm816_vm14, %v1218_v15  ;;  %v2661_v61 = vcombine.high %v2657_v31, %v5410_v45  ;;  %v1502_v10 = vsel %vm551_vm7, %v5449_v20, %v5448_v27  ;;  %v5450_v15 = vld [vmem:[#allocation31_spill] sm:$0xff]  ;;  %p3597_p4 = pneg %p3596_p2 }
 0x22d   : > { %v1209_v40 = vsel %vm559_vm11, %v1208_v52, %v1167_v28  ;;  %3068 = vrot.lane.b32.xlu0 %v2988_v19, %s3696_s11  ;;  %v1503_v19 = vsel %vm553_vm8, %v1502_v10, %v5450_v15  ;;  %v5459_v27 = vld [vmem:[#allocation35_spill] sm:$0xff] }
 0x22e   : > { %v1210_v30 = vsel %vm561_vm12, %v1209_v40, %v4932_v35  ;;  %2775 = vrot.lane.b32.xlu1 %v2728_v43, %s3701_s4  ;;  %v1513_v35 = vsel %vm559_vm11, %v1512_v50, %v4764_v62  ;;  %v5451_v43 = vld [vmem:[#allocation36_spill] sm:$0xff]  ;;  %v5452_v50 = vld [vmem:[#allocation37_spill] sm:$0xff] }
 0x22f   : > { %v5113_v24 = vpop.permute.xlu0 %2137  ;;  %v1211_v41 = vsel %vm563_vm13, %v1210_v30, %v1175_v12  ;;  %v1514_v32 = vsel %vm561_vm12, %v1513_v35, %v4796_v42  ;;  %v3006_v42 = vrot.slane %v2992_v5, %v3967_v33  ;;  %v5453_v35 = vld [vmem:[#allocation33_spill] sm:$0xff] }
 0x230   : > { %v5119_v0 = vpop.permute.xlu1 %1776  ;;  %3360 = vmatpush1.msk.msra.mxu0 %vm816_vm14, %v1211_v41 }
 0x231   : > { %2751 = vrot.lane.b32.xlu0 %v2657_v31, %s3699_s27  ;;  %v3039_v6 = vcombine.low %v3006_v42, %v3022_v4  ;;  %v3040_v49 = vcombine.high %v3006_v42, %v3022_v4  ;;  %v5456_v42 = vld [vmem:[#allocation22_spill] sm:$0xff] }
 0x232   : > { %3096 = vrot.lane.b32.xlu1 %v3056_v18, %s3696_s11  ;;  %v2990_v18 = vcombine.high %v2986_v3, %v5410_v45 }
 0x233   : > { %v1500_v2 = vpop.permute.xlu0 %1499  ;;  %v3047_v39 = vrot.slane %v3039_v6, %v4126_v25  ;;  %v3054_v52 = vrot.slane %v3040_v49, %v4126_v25 }
 0x234   : > { %v1515_v62 = vsel %vm563_vm13, %v1514_v32, %v1500_v2  ;;  %v5136_v14 = vpop.permute.xlu1 %2133  ;;  %v5454_v2 = vld [vmem:[#allocation27_spill] sm:$0xff] }
 0x235   : > { %3072 = vrot.lane.b32.xlu0 %v2979_v56, %s3697_s21  ;;  %3362 = vmatprep.subr.msk.mxu1 %vm816_vm14, %v1515_v62  ;;  %v3057_v60 = vcombine.high %v3047_v39, %v5410_v45  ;;  %v3058_v31 = vcombine.high %v3054_v52, %v5410_v45  ;;  %v1831_v56 = vsel %vm551_vm7, %v5454_v2, %v5119_v0  ;;  %v5455_v62 = vld [vmem:[#allocation25_spill] sm:$0xff] }
 0x236   : > { %2426 = vrot.lane.b32.xlu1 %v2332_v34, %s3702_s8  ;;  %v1838_v34 = vsel %vm551_vm7, %v5455_v62, %v5031_v53  ;;  %v1832_v6 = vsel %vm553_vm8, %v1831_v56, %v5456_v42 }
 0x237   : > { %v5144_v16 = vpop.permute.xlu0 %1820 }
 0x238   : > { %v5146_v48 = vpop.permute.xlu1 %1784 }
 0x239   : > { %2471 = vrot.lane.b32.xlu0 %v4232_v58, %s3706_s26 }
 0x23a   : > { %2779 = vrot.lane.b32.xlu1 %v2725_v22, %s3699_s27 }
 0x23b   : > { %v5151_v54 = vpop.permute.xlu0 %2141 }
 0x23c   : > { %v2106_v33 = vpop.permute.xlu1 %2105 }
 0x23d   : > { %3076 = vrot.lane.b32.xlu0 %v2989_v11, %s3701_s4  ;;  %v2160_v21 = vsel %vm551_vm7, %v5447_v9, %v2106_v33  ;;  %v1839_v11 = vsel %vm553_vm8, %v1838_v34, %v5457_v57  ;;  %v1833_v33 = vsel %vm555_vm9, %v1832_v6, %v5146_v48 }
 0x23e   : > { %3100 = vrot.lane.b32.xlu1 %v3047_v39, %s3697_s21  ;;  %v1840_v0 = vsel %vm555_vm9, %v1839_v11, %v5054_v37 }
 0x23f   : > { %v1220_v23 = vpop.permute.xlu0 %1219 }
 0x240   : > { %v1468_v12 = vpop.permute.xlu1 %1467  ;;  %3361 = vmatmul.mubr.msk.f32.vlgmr.msra.gmra.mxu0 %vm813_vm15, %v1220_v23 }
 0x241   : > { %3080 = vrot.lane.b32.xlu0 %v2986_v3, %s3699_s27  ;;  %1919 = vmatprep.mubr.f32.mxu0 %v5410_v45  ;;  %v1841_v3 = vsel %vm557_vm10, %v1840_v0, %v5097_v44 }
 0x242   : > { %2783 = vrot.lane.b32.xlu1 %v2729_v38, %s3702_s8  ;;  %v1842_v53 = vsel %vm559_vm11, %v1841_v3, %v5144_v16  ;;  %v5458_v16 = vld [vmem:[#allocation29_spill] sm:$0xff] }
 0x243   : > { %v1793_v47 = vpop.permute.xlu0 %1792  ;;  %v2167_v9 = vsel %vm551_vm7, %v5458_v16, %v5136_v14 }
 0x244   : > { %v1789_v8 = vpop.permute.xlu1 %1788 }
 0x245   : > { %2800 = vrot.lane.b32.xlu0 %v4232_v58, %s3707_s28  ;;  %v1834_v23 = vsel %vm557_vm10, %v1833_v33, %v1789_v8 }
 0x246   : > { %3104 = vrot.lane.b32.xlu1 %v3057_v60, %s3701_s4  ;;  %v1835_v38 = vsel %vm559_vm11, %v1834_v23, %v1793_v47  ;;  %s3598_s4 = sshll.u32 %s3708_s15, 4  ;;  %s3599_s4 = int_to_ptr.vmem [resolvable:$false] %s3598_s4 }
 0x247   : > { %v2114_v7 = vpop.permute.xlu0 %2113  ;;  %p3601_p10 = scmp.lt.s32.totalorder %s3232_s9, %s3599_s4 }
 0x248   : > { %v2110_v55 = vpop.permute.xlu1 %2109 }
 0x249   : > { %v2161_v51 = vsel %vm553_vm8, %v2160_v21, %v2110_v55  ;;  %3129 = vrot.lane.b32.xlu0 %v4232_v58, %s3699_s27  ;;  %v1504_v58 = vsel %vm555_vm9, %v1503_v19, %v4838_v17  ;;  %v2168_v55 = vsel %vm553_vm8, %v2167_v9, %v5113_v24 }
 0x24a   : > { %2755 = vrot.lane.b32.xlu1 %v2661_v61, %s3702_s8  ;;  %v5174_v26 = vsel %vm555_vm9, %v2161_v51, %v2114_v7  ;;  %v1505_v13 = vsel %vm557_vm10, %v1504_v58, %v5451_v43  ;;  %v2169_v61 = vsel %vm555_vm9, %v2168_v55, %v5151_v54 }
 0x24b   : > { %v2403_v59 = vpop.permute.xlu0 %2402  ;;  %v1506_v40 = vsel %vm559_vm11, %v1505_v13, %v5452_v50 }
 0x24c   : > { %v5181_v28 = vpop.permute.xlu1 %2430  ;;  %v1507_v36 = vsel %vm561_vm12, %v1506_v40, %v1468_v12  ;;  %v2457_v5 = vsel %vm551_vm7, %v5453_v35, %v2403_v59 }
 0x24e   : > { %3108 = vrot.lane.b32.xlu1 %v3054_v52, %s3699_s27  ;;  %s3215_s27 = scalar_lea.sflag [#allocation5], %s3856_s5 }
 0x24f   : > { %v1797_v30 = vpop.permute.xlu0 %1796 }
 0x250   : > { %v1472_v41 = vpop.permute.xlu1 %1471  ;;  %v1836_v48 = vsel %vm561_vm12, %v1835_v38, %v1797_v30 }
 0x251   : > { %v1508_v63 = vsel %vm563_vm13, %v1507_v36, %v1472_v41 }
 0x252   : > { %3112 = vrot.lane.b32.xlu1 %v3058_v31, %s3702_s8  ;;  %3363 = vmatpush1.msk.msra.mxu1 %vm816_vm14, %v1508_v63 }
 0x253   : > { %v5196_v25 = vpop.permute.xlu0 %2117 }
 0x254   : > { %v1825_v17 = vpop.permute.xlu1 %1824  ;;  %v2163_v35 = vsel %vm557_vm10, %v5174_v26, %v5196_v25 }
 0x255   : > { %v1843_v60 = vsel %vm561_vm12, %v1842_v53, %v1825_v17 }
 0x256   : > { %3084 = vrot.lane.b32.xlu1 %v2990_v18, %s3702_s8  ;;  %s3600_s8 = scalar_lea.vmem %s3599_s4, 512 }
 0x257   : > { %v2407_v32 = vpop.permute.xlu0 %2406  ;;  %p3602_p1 = scmp.lt.s32.totalorder %s3600_s8, %s3594_s29 }
 0x258   : > { %v5206_v46 = vsel %vm553_vm8, %v2457_v5, %v2407_v32  ;;  %v2146_v4 = vpop.permute.xlu1 %2145 }
 0x259   : > { %v2170_v51 = vsel %vm557_vm10, %v2169_v61, %v2146_v4  ;;  %p3603_p8 = por %p3602_p1, %p3601_p10 }
 0x25b   : > { %v2760_v22 = vpop.permute.xlu0 %2759  ;;  %p3604_p6 = pnand %p3603_p8, %p3597_p4 }
 0x25c   : > { %v2435_v39 = vpop.permute.xlu1 %2434  ;;  %v2793_v20 = vsel %vm551_vm7, %v5459_v27, %v2760_v22  ;;  %v5460_v22 = vld [vmem:[#allocation34_spill] sm:$0xff] }
 0x25d   : > { %v2464_v57 = vsel %vm551_vm7, %v5460_v22, %v5181_v28 }
 0x25e   : > { %v2465_v26 = vsel %vm553_vm8, %v2464_v57, %v2435_v39 }
 0x25f   : > { %v1801_v12 = vpop.permute.xlu0 %1800 }
 0x260   : > { %v1829_v7 = vpop.permute.xlu1 %1828  ;;  %v1837_v37 = vsel %vm563_vm13, %v1836_v48, %v1801_v12 }
 0x261   : > { %v1844_v49 = vsel %vm563_vm13, %v1843_v60, %v1829_v7 }
 0x262   : > { %3365 = vmatprep.subr.msk.mxu0 %vm816_vm14, %v1844_v49 }
 0x263   : > { %3366 = vmatpush1.msk.msra.mxu0 %vm816_vm14, %v1837_v37  ;;  %v2154_v44 = vpop.permute.xlu0 %2153 }
 0x264   : > { %v2150_v8 = vpop.permute.xlu1 %2149 }
 0x265   : > { %v2171_v59 = vsel %vm559_vm11, %v2170_v51, %v2150_v8 }
 0x266   : > { %v2172_v24 = vsel %vm561_vm12, %v2171_v59, %v2154_v44  ;;  %v5461_v59 = vld [vmem:[#allocation17_spill] sm:$0xff] }
 0x267   : > { %v2443_v47 = vpop.permute.xlu0 %2442 }
 0x268   : > { %v2439_v21 = vpop.permute.xlu1 %2438 }
 0x269   : > { %v2466_v25 = vsel %vm555_vm9, %v2465_v26, %v2439_v21 }
 0x26a   : > { %v2467_v0 = vsel %vm557_vm10, %v2466_v25, %v2443_v47 }
 0x26b   : > { %v2764_v10 = vpop.permute.xlu0 %2763 }
 0x26c   : > { %v5243_v15 = vsel %vm553_vm8, %v2793_v20, %v2764_v10  ;;  %v1517_v14 = vpop.permute.xlu1 %1516 }
 0x26d   : > { %3364 = vmatmul.mubr.msk.f32.vlgmr.msra.gmra.mxu1 %vm813_vm15, %v1517_v14 }
 0x26e   : > { %2248 = vmatprep.mubr.f32.mxu1 %v5410_v45 }
 0x26f   : > { %v2158_v19 = vpop.permute.xlu0 %2157 }
 0x270   : > { %v2173_v54 = vsel %vm563_vm13, %v2172_v24, %v2158_v19  ;;  %v2122_v52 = vpop.permute.xlu1 %2121 }
 0x271   : > { %3368 = vmatprep.subr.msk.mxu1 %vm816_vm14, %v2173_v54  ;;  %v2164_v5 = vsel %vm559_vm11, %v2163_v35, %v2122_v52 }
 0x273   : > { %v2447_v58 = vpop.permute.xlu0 %2446 }
 0x274   : > { %v2411_v43 = vpop.permute.xlu1 %2410  ;;  %v2468_v23 = vsel %vm559_vm11, %v2467_v0, %v2447_v58 }
 0x275   : > { %v2459_v60 = vsel %vm555_vm9, %v5206_v46, %v2411_v43 }
 0x277   : > { %v2768_v13 = vpop.permute.xlu0 %2767 }
 0x278   : > { %v2732_v50 = vpop.permute.xlu1 %2731  ;;  %v2795_v55 = vsel %vm555_vm9, %v5243_v15, %v2768_v13 }
 0x279   : > { %v2786_v14 = vsel %vm551_vm7, %v5461_v59, %v2732_v50 }
 0x27b   : > { %v1846_v40 = vpop.permute.xlu0 %1845 }
 0x27c   : > { %v2126_v30 = vpop.permute.xlu1 %2125  ;;  %3367 = vmatmul.mubr.msk.f32.vlgmr.msra.gmra.mxu0 %vm813_vm15, %v1846_v40 }
 0x27d   : > { %2545 = vmatprep.mubr.f32.mxu0 %v5410_v45  ;;  %v2165_v2 = vsel %vm561_vm12, %v2164_v5, %v2126_v30 }
 0x27f   : > { %v2419_v36 = vpop.permute.xlu0 %2418 }
 0x280   : > { %v2415_v41 = vpop.permute.xlu1 %2414 }
 0x281   : > { %v2460_v48 = vsel %vm557_vm10, %v2459_v60, %v2415_v41 }
 0x282   : > { %v2461_v37 = vsel %vm559_vm11, %v2460_v48, %v2419_v36 }
 0x283   : > { %v2740_v31 = vpop.permute.xlu0 %2739 }
 0x284   : > { %v2736_v63 = vpop.permute.xlu1 %2735 }
 0x285   : > { %v2787_v19 = vsel %vm553_vm8, %v2786_v14, %v2736_v63 }
 0x286   : > { %v2788_v15 = vsel %vm555_vm9, %v2787_v19, %v2740_v31 }
 0x287   : > { %v5252_v17 = vpop.permute.xlu0 %3060 }
 0x288   : > { %v5254_v18 = vpop.permute.xlu1 %3088  ;;  %v3115_v35 = vsel %vm551_vm7, %v4975_v1, %v5252_v17 }
 0x289   : > { %v3122_v30 = vsel %vm551_vm7, %v4978_v29, %v5254_v18 }
 0x28b   : > { %v2423_v32 = vpop.permute.xlu0 %2422 }
 0x28c   : > { %v2130_v56 = vpop.permute.xlu1 %2129  ;;  %v2462_v8 = vsel %vm561_vm12, %v2461_v37, %v2423_v32 }
 0x28d   : > { %v2166_v4 = vsel %vm563_vm13, %v2165_v2, %v2130_v56 }
 0x28e   : > { %3369 = vmatpush1.msk.msra.mxu1 %vm816_vm14, %v2166_v4 }
 0x28f   : > { %v2744_v62 = vpop.permute.xlu0 %2743 }
 0x290   : > { %v2451_v34 = vpop.permute.xlu1 %2450  ;;  %v2789_v52 = vsel %vm557_vm10, %v2788_v15, %v2744_v62 }
 0x291   : > { %v2469_v53 = vsel %vm561_vm12, %v2468_v23, %v2451_v34 }
 0x293   : > { %v3065_v42 = vpop.permute.xlu0 %3064 }
 0x294   : > { %v2772_v6 = vpop.permute.xlu1 %2771  ;;  %v3116_v32 = vsel %vm553_vm8, %v3115_v35, %v3065_v42 }
 0x295   : > { %v2796_v61 = vsel %vm557_vm10, %v2795_v55, %v2772_v6 }
 0x297   : > { %v2175_v11 = vpop.permute.xlu0 %2174 }
 0x298   : > { %v3093_v33 = vpop.permute.xlu1 %3092  ;;  %3370 = vmatmul.mubr.msk.f32.vlgmr.msra.gmra.mxu1 %vm813_vm15, %v2175_v11 }
 0x299   : > { %2874 = vmatprep.mubr.f32.mxu1 %v5410_v45  ;;  %v3123_v36 = vsel %vm553_vm8, %v3122_v30, %v3093_v33 }
 0x29b   : > { %v2748_v3 = vpop.permute.xlu0 %2747 }
 0x29c   : > { %v2455_v12 = vpop.permute.xlu1 %2454  ;;  %v2790_v58 = vsel %vm559_vm11, %v2789_v52, %v2748_v3 }
 0x29d   : > { %v2470_v28 = vsel %vm563_vm13, %v2469_v53, %v2455_v12 }
 0x29e   : > { %3371 = vmatprep.subr.msk.mxu0 %vm816_vm14, %v2470_v28 }
 0x29f   : > { %v3069_v39 = vpop.permute.xlu0 %3068 }
 0x2a0   : > { %v2776_v38 = vpop.permute.xlu1 %2775  ;;  %v3117_v18 = vsel %vm555_vm9, %v3116_v32, %v3069_v39 }
 0x2a1   : > { %v2797_v27 = vsel %vm559_vm11, %v2796_v61, %v2776_v38 }
 0x2a3   : > { %v2752_v7 = vpop.permute.xlu0 %2751 }
 0x2a4   : > { %v3097_v49 = vpop.permute.xlu1 %3096  ;;  %v2791_v43 = vsel %vm561_vm12, %v2790_v58, %v2752_v7 }
 0x2a5   : > { %v3124_v31 = vsel %vm555_vm9, %v3123_v36, %v3097_v49 }
 0x2a7   : > { %v3073_v44 = vpop.permute.xlu0 %3072  ;;  %v968_v22 = vpop.f32.mrf.mxu1 }
 0x2a8   : > { %v2427_v16 = vpop.permute.xlu1 %2426  ;;  %v3118_v4 = vsel %vm557_vm10, %v3117_v18, %v3073_v44 }
 0x2a9   : > { %v2463_v9 = vsel %vm563_vm13, %v2462_v8, %v2427_v16  ;;  %v970_v26 = vpop.f32.mrf.mxu1 }
 0x2aa   : > { %3372 = vmatpush1.msk.msra.mxu0 %vm816_vm14, %v2463_v9 }
 0x2ab   : > { %v2472_v47 = vpop.permute.xlu0 %2471 }
 0x2ac   : > { %v2780_v21 = vpop.permute.xlu1 %2779  ;;  %3373 = vmatmul.mubr.msk.f32.vlgmr.msra.gmra.mxu0 %vm813_vm15, %v2472_v47 }
 0x2ad   : > { %3203 = vmatprep.mubr.f32.mxu0 %v5410_v45  ;;  %v2798_v20 = vsel %vm561_vm12, %v2797_v27, %v2780_v21 }
 0x2af   : > { %v3077_v51 = vpop.permute.xlu0 %3076 }
 0x2b0   : > { %v3101_v46 = vpop.permute.xlu1 %3100  ;;  %v3119_v62 = vsel %vm559_vm11, %v3118_v4, %v3077_v51 }
 0x2b1   : > { %v3125_v63 = vsel %vm557_vm10, %v3124_v31, %v3101_v46 }
 0x2b3   : > { %v3081_v45 = vpop.permute.xlu0 %3080 }
 0x2b4   : > { %v2784_v10 = vpop.permute.xlu1 %2783  ;;  %v3120_v34 = vsel %vm561_vm12, %v3119_v62, %v3081_v45 }
 0x2b5   : > { %v2799_v24 = vsel %vm563_vm13, %v2798_v20, %v2784_v10 }
 0x2b6   : > { %3374 = vmatprep.subr.msk.mxu1 %vm816_vm14, %v2799_v24 }
 0x2b7   : > { %v2801_v50 = vpop.permute.xlu0 %2800 }
 0x2b8   : > { %v3105_v54 = vpop.permute.xlu1 %3104 }
 0x2b9   : > { %v3126_v5 = vsel %vm559_vm11, %v3125_v63, %v3105_v54 }
 0x2bb   : > { %v3130_v6 = vpop.permute.xlu0 %3129 }
 0x2bc   : > { %v2756_v13 = vpop.permute.xlu1 %2755 }
 0x2bd   : > { %v2792_v40 = vsel %vm563_vm13, %v2791_v43, %v2756_v13 }
 0x2be   : > { %3375 = vmatpush1.msk.msra.mxu1 %vm816_vm14, %v2792_v40 }
 0x2bf   : > { %3376 = vmatmul.mubr.msk.f32.vlgmr.msra.gmra.mxu1 %vm813_vm15, %v2801_v50 }
 0x2c0   : > { %v3109_v41 = vpop.permute.xlu1 %3108 }
 0x2c1   : > { %v3127_v2 = vsel %vm561_vm12, %v3126_v5, %v3109_v41 }
 0x2c4   : > { %v3113_v29 = vpop.permute.xlu1 %3112 }
 0x2c5   : > { %v3128_v56 = vsel %vm563_vm13, %v3127_v2, %v3113_v29 }
 0x2c6   : > { %3377 = vmatprep.subr.msk.mxu0 %vm816_vm14, %v3128_v56 }
 0x2c8   : > { %v3085_v1 = vpop.permute.xlu1 %3084 }
 0x2c9   : > { %v3121_v17 = vsel %vm563_vm13, %v3120_v34, %v3085_v1 }
 0x2ca   : > { %3378 = vmatpush1.msk.msra.mxu0 %vm816_vm14, %v3121_v17 }
 0x2cb   : > { %3379 = vmatmul.mubr.msk.f32.vlgmr.msra.gmra.mxu0 %vm813_vm15, %v3130_v6 }
 0x2e7   : > { %v889_v42 = vpop.f32.mrf.mxu0 }
 0x2e8   : > { %v969_v3 = vadd.f32 %v968_v22, %v889_v42 }
 0x2e9   : > { %v891_v57 = vpop.f32.mrf.mxu0 }
 0x2ea   : > { %v971_v12 = vadd.f32 %v970_v26, %v891_v57 }
 0x300   : > { %v1295_v25 = vpop.f32.mrf.mxu0 }
 0x301   : > { %v1300_v28 = vadd.f32 %v1295_v25, %v969_v3 }
 0x302   : > { %v1297_v33 = vpop.f32.mrf.mxu0 }
 0x303   : > { %v1301_v38 = vadd.f32 %v1297_v33, %v971_v12 }
 0x32d   : > { %v1592_v11 = vpop.f32.mrf.mxu1 }
 0x32e   : > { %v1597_v60 = vadd.f32 %v1592_v11, %v1300_v28 }
 0x32f   : > { %v1594_v0 = vpop.f32.mrf.mxu1 }
 0x330   : > { %v1598_v49 = vadd.f32 %v1594_v0, %v1301_v38 }
 0x33c   : > { %v1921_v23 = vpop.f32.mrf.mxu0 }
 0x33d   : > { %v1926_v37 = vadd.f32 %v1921_v23, %v1597_v60 }
 0x33e   : > { %v1923_v39 = vpop.f32.mrf.mxu0 }
 0x33f   : > { %v1927_v8 = vadd.f32 %v1923_v39, %v1598_v49 }
 0x358   : > { %v2250_v53 = vpop.f32.mrf.mxu1 }
 0x359   : > { %v2255_v16 = vadd.f32 %v2250_v53, %v1926_v37 }
 0x35a   : > { %v2252_v7 = vpop.f32.mrf.mxu1 }
 0x35b   : > { %v2256_v47 = vadd.f32 %v2252_v7, %v1927_v8 }
 0x36c   : > { %v2547_v48 = vpop.f32.mrf.mxu0 }
 0x36d   : > { %v2552_v21 = vadd.f32 %v2547_v48, %v2255_v16 }
 0x36e   : > { %v2549_v9 = vpop.f32.mrf.mxu0 }
 0x36f   : > { %v2553_v55 = vadd.f32 %v2549_v9, %v2256_v47 }
 0x37f   : > { %v2876_v44 = vpop.f32.mrf.mxu1 }
 0x380   : > { %v2881_v61 = vadd.f32 %v2876_v44, %v2552_v21 }
 0x381   : > { %v2878_v46 = vpop.f32.mrf.mxu1 }
 0x382   : > { %v2882_v27 = vadd.f32 %v2878_v46, %v2553_v55 }
 0x38b   : > { %v3205_v51 = vpop.f32.mrf.mxu0 }
 0x38c   : > { %v3210_v20 = vadd.f32 %v3205_v51, %v2881_v61 }
 0x38d   : > { %v3207_v10 = vpop.f32.mrf.mxu0 }
 0x38e   : > { %3212 = vst [vmem:[%s246_s7] sm:$0xff] %v3210_v20  ;;  %v3211_v59 = vadd.f32 %v3207_v10, %v2882_v27 }
 0x390   : > { %3213 = vst [vmem:[%s246_s7 + $0x8] sm:$0xff] %v3211_v59 }
 0x391   : > { %3607 = shalt.err (!%p3604_p6)
}
 0x392   : > { %s3608_s30 = scalar_lea.hbm %s3229_s10, 256  ;;  %s3612_s6 = scalar_lea.hbm %s5366_s3, 512 }
 0x393   : > { %p3609_p9 = scmp.ne.s32.totalorder %s3229_s10, %s3608_s30  ;;  %p3613_p7 = scmp.lt.s32.totalorder %s3229_s10, %s5366_s3 }
 0x394   : > { %p3614_p5 = scmp.lt.s32.totalorder %s3612_s6, %s3608_s30 }
 0x395   : > { %p3610_p0 = pnand %p3609_p9, %p5462_p13 }
 0x396   : > { %p3615_p11 = por %p3614_p5, %p3613_p7 }
 0x397   : > { %p3611_p3 = pneg %p3610_p0 }
 0x399   : > { %p3616_p12 = pnand %p3615_p11, %p3611_p3 }
 0x39b   : > { %3619 = shalt.err (!%p3616_p12)
}
 0x39c   : > { %3395 = dma.vmem_to_hbm [thread:$0]  (%p5462_p13), %s3232_s9, 256, %s3229_s10, %s3215_s27  }
 0x39d PF: > { %s3243_s20 = sand.u32 1, %s3662_s12   ;;  %p5463_p2 = scmp.ne.s32.totalorder %s5395_s25, 0 }
 0x39e   : > { %p5464_p4 = scmp.ge.s32.totalorder %s3682_s17, 2  ;;  %s3244_s22 = scalar_lea.sflag [#allocation5], %s3243_s20 }
 0x3a0   : > { %p3409_p10 = pnand %p5464_p4, %p5463_p2 }
 0x3a2   : > { %p3410_p1 = pneg %p3409_p10 }
 0x3a4   : > { %3657 = dma.done.wait (%p3410_p1), %s3244_s22, 256  }
 0x3a5   : > { %3659 = vsyncadd (%p3410_p1), %s3244_s22, 4294967040  ;;  %s20_s17 = sadd.s32 1, %s3682_s17   ;;  %s5465_s12 = smov %s3666_s13 }
 0x3a6   : > { %p17_p8 = scmp.ge.s32.totalorder %s20_s17, 4   ;;  %s5466_s13 = smov %s3670_s14 }
 0x3a7   : > { %s5467_s14 = smov %s3777_s24  ;;  %s5468_s15 = smov %s3678_s16 }
 0x3a8   : > { %s5469_s16 = smov %s5471_s18  ;;  %19 = sbr.rel (!%p17_p8) target bundleno = 7 (0x7), region = 92 }
 0x3ad   :  { %3249 = vsyncpa [#allocation4], 1 }
 0x3ae   :  { %3251 = vsyncpa [#allocation4 + $0x1], 1 }
 0x3af   :  { %3252 = vsyncpa [#allocation7], 1 }
 0x3b0   :  { %3253 = vsyncpa [#allocation5], 1 }
 0x3b1   :  { %3255 = vsyncpa [#allocation5 + $0x1], 1 }

</bundles_post_ra>
